<compile_context>
chip_gen: v7x
topology: tpu7x:2x2x1
jax: 0.10.0
libtpu: 0.0.40
codegen_flags: <defaults>
</compile_context>

<pallas_src>
import math
import numpy as np
import jax
import jax.numpy as jnp
from jax.experimental import pallas as pl
from jax.experimental.pallas import tpu as pltpu

# default_params(): n_channel=1, num_filter=12, weight_std=1e-4, pool='max'
N_CHANNEL = 1
NUM_FILTER = 12
WEIGHT_STD = 1e-4
KSIZE = 9
STRIDE = 2
POOL_K = 4
POOL_S = 2
IMG = 20                                        # 20x20 image
CONV_OUT = (IMG - KSIZE) // STRIDE + 1          # 6
POOL_OUT = (CONV_OUT - POOL_K) // POOL_S + 1    # 2

TB = 512   # samples per grid step (lane axis; multiple of 128, VMEM-safe on v5e/v6e/v7x)


def _single_neuron_kernel(img_ref, wd_ref, bvec_ref, wf_ref, bf_ref, out_ref):
    # img_ref : (1, CHW, TB)     raw images, samples in lanes
    # wd_ref  : (E*Q*F, CHW)     conv lowered to dense matmul, pool-window duplicated
    # bvec_ref: (E*Q*F, 1)       conv bias per output row
    # wf_ref  : (1, Q*F)         FC weight in (i, j, f) order
    # bf_ref  : (1, 1)           FC bias
    # out_ref : (1, 1, TB)       lane-dense per-sample outputs
    conv = jnp.dot(wd_ref[...], img_ref[0],
                   preferred_element_type=jnp.float32)          # (E*Q*F, TB)
    conv = jnp.maximum(conv + bvec_ref[...], 0.0)               # bias + ReLU

    qf = wf_ref.shape[1]                 # Q*F = 48 -> 8-aligned sublane groups
    n_e = wd_ref.shape[0] // qf          # 16 pool-window elements
    pooled = conv[0:qf, :]
    for e in range(1, n_e):              # fused MaxPool: 15 whole-tile vmax ops
        pooled = jnp.maximum(pooled, conv[e * qf:(e + 1) * qf, :])

    out = jnp.dot(wf_ref[...], pooled,
                  preferred_element_type=jnp.float32) + bf_ref[...]   # (1, TB)
    out_ref[0] = out


def single_neuron_forward(x, w_conv, b_conv, w_fc, b_fc):
    """x: (N, C, H, W) NCHW, like PyTorch. Returns (N, 1)."""
    N, C, H, W = x.shape
    F = w_conv.shape[0]
    OH = (H - KSIZE) // STRIDE + 1
    OW = (W - KSIZE) // STRIDE + 1
    PH = (OH - POOL_K) // POOL_S + 1
    PW = (OW - POOL_K) // POOL_S + 1
    Q = PH * PW                      # pooled spatial positions (4)
    E = POOL_K * POOL_K              # pool-window elements (16)
    CHW = C * H * W
    R = E * Q * F                    # 768 conv-output rows (pool-window duplicated)

    # --- glue: lower conv + pool-window gather into one dense weight matrix ---
    ii, jj, di, dj, ff, cc, kh, kw = np.meshgrid(
        np.arange(PH), np.arange(PW), np.arange(POOL_K), np.arange(POOL_K),
        np.arange(F), np.arange(C), np.arange(KSIZE), np.arange(KSIZE),
        indexing="ij")
    rows = (di * POOL_K + dj) * (Q * F) + (ii * PW + jj) * F + ff
    hh = STRIDE * (POOL_S * ii + di) + kh
    ww = STRIDE * (POOL_S * jj + dj) + kw
    cols = cc * (H * W) + hh * W + ww
    vals = w_conv[ff, cc, kh, kw].astype(jnp.float32)
    wd = jnp.zeros((R, CHW), jnp.float32).at[rows, cols].set(vals)
    bvec = jnp.tile(b_conv.astype(jnp.float32), E * Q).reshape(R, 1)
    # PyTorch flattens pooled (F, PH, PW) as f*Q + i*PW + j; kernel consumes (i, j, f).
    wf_row = w_fc.reshape(F, PH, PW).transpose(1, 2, 0).reshape(1, Q * F).astype(jnp.float32)
    bf = b_fc.reshape(1, 1).astype(jnp.float32)

    # --- glue: batch-tile + transpose so samples sit in the lane axis ---
    G = pl.cdiv(N, TB)
    n_pad = G * TB
    xf = x.reshape(N, CHW).astype(jnp.float32)
    xf = jnp.pad(xf, ((0, n_pad - N), (0, 0)))
    xt = xf.reshape(G, TB, CHW).transpose(0, 2, 1)          # (G, CHW, TB)

    out = pl.pallas_call(
        _single_neuron_kernel,
        out_shape=jax.ShapeDtypeStruct((G, 1, TB), jnp.float32),
        grid_spec=pltpu.PrefetchScalarGridSpec(
            num_scalar_prefetch=0,
            grid=(G,),
            in_specs=[
                pl.BlockSpec((1, CHW, TB), lambda n: (n, 0, 0)),
                pl.BlockSpec((R, CHW), lambda n: (0, 0)),
                pl.BlockSpec((R, 1), lambda n: (0, 0)),
                pl.BlockSpec((1, Q * F), lambda n: (0, 0)),
                pl.BlockSpec((1, 1), lambda n: (0, 0)),
            ],
            out_specs=pl.BlockSpec((1, 1, TB), lambda n: (n, 0, 0)),
        ),
        compiler_params=pltpu.CompilerParams(
            dimension_semantics=("parallel",),
            vmem_limit_bytes=32 * 1024 * 1024),
    )(xt, wd, bvec, wf_row, bf)
    return out.reshape(n_pad)[:N].reshape(N, 1)


def reference_forward(x, w_conv, b_conv, w_fc, b_fc):
    """Pure-JAX reference with exact PyTorch semantics (NCHW, OIHW)."""
    conv = jax.lax.conv_general_dilated(
        x, w_conv, window_strides=(STRIDE, STRIDE), padding="VALID",
        dimension_numbers=("NCHW", "OIHW", "NCHW"))
    conv = conv + b_conv[None, :, None, None]
    conv = jnp.maximum(conv, 0.0)
    pooled = jax.lax.reduce_window(
        conv, -jnp.inf, jax.lax.max,
        window_dimensions=(1, 1, POOL_K, POOL_K),
        window_strides=(1, 1, POOL_S, POOL_S), padding="VALID")
    flat = pooled.reshape(x.shape[0], -1)                 # PyTorch view(N, 2*2*F)
    return flat @ w_fc.T + b_fc[None, :]


if __name__ == "__main__":
    key = jax.random.PRNGKey(0)
    kx, kw, kf, kb1, kb2 = jax.random.split(key, 5)
    N = 2
    x = jax.random.normal(kx, (N, N_CHANNEL, IMG, IMG), dtype=jnp.float32)

    # conv weight ~ N(0, sqrt(2/(k*k*F))) as in initialize_weights(); small nonzero
    # biases used here to exercise the bias paths of the kernel.
    conv_std = math.sqrt(2.0 / (KSIZE * KSIZE * NUM_FILTER))
    w_conv = conv_std * jax.random.normal(kw, (NUM_FILTER, N_CHANNEL, KSIZE, KSIZE), dtype=jnp.float32)
    b_conv = 0.05 * jax.random.normal(kb1, (NUM_FILTER,), dtype=jnp.float32)
    w_fc = WEIGHT_STD * jax.random.normal(kf, (1, POOL_OUT * POOL_OUT * NUM_FILTER), dtype=jnp.float32)
    b_fc = 0.01 * jax.random.normal(kb2, (1,), dtype=jnp.float32)

    out = single_neuron_forward(x, w_conv, b_conv, w_fc, b_fc)
    out = jax.block_until_ready(out)

    ref = reference_forward(x, w_conv, b_conv, w_fc, b_fc)
    assert out.shape == (N, 1), out.shape
    assert jnp.allclose(out, ref, rtol=1e-4, atol=2e-6), (out, ref)
    print("KERNEL_OK")
</pallas_src>

<mosaic_0001>
module attributes {stable_mosaic.version = 11 : i64} {
  func.func @_single_neuron_kernel(%arg0: i32, %arg1: memref<1x400x512xf32, #tpu.memory_space<vmem>>, %arg2: memref<768x400xf32, #tpu.memory_space<vmem>>, %arg3: memref<768x1xf32, #tpu.memory_space<vmem>>, %arg4: memref<1x48xf32, #tpu.memory_space<vmem>>, %arg5: memref<1x1xf32, #tpu.memory_space<vmem>>, %arg6: memref<1x1x512xf32, #tpu.memory_space<vmem>>) attributes {dimension_semantics = [#tpu.dimension_semantics<parallel>], iteration_bounds = array<i64: 1>, scalar_prefetch = 0 : i64, scratch_operands = 0 : i64, tpu.core_type = #tpu.core_type<tc>, window_params = [{transform_indices = @transform_0, window_bounds = array<i64: 1, 400, 512>}, {pipeline_mode = #tpu.pipeline_mode<synchronous>, transform_indices = @transform_1, window_bounds = array<i64: 768, 400>}, {pipeline_mode = #tpu.pipeline_mode<synchronous>, transform_indices = @transform_2, window_bounds = array<i64: 768, 1>}, {pipeline_mode = #tpu.pipeline_mode<synchronous>, transform_indices = @transform_3, window_bounds = array<i64: 1, 48>}, {pipeline_mode = #tpu.pipeline_mode<synchronous>, transform_indices = @transform_4, window_bounds = array<i64: 1, 1>}, {transform_indices = @transform_5, window_bounds = array<i64: 1, 1, 512>}]} {
    %c0 = arith.constant 0 : index
    %c0_0 = arith.constant 0 : index
    %0 = vector.load %arg2[%c0, %c0_0] : memref<768x400xf32, #tpu.memory_space<vmem>>, vector<768x400xf32>
    %c0_1 = arith.constant 0 : index
    %c0_2 = arith.constant 0 : index
    %c0_3 = arith.constant 0 : index
    %1 = vector.load %arg1[%c0_1, %c0_2, %c0_3] : memref<1x400x512xf32, #tpu.memory_space<vmem>>, vector<1x400x512xf32>
    %2 = vector.shape_cast %1 : vector<1x400x512xf32> to vector<400x512xf32>
    %cst = arith.constant dense<0.000000e+00> : vector<768x512xf32>
    %3 = tpu.matmul %0, %2, %cst {dimension_numbers = #tpu.dot_dimension_numbers<[1], [0], [0], [1], [0, 0, 1, 1], [], []>} : vector<768x400xf32>, vector<400x512xf32>, vector<768x512xf32> -> vector<768x512xf32>
    %c0_4 = arith.constant 0 : index
    %c0_5 = arith.constant 0 : index
    %4 = vector.load %arg3[%c0_4, %c0_5] : memref<768x1xf32, #tpu.memory_space<vmem>>, vector<768x1xf32>
    %5 = vector.broadcast %4 : vector<768x1xf32> to vector<768x512xf32>
    %6 = arith.addf %3, %5 : vector<768x512xf32>
    %cst_6 = arith.constant 0.000000e+00 : f32
    %7 = vector.broadcast %cst_6 : f32 to vector<768x512xf32>
    %8 = arith.maximumf %6, %7 : vector<768x512xf32>
    %9 = vector.extract_strided_slice %8 {offsets = [0, 0], sizes = [48, 512], strides = [1, 1]} : vector<768x512xf32> to vector<48x512xf32>
    %10 = vector.extract_strided_slice %8 {offsets = [48, 0], sizes = [48, 512], strides = [1, 1]} : vector<768x512xf32> to vector<48x512xf32>
    %11 = arith.maximumf %9, %10 : vector<48x512xf32>
    %12 = vector.extract_strided_slice %8 {offsets = [96, 0], sizes = [48, 512], strides = [1, 1]} : vector<768x512xf32> to vector<48x512xf32>
    %13 = arith.maximumf %11, %12 : vector<48x512xf32>
    %14 = vector.extract_strided_slice %8 {offsets = [144, 0], sizes = [48, 512], strides = [1, 1]} : vector<768x512xf32> to vector<48x512xf32>
    %15 = arith.maximumf %13, %14 : vector<48x512xf32>
    %16 = vector.extract_strided_slice %8 {offsets = [192, 0], sizes = [48, 512], strides = [1, 1]} : vector<768x512xf32> to vector<48x512xf32>
    %17 = arith.maximumf %15, %16 : vector<48x512xf32>
    %18 = vector.extract_strided_slice %8 {offsets = [240, 0], sizes = [48, 512], strides = [1, 1]} : vector<768x512xf32> to vector<48x512xf32>
    %19 = arith.maximumf %17, %18 : vector<48x512xf32>
    %20 = vector.extract_strided_slice %8 {offsets = [288, 0], sizes = [48, 512], strides = [1, 1]} : vector<768x512xf32> to vector<48x512xf32>
    %21 = arith.maximumf %19, %20 : vector<48x512xf32>
    %22 = vector.extract_strided_slice %8 {offsets = [336, 0], sizes = [48, 512], strides = [1, 1]} : vector<768x512xf32> to vector<48x512xf32>
    %23 = arith.maximumf %21, %22 : vector<48x512xf32>
    %24 = vector.extract_strided_slice %8 {offsets = [384, 0], sizes = [48, 512], strides = [1, 1]} : vector<768x512xf32> to vector<48x512xf32>
    %25 = arith.maximumf %23, %24 : vector<48x512xf32>
    %26 = vector.extract_strided_slice %8 {offsets = [432, 0], sizes = [48, 512], strides = [1, 1]} : vector<768x512xf32> to vector<48x512xf32>
    %27 = arith.maximumf %25, %26 : vector<48x512xf32>
    %28 = vector.extract_strided_slice %8 {offsets = [480, 0], sizes = [48, 512], strides = [1, 1]} : vector<768x512xf32> to vector<48x512xf32>
    %29 = arith.maximumf %27, %28 : vector<48x512xf32>
    %30 = vector.extract_strided_slice %8 {offsets = [528, 0], sizes = [48, 512], strides = [1, 1]} : vector<768x512xf32> to vector<48x512xf32>
    %31 = arith.maximumf %29, %30 : vector<48x512xf32>
    %32 = vector.extract_strided_slice %8 {offsets = [576, 0], sizes = [48, 512], strides = [1, 1]} : vector<768x512xf32> to vector<48x512xf32>
    %33 = arith.maximumf %31, %32 : vector<48x512xf32>
    %34 = vector.extract_strided_slice %8 {offsets = [624, 0], sizes = [48, 512], strides = [1, 1]} : vector<768x512xf32> to vector<48x512xf32>
    %35 = arith.maximumf %33, %34 : vector<48x512xf32>
    %36 = vector.extract_strided_slice %8 {offsets = [672, 0], sizes = [48, 512], strides = [1, 1]} : vector<768x512xf32> to vector<48x512xf32>
    %37 = arith.maximumf %35, %36 : vector<48x512xf32>
    %38 = vector.extract_strided_slice %8 {offsets = [720, 0], sizes = [48, 512], strides = [1, 1]} : vector<768x512xf32> to vector<48x512xf32>
    %39 = arith.maximumf %37, %38 : vector<48x512xf32>
    %c0_7 = arith.constant 0 : index
    %c0_8 = arith.constant 0 : index
    %40 = vector.load %arg4[%c0_7, %c0_8] : memref<1x48xf32, #tpu.memory_space<vmem>>, vector<1x48xf32>
    %cst_9 = arith.constant dense<0.000000e+00> : vector<1x512xf32>
    %41 = tpu.matmul %40, %39, %cst_9 {dimension_numbers = #tpu.dot_dimension_numbers<[1], [0], [0], [1], [0, 0, 1, 1], [], []>} : vector<1x48xf32>, vector<48x512xf32>, vector<1x512xf32> -> vector<1x512xf32>
    %c0_10 = arith.constant 0 : index
    %c0_11 = arith.constant 0 : index
    %42 = vector.load %arg5[%c0_10, %c0_11] : memref<1x1xf32, #tpu.memory_space<vmem>>, vector<1x1xf32>
    %43 = vector.broadcast %42 : vector<1x1xf32> to vector<1x512xf32>
    %44 = arith.addf %41, %43 : vector<1x512xf32>
    %c0_12 = arith.constant 0 : index
    %c0_13 = arith.constant 0 : index
    %c0_14 = arith.constant 0 : index
    %45 = vector.load %arg6[%c0_12, %c0_13, %c0_14] : memref<1x1x512xf32, #tpu.memory_space<vmem>>, vector<1x1x512xf32>
    %46 = vector.shape_cast %45 : vector<1x1x512xf32> to vector<1x512xf32>
    %47 = vector.shape_cast %44 : vector<1x512xf32> to vector<1x1x512xf32>
    tpu.vector_store %arg6[%c0_12, %c0_13, %c0_14], %47 {strides = array<i32>} : memref<1x1x512xf32, #tpu.memory_space<vmem>>, vector<1x1x512xf32>,
    return
  }
  func.func @transform_0(%arg0: i32) -> (i32, i32, i32) {
    %c0_i32 = arith.constant 0 : i32
    %c0_i32_0 = arith.constant 0 : i32
    %c0_i32_1 = arith.constant 0 : i32
    return %arg0, %c0_i32, %c0_i32_0 : i32, i32, i32
  }
  func.func @transform_1(%arg0: i32) -> (i32, i32) {
    %c0_i32 = arith.constant 0 : i32
    %c0_i32_0 = arith.constant 0 : i32
    %c0_i32_1 = arith.constant 0 : i32
    return %c0_i32, %c0_i32_0 : i32, i32
  }
  func.func @transform_2(%arg0: i32) -> (i32, i32) {
    %c0_i32 = arith.constant 0 : i32
    %c0_i32_0 = arith.constant 0 : i32
    %c0_i32_1 = arith.constant 0 : i32
    return %c0_i32, %c0_i32_0 : i32, i32
  }
  func.func @transform_3(%arg0: i32) -> (i32, i32) {
    %c0_i32 = arith.constant 0 : i32
    %c0_i32_0 = arith.constant 0 : i32
    %c0_i32_1 = arith.constant 0 : i32
    return %c0_i32, %c0_i32_0 : i32, i32
  }
  func.func @transform_4(%arg0: i32) -> (i32, i32) {
    %c0_i32 = arith.constant 0 : i32
    %c0_i32_0 = arith.constant 0 : i32
    %c0_i32_1 = arith.constant 0 : i32
    return %c0_i32, %c0_i32_0 : i32, i32
  }
  func.func @transform_5(%arg0: i32) -> (i32, i32, i32) {
    %c0_i32 = arith.constant 0 : i32
    %c0_i32_0 = arith.constant 0 : i32
    %c0_i32_1 = arith.constant 0 : i32
    return %arg0, %c0_i32, %c0_i32_0 : i32, i32, i32
  }
}

</mosaic_0001>

<bundles_post_ra>
// kernel: tpu_custom_call.1
= control target key start
LH: loop header
LB: loop body
LE: loop exit
PB: predicated region body
PF: predicated region fallthrough
CT: control target
= control target key end

     0   :  { %s10019_s0 = inlined_call_operand.vmem [shape: f32[1,400,512], index: 0, kind: input, shape index: {}]   ;;  %s10020_s1 = inlined_call_operand.vmem [shape: f32[768,400], index: 1, kind: input, shape index: {}]   ;;  %s10021_s2 = inlined_call_operand.vmem [shape: f32[768,1], index: 2, kind: input, shape index: {}]   ;;  %s10022_s3 = inlined_call_operand.vmem [shape: f32[1,48], index: 3, kind: input, shape index: {}]   ;;  %s10023_s4 = inlined_call_operand.<no memory space> [shape: f32[1,1], index: 4, kind: input, shape index: {}]   ;;  %s10024_s5 = inlined_call_operand.hbm [shape: f32[1,1,512], index: 5, kind: output, shape index: {}]  }
   0x1   :  { %v10_v0 = vstv %s10023_s4 }
   0x2   :  { %11 = vst [vmem:[#allocation2] sm:$0x1] %v10_v0 }
   0x3   :  { %v408_v1 = vld [vmem:[%s10019_s0 + $0x8] sm:$0xff]  ;;  %v410_v3 = vld [vmem:[%s10019_s0 + $0x18] sm:$0xff]  ;;  %v407_v6 = vld [vmem:[%s10019_s0] sm:$0xff] }
   0x4   :  { %v412_v2 = vld [vmem:[%s10019_s0 + $0x28] sm:$0xff]  ;;  %v414_v5 = vld [vmem:[%s10019_s0 + $0x38] sm:$0xff]  ;;  %v411_v7 = vld [vmem:[%s10019_s0 + $0x20] sm:$0xff] }
   0x5   :  { %v5179_v4 = vpack.c.bf16 %v412_v2, %v408_v1  ;;  %v5279_v8 = vpack.c.bf16 %v414_v5, %v410_v3  ;;  %v5181_v9 = vpack.c.bf16 %v411_v7, %v407_v6  ;;  %v409_v10 = vld [vmem:[%s10019_s0 + $0x10] sm:$0xff]  ;;  %v416_v12 = vld [vmem:[%s10019_s0 + $0x48] sm:$0xff]  ;;  %v418_v15 = vld [vmem:[%s10019_s0 + $0x58] sm:$0xff] }
   0x6   :  { %v413_v11 = vld [vmem:[%s10019_s0 + $0x30] sm:$0xff]  ;;  %v420_v14 = vld [vmem:[%s10019_s0 + $0x68] sm:$0xff]  ;;  %v422_v16 = vld [vmem:[%s10019_s0 + $0x78] sm:$0xff] }
   0x7   :  { %5180 = vmatprep.subr.bf16.mxu0 %v5179_v4  ;;  %v5281_v13 = vpack.c.bf16 %v413_v11, %v409_v10  ;;  %5280 = vmatprep.subr.bf16.mxu1 %v5279_v8  ;;  %v5183_v17 = vpack.c.bf16 %v420_v14, %v416_v12  ;;  %v5283_v18 = vpack.c.bf16 %v422_v16, %v418_v15  ;;  %v415_v19 = vld [vmem:[%s10019_s0 + $0x40] sm:$0xff]  ;;  %v417_v21 = vld [vmem:[%s10019_s0 + $0x50] sm:$0xff]  ;;  %v424_v24 = vld [vmem:[%s10019_s0 + $0x88] sm:$0xff] }
   0x8   :  { %5182 = vmatpush1.bf16.msra.mxu0 %v5181_v9  ;;  %v419_v20 = vld [vmem:[%s10019_s0 + $0x60] sm:$0xff]  ;;  %v421_v23 = vld [vmem:[%s10019_s0 + $0x70] sm:$0xff]  ;;  %v428_v25 = vld [vmem:[%s10019_s0 + $0xa8] sm:$0xff] }
   0x9   :  { %5282 = vmatpush1.bf16.msra.mxu1 %v5281_v13  ;;  %v5185_v22 = vpack.c.bf16 %v419_v20, %v415_v19  ;;  %5184 = vmatprep.subr.bf16.mxu0 %v5183_v17  ;;  %v5285_v26 = vpack.c.bf16 %v421_v23, %v417_v21  ;;  %v5187_v27 = vpack.c.bf16 %v428_v25, %v424_v24  ;;  %v426_v28 = vld [vmem:[%s10019_s0 + $0x98] sm:$0xff]  ;;  %v423_v30 = vld [vmem:[%s10019_s0 + $0x80] sm:$0xff]  ;;  %v425_v33 = vld [vmem:[%s10019_s0 + $0x90] sm:$0xff] }
   0xa   :  { %5284 = vmatprep.subr.bf16.mxu1 %v5283_v18  ;;  %v430_v29 = vld [vmem:[%s10019_s0 + $0xb8] sm:$0xff]  ;;  %v427_v32 = vld [vmem:[%s10019_s0 + $0xa0] sm:$0xff]  ;;  %v429_v34 = vld [vmem:[%s10019_s0 + $0xb0] sm:$0xff] }
   0xb   :  { %v5287_v31 = vpack.c.bf16 %v430_v29, %v426_v28  ;;  %v5189_v35 = vpack.c.bf16 %v427_v32, %v423_v30  ;;  %v432_v36 = vld [vmem:[%s10019_s0 + $0xc8] sm:$0xff]  ;;  %v434_v38 = vld [vmem:[%s10019_s0 + $0xd8] sm:$0xff]  ;;  %v5289_v39 = vpack.c.bf16 %v429_v34, %v425_v33  ;;  %v431_v42 = vld [vmem:[%s10019_s0 + $0xc0] sm:$0xff] }
   0xc   :  { %5186 = vmatpush1.bf16.msra.mxu0 %v5185_v22  ;;  %v436_v37 = vld [vmem:[%s10019_s0 + $0xe8] sm:$0xff]  ;;  %v438_v41 = vld [vmem:[%s10019_s0 + $0xf8] sm:$0xff]  ;;  %v435_v43 = vld [vmem:[%s10019_s0 + $0xe0] sm:$0xff] }
   0xd   :  { %5286 = vmatpush1.bf16.msra.mxu1 %v5285_v26  ;;  %5188 = vmatprep.subr.bf16.mxu0 %v5187_v27  ;;  %v5191_v40 = vpack.c.bf16 %v436_v37, %v432_v36  ;;  %v5291_v44 = vpack.c.bf16 %v438_v41, %v434_v38  ;;  %v433_v45 = vld [vmem:[%s10019_s0 + $0xd0] sm:$0xff]  ;;  %v440_v47 = vld [vmem:[%s10019_s0 + $0x108] sm:$0xff]  ;;  %v442_v49 = vld [vmem:[%s10019_s0 + $0x118] sm:$0xff]  ;;  %v5193_v51 = vpack.c.bf16 %v435_v43, %v431_v42 }
   0xe   :  { %5288 = vmatprep.subr.bf16.mxu1 %v5287_v31  ;;  %v437_v46 = vld [vmem:[%s10019_s0 + $0xf0] sm:$0xff]  ;;  %v444_v48 = vld [vmem:[%s10019_s0 + $0x128] sm:$0xff]  ;;  %v446_v50 = vld [vmem:[%s10019_s0 + $0x138] sm:$0xff] }
   0xf   :  { %v5293_v52 = vpack.c.bf16 %v437_v46, %v433_v45  ;;  %v5195_v53 = vpack.c.bf16 %v444_v48, %v440_v47  ;;  %v439_v54 = vld [vmem:[%s10019_s0 + $0x100] sm:$0xff]  ;;  %v441_v56 = vld [vmem:[%s10019_s0 + $0x110] sm:$0xff]  ;;  %v5295_v57 = vpack.c.bf16 %v446_v50, %v442_v49  ;;  %v448_v59 = vld [vmem:[%s10019_s0 + $0x148] sm:$0xff] }
  0x10   :  { %5190 = vmatpush1.bf16.msra.mxu0 %v5189_v35  ;;  %v443_v55 = vld [vmem:[%s10019_s0 + $0x120] sm:$0xff]  ;;  %v445_v58 = vld [vmem:[%s10019_s0 + $0x130] sm:$0xff]  ;;  %v452_v60 = vld [vmem:[%s10019_s0 + $0x168] sm:$0xff] }
  0x11   :  { %5290 = vmatpush1.bf16.msra.mxu1 %v5289_v39  ;;  %5192 = vmatprep.subr.bf16.mxu0 %v5191_v40  ;;  %v450_v61 = vld [vmem:[%s10019_s0 + $0x158] sm:$0xff]  ;;  %v5197_v63 = vpack.c.bf16 %v443_v55, %v439_v54  ;;  %v5297_v0 = vpack.c.bf16 %v445_v58, %v441_v56  ;;  %v5199_v1 = vpack.c.bf16 %v452_v60, %v448_v59  ;;  %v447_v2 = vld [vmem:[%s10019_s0 + $0x140] sm:$0xff]  ;;  %v449_v4 = vld [vmem:[%s10019_s0 + $0x150] sm:$0xff] }
  0x12   :  { %5292 = vmatprep.subr.bf16.mxu1 %v5291_v44  ;;  %v454_v62 = vld [vmem:[%s10019_s0 + $0x178] sm:$0xff]  ;;  %v451_v3 = vld [vmem:[%s10019_s0 + $0x160] sm:$0xff]  ;;  %v453_v6 = vld [vmem:[%s10019_s0 + $0x170] sm:$0xff] }
  0x13   :  { %v5299_v5 = vpack.c.bf16 %v454_v62, %v450_v61  ;;  %v456_v7 = vld [vmem:[%s10019_s0 + $0x188] sm:$0xff]  ;;  %v458_v9 = vld [vmem:[%s10019_s0 + $0x198] sm:$0xff]  ;;  %v5201_v11 = vpack.c.bf16 %v451_v3, %v447_v2  ;;  %v5301_v12 = vpack.c.bf16 %v453_v6, %v449_v4  ;;  %v455_v14 = vld [vmem:[%s10019_s0 + $0x180] sm:$0xff] }
  0x14   :  { %5194 = vmatpush1.bf16.msra.mxu0 %v5193_v51  ;;  %v460_v8 = vld [vmem:[%s10019_s0 + $0x1a8] sm:$0xff]  ;;  %v462_v10 = vld [vmem:[%s10019_s0 + $0x1b8] sm:$0xff]  ;;  %v459_v15 = vld [vmem:[%s10019_s0 + $0x1a0] sm:$0xff] }
  0x15   :  { %5294 = vmatpush1.bf16.msra.mxu1 %v5293_v52  ;;  %5196 = vmatprep.subr.bf16.mxu0 %v5195_v53  ;;  %v5203_v13 = vpack.c.bf16 %v460_v8, %v456_v7  ;;  %v457_v16 = vld [vmem:[%s10019_s0 + $0x190] sm:$0xff]  ;;  %v5303_v17 = vpack.c.bf16 %v462_v10, %v458_v9  ;;  %v464_v19 = vld [vmem:[%s10019_s0 + $0x1c8] sm:$0xff]  ;;  %v466_v21 = vld [vmem:[%s10019_s0 + $0x1d8] sm:$0xff]  ;;  %v5205_v23 = vpack.c.bf16 %v459_v15, %v455_v14 }
  0x16   :  { %5296 = vmatprep.subr.bf16.mxu1 %v5295_v57  ;;  %v461_v18 = vld [vmem:[%s10019_s0 + $0x1b0] sm:$0xff]  ;;  %v468_v20 = vld [vmem:[%s10019_s0 + $0x1e8] sm:$0xff]  ;;  %v470_v22 = vld [vmem:[%s10019_s0 + $0x1f8] sm:$0xff] }
  0x17   :  { %v5305_v24 = vpack.c.bf16 %v461_v18, %v457_v16  ;;  %v5207_v25 = vpack.c.bf16 %v468_v20, %v464_v19  ;;  %v463_v26 = vld [vmem:[%s10019_s0 + $0x1c0] sm:$0xff]  ;;  %v465_v28 = vld [vmem:[%s10019_s0 + $0x1d0] sm:$0xff]  ;;  %v5307_v29 = vpack.c.bf16 %v470_v22, %v466_v21  ;;  %v472_v31 = vld [vmem:[%s10019_s0 + $0x208] sm:$0xff] }
  0x18   :  { %5198 = vmatpush1.bf16.msra.mxu0 %v5197_v63  ;;  %v467_v27 = vld [vmem:[%s10019_s0 + $0x1e0] sm:$0xff]  ;;  %v469_v30 = vld [vmem:[%s10019_s0 + $0x1f0] sm:$0xff]  ;;  %v476_v32 = vld [vmem:[%s10019_s0 + $0x228] sm:$0xff] }
  0x19   :  { %5298 = vmatpush1.bf16.msra.mxu1 %v5297_v0  ;;  %5200 = vmatprep.subr.bf16.mxu0 %v5199_v1  ;;  %v474_v33 = vld [vmem:[%s10019_s0 + $0x218] sm:$0xff]  ;;  %v5209_v35 = vpack.c.bf16 %v467_v27, %v463_v26  ;;  %v5309_v36 = vpack.c.bf16 %v469_v30, %v465_v28  ;;  %v5211_v37 = vpack.c.bf16 %v476_v32, %v472_v31  ;;  %v471_v38 = vld [vmem:[%s10019_s0 + $0x200] sm:$0xff]  ;;  %v473_v40 = vld [vmem:[%s10019_s0 + $0x210] sm:$0xff] }
  0x1a   :  { %5300 = vmatprep.subr.bf16.mxu1 %v5299_v5  ;;  %v478_v34 = vld [vmem:[%s10019_s0 + $0x238] sm:$0xff]  ;;  %v475_v39 = vld [vmem:[%s10019_s0 + $0x220] sm:$0xff]  ;;  %v477_v42 = vld [vmem:[%s10019_s0 + $0x230] sm:$0xff] }
  0x1b   :  { %v5311_v41 = vpack.c.bf16 %v478_v34, %v474_v33  ;;  %v480_v43 = vld [vmem:[%s10019_s0 + $0x248] sm:$0xff]  ;;  %v482_v45 = vld [vmem:[%s10019_s0 + $0x258] sm:$0xff]  ;;  %v5213_v47 = vpack.c.bf16 %v475_v39, %v471_v38  ;;  %v5313_v48 = vpack.c.bf16 %v477_v42, %v473_v40  ;;  %v479_v50 = vld [vmem:[%s10019_s0 + $0x240] sm:$0xff] }
  0x1c   :  { %5202 = vmatpush1.bf16.msra.mxu0 %v5201_v11  ;;  %v484_v44 = vld [vmem:[%s10019_s0 + $0x268] sm:$0xff]  ;;  %v486_v46 = vld [vmem:[%s10019_s0 + $0x278] sm:$0xff]  ;;  %v483_v51 = vld [vmem:[%s10019_s0 + $0x260] sm:$0xff] }
  0x1d   :  { %5302 = vmatpush1.bf16.msra.mxu1 %v5301_v12  ;;  %5204 = vmatprep.subr.bf16.mxu0 %v5203_v13  ;;  %v5215_v49 = vpack.c.bf16 %v484_v44, %v480_v43  ;;  %v481_v52 = vld [vmem:[%s10019_s0 + $0x250] sm:$0xff]  ;;  %v5315_v53 = vpack.c.bf16 %v486_v46, %v482_v45  ;;  %v488_v55 = vld [vmem:[%s10019_s0 + $0x288] sm:$0xff]  ;;  %v490_v57 = vld [vmem:[%s10019_s0 + $0x298] sm:$0xff]  ;;  %v5217_v59 = vpack.c.bf16 %v483_v51, %v479_v50 }
  0x1e   :  { %5304 = vmatprep.subr.bf16.mxu1 %v5303_v17  ;;  %v485_v54 = vld [vmem:[%s10019_s0 + $0x270] sm:$0xff]  ;;  %v492_v56 = vld [vmem:[%s10019_s0 + $0x2a8] sm:$0xff]  ;;  %v494_v58 = vld [vmem:[%s10019_s0 + $0x2b8] sm:$0xff] }
  0x1f   :  { %v5317_v60 = vpack.c.bf16 %v485_v54, %v481_v52  ;;  %v5219_v61 = vpack.c.bf16 %v492_v56, %v488_v55  ;;  %v487_v62 = vld [vmem:[%s10019_s0 + $0x280] sm:$0xff]  ;;  %v489_v0 = vld [vmem:[%s10019_s0 + $0x290] sm:$0xff]  ;;  %v5319_v1 = vpack.c.bf16 %v494_v58, %v490_v57  ;;  %v496_v3 = vld [vmem:[%s10019_s0 + $0x2c8] sm:$0xff] }
  0x20   :  { %5206 = vmatpush1.bf16.msra.mxu0 %v5205_v23  ;;  %v491_v63 = vld [vmem:[%s10019_s0 + $0x2a0] sm:$0xff]  ;;  %v493_v2 = vld [vmem:[%s10019_s0 + $0x2b0] sm:$0xff]  ;;  %v500_v4 = vld [vmem:[%s10019_s0 + $0x2e8] sm:$0xff] }
  0x21   :  { %5306 = vmatpush1.bf16.msra.mxu1 %v5305_v24  ;;  %5208 = vmatprep.subr.bf16.mxu0 %v5207_v25  ;;  %v498_v5 = vld [vmem:[%s10019_s0 + $0x2d8] sm:$0xff]  ;;  %v5221_v7 = vpack.c.bf16 %v491_v63, %v487_v62  ;;  %v495_v8 = vld [vmem:[%s10019_s0 + $0x2c0] sm:$0xff]  ;;  %v5321_v9 = vpack.c.bf16 %v493_v2, %v489_v0  ;;  %v5223_v10 = vpack.c.bf16 %v500_v4, %v496_v3  ;;  %v497_v12 = vld [vmem:[%s10019_s0 + $0x2d0] sm:$0xff] }
  0x22   :  { %5308 = vmatprep.subr.bf16.mxu1 %v5307_v29  ;;  %v502_v6 = vld [vmem:[%s10019_s0 + $0x2f8] sm:$0xff]  ;;  %v499_v11 = vld [vmem:[%s10019_s0 + $0x2e0] sm:$0xff]  ;;  %v501_v13 = vld [vmem:[%s10019_s0 + $0x2f0] sm:$0xff] }
  0x23   :  { %v5323_v14 = vpack.c.bf16 %v502_v6, %v498_v5  ;;  %v504_v15 = vld [vmem:[%s10019_s0 + $0x308] sm:$0xff]  ;;  %v506_v18 = vld [vmem:[%s10019_s0 + $0x318] sm:$0xff]  ;;  %v5225_v20 = vpack.c.bf16 %v499_v11, %v495_v8  ;;  %v5325_v21 = vpack.c.bf16 %v501_v13, %v497_v12  ;;  %v503_v23 = vld [vmem:[%s10019_s0 + $0x300] sm:$0xff] }
  0x24   :  { %5210 = vmatpush1.bf16.msra.mxu0 %v5209_v35  ;;  %v508_v16 = vld [vmem:[%s10019_s0 + $0x328] sm:$0xff]  ;;  %v510_v19 = vld [vmem:[%s10019_s0 + $0x338] sm:$0xff]  ;;  %v507_v24 = vld [vmem:[%s10019_s0 + $0x320] sm:$0xff] }
  0x25   :  { %5310 = vmatpush1.bf16.msra.mxu1 %v5309_v36  ;;  %5212 = vmatprep.subr.bf16.mxu0 %v5211_v37  ;;  %v24_v17 = vld [vmem:[%s10020_s1 + $0x8] sm:$0xff]  ;;  %v5227_v22 = vpack.c.bf16 %v508_v16, %v504_v15  ;;  %v505_v25 = vld [vmem:[%s10019_s0 + $0x310] sm:$0xff]  ;;  %v5327_v26 = vpack.c.bf16 %v510_v19, %v506_v18  ;;  %v514_v30 = vld [vmem:[%s10019_s0 + $0x358] sm:$0xff]  ;;  %v5229_v32 = vpack.c.bf16 %v507_v24, %v503_v23 }
  0x26   :  { %5312 = vmatprep.subr.bf16.mxu1 %v5311_v41  ;;  %1536 = vmatprep.mubr.f32.mxu0 %v24_v17  ;;  %v509_v27 = vld [vmem:[%s10019_s0 + $0x330] sm:$0xff]  ;;  %v512_v28 = vld [vmem:[%s10019_s0 + $0x348] sm:$0xff]  ;;  %v518_v31 = vld [vmem:[%s10019_s0 + $0x378] sm:$0xff] }
  0x27   :  { %2818 = vmatprep.mubr.f32.mxu1 %v24_v17  ;;  %v516_v29 = vld [vmem:[%s10019_s0 + $0x368] sm:$0xff]  ;;  %v5329_v33 = vpack.c.bf16 %v509_v27, %v505_v25  ;;  %v511_v35 = vld [vmem:[%s10019_s0 + $0x340] sm:$0xff]  ;;  %v513_v37 = vld [vmem:[%s10019_s0 + $0x350] sm:$0xff]  ;;  %v5331_v38 = vpack.c.bf16 %v518_v31, %v514_v30 }
  0x28   :  { %5214 = vmatpush1.bf16.msra.mxu0 %v5213_v47  ;;  %v5231_v34 = vpack.c.bf16 %v516_v29, %v512_v28  ;;  %v515_v36 = vld [vmem:[%s10019_s0 + $0x360] sm:$0xff]  ;;  %v517_v39 = vld [vmem:[%s10019_s0 + $0x370] sm:$0xff]  ;;  %v520_v40 = vld [vmem:[%s10019_s0 + $0x388] sm:$0xff] }
  0x29   :  { %5314 = vmatpush1.bf16.msra.mxu1 %v5313_v48  ;;  %5216 = vmatprep.subr.bf16.mxu0 %v5215_v49  ;;  %v524_v41 = vld [vmem:[%s10019_s0 + $0x3a8] sm:$0xff]  ;;  %v522_v42 = vld [vmem:[%s10019_s0 + $0x398] sm:$0xff]  ;;  %v5233_v44 = vpack.c.bf16 %v515_v36, %v511_v35  ;;  %v5333_v45 = vpack.c.bf16 %v517_v39, %v513_v37  ;;  %v519_v47 = vld [vmem:[%s10019_s0 + $0x380] sm:$0xff] }
  0x2a   :  { %5316 = vmatprep.subr.bf16.mxu1 %v5315_v53  ;;  %v526_v43 = vld [vmem:[%s10019_s0 + $0x3b8] sm:$0xff]  ;;  %v5235_v46 = vpack.c.bf16 %v524_v41, %v520_v40  ;;  %v523_v48 = vld [vmem:[%s10019_s0 + $0x3a0] sm:$0xff]  ;;  %v521_v49 = vld [vmem:[%s10019_s0 + $0x390] sm:$0xff] }
  0x2b   :  { %v5335_v50 = vpack.c.bf16 %v526_v43, %v522_v42  ;;  %v525_v51 = vld [vmem:[%s10019_s0 + $0x3b0] sm:$0xff]  ;;  %v528_v52 = vld [vmem:[%s10019_s0 + $0x3c8] sm:$0xff]  ;;  %v530_v54 = vld [vmem:[%s10019_s0 + $0x3d8] sm:$0xff]  ;;  %v5237_v56 = vpack.c.bf16 %v523_v48, %v519_v47 }
  0x2c   :  { %5218 = vmatpush1.bf16.msra.mxu0 %v5217_v59  ;;  %v532_v53 = vld [vmem:[%s10019_s0 + $0x3e8] sm:$0xff]  ;;  %v534_v55 = vld [vmem:[%s10019_s0 + $0x3f8] sm:$0xff]  ;;  %v5337_v57 = vpack.c.bf16 %v525_v51, %v521_v49  ;;  %v527_v59 = vld [vmem:[%s10019_s0 + $0x3c0] sm:$0xff] }
  0x2d   :  { %5318 = vmatpush1.bf16.msra.mxu1 %v5317_v60  ;;  %5220 = vmatprep.subr.bf16.mxu0 %v5219_v61  ;;  %v5239_v58 = vpack.c.bf16 %v532_v53, %v528_v52  ;;  %v531_v60 = vld [vmem:[%s10019_s0 + $0x3e0] sm:$0xff]  ;;  %v5339_v61 = vpack.c.bf16 %v534_v55, %v530_v54  ;;  %v529_v62 = vld [vmem:[%s10019_s0 + $0x3d0] sm:$0xff] }
  0x2e   :  { %5320 = vmatprep.subr.bf16.mxu1 %v5319_v1  ;;  %v533_v63 = vld [vmem:[%s10019_s0 + $0x3f0] sm:$0xff]  ;;  %v5241_v0 = vpack.c.bf16 %v531_v60, %v527_v59  ;;  %v23_v2 = vld [vmem:[%s10020_s1] sm:$0xff] }
  0x2f   :  { %v5341_v1 = vpack.c.bf16 %v533_v63, %v529_v62 }
  0x30   :  { %5222 = vmatpush1.bf16.msra.mxu0 %v5221_v7 }
  0x31   :  { %5322 = vmatpush1.bf16.msra.mxu1 %v5321_v9  ;;  %5224 = vmatprep.subr.bf16.mxu0 %v5223_v10 }
  0x32   :  { %5324 = vmatprep.subr.bf16.mxu1 %v5323_v14 }
  0x34   :  { %5226 = vmatpush1.bf16.msra.mxu0 %v5225_v20 }
  0x35   :  { %5326 = vmatpush1.bf16.msra.mxu1 %v5325_v21  ;;  %5228 = vmatprep.subr.bf16.mxu0 %v5227_v22 }
  0x36   :  { %5328 = vmatprep.subr.bf16.mxu1 %v5327_v26 }
  0x38   :  { %5230 = vmatpush1.bf16.msra.mxu0 %v5229_v32 }
  0x39   :  { %5330 = vmatpush1.bf16.msra.mxu1 %v5329_v33  ;;  %5232 = vmatprep.subr.bf16.mxu0 %v5231_v34 }
  0x3a   :  { %5332 = vmatprep.subr.bf16.mxu1 %v5331_v38 }
  0x3c   :  { %5234 = vmatpush1.bf16.msra.mxu0 %v5233_v44 }
  0x3d   :  { %5334 = vmatpush1.bf16.msra.mxu1 %v5333_v45  ;;  %5236 = vmatprep.subr.bf16.mxu0 %v5235_v46 }
  0x3e   :  { %5336 = vmatprep.subr.bf16.mxu1 %v5335_v50 }
  0x40   :  { %5238 = vmatpush1.bf16.msra.mxu0 %v5237_v56 }
  0x41   :  { %5338 = vmatpush1.bf16.msra.mxu1 %v5337_v57  ;;  %5240 = vmatprep.subr.bf16.mxu0 %v5239_v58 }
  0x42   :  { %5340 = vmatprep.subr.bf16.mxu1 %v5339_v61 }
  0x44   :  { %5242 = vmatpush1.bf16.msra.mxu0 %v5241_v0 }
  0x45   :  { %12 = vsyncpa [#allocation4], 0  ;;  %5342 = vmatpush1.bf16.msra.mxu1 %v5341_v1  ;;  %v28_v3 = vld [vmem:[%s10020_s1 + $0x28] sm:$0xff]  ;;  %v27_v4 = vld [vmem:[%s10020_s1 + $0x20] sm:$0xff]  ;;  %vm1183_vm0 = vcmask 130048   ;;  %vm4791_vm1 = vcmask 392192  }
  0x46   :  { %v32_v5 = vld [vmem:[%s10020_s1 + $0x48] sm:$0xff]  ;;  %v31_v6 = vld [vmem:[%s10020_s1 + $0x40] sm:$0xff] }
  0x47   :  { %1537 = vmatmul.mubr.f32.vlgmr.msra.gmra.mrb[0].mxu0 %v23_v2  ;;  %v36_v7 = vld [vmem:[%s10020_s1 + $0x68] sm:$0xff]  ;;  %v35_v8 = vld [vmem:[%s10020_s1 + $0x60] sm:$0xff] }
  0x48   :  { %2819 = vmatmul.mubr.f32.vlgmr.msra.gmra.mrb[0].mxu1 %v23_v2  ;;  %1542 = vmatprep.mubr.f32.mxu0 %v28_v3  ;;  %v40_v9 = vld [vmem:[%s10020_s1 + $0x88] sm:$0xff]  ;;  %v39_v10 = vld [vmem:[%s10020_s1 + $0x80] sm:$0xff] }
  0x49   :  { %2824 = vmatprep.mubr.f32.mxu1 %v28_v3  ;;  %v44_v11 = vld [vmem:[%s10020_s1 + $0xa8] sm:$0xff]  ;;  %v43_v12 = vld [vmem:[%s10020_s1 + $0xa0] sm:$0xff] }
  0x4a   :  { %v48_v13 = vld [vmem:[%s10020_s1 + $0xc8] sm:$0xff]  ;;  %v47_v14 = vld [vmem:[%s10020_s1 + $0xc0] sm:$0xff] }
  0x4b   :  { %1543 = vmatmul.mubr.f32.gmra.mrb[2].mxu0 %v27_v4  ;;  %v52_v15 = vld [vmem:[%s10020_s1 + $0xe8] sm:$0xff]  ;;  %v51_v16 = vld [vmem:[%s10020_s1 + $0xe0] sm:$0xff] }
  0x4c   :  { %2825 = vmatmul.mubr.f32.gmra.mrb[2].mxu1 %v27_v4  ;;  %1548 = vmatprep.mubr.f32.mxu0 %v32_v5  ;;  %v56_v17 = vld [vmem:[%s10020_s1 + $0x108] sm:$0xff]  ;;  %v55_v18 = vld [vmem:[%s10020_s1 + $0x100] sm:$0xff] }
  0x4d   :  { %2830 = vmatprep.mubr.f32.mxu1 %v32_v5  ;;  %v60_v19 = vld [vmem:[%s10020_s1 + $0x128] sm:$0xff]  ;;  %v59_v20 = vld [vmem:[%s10020_s1 + $0x120] sm:$0xff] }
  0x4e   :  { %v64_v21 = vld [vmem:[%s10020_s1 + $0x148] sm:$0xff]  ;;  %v63_v22 = vld [vmem:[%s10020_s1 + $0x140] sm:$0xff] }
  0x4f   :  { %1549 = vmatmul.mubr.f32.gmra.mrb[4].mxu0 %v31_v6  ;;  %v68_v23 = vld [vmem:[%s10020_s1 + $0x168] sm:$0xff]  ;;  %v67_v24 = vld [vmem:[%s10020_s1 + $0x160] sm:$0xff] }
  0x50   :  { %2831 = vmatmul.mubr.f32.gmra.mrb[4].mxu1 %v31_v6  ;;  %1554 = vmatprep.mubr.f32.mxu0 %v36_v7  ;;  %v72_v25 = vld [vmem:[%s10020_s1 + $0x188] sm:$0xff]  ;;  %v71_v26 = vld [vmem:[%s10020_s1 + $0x180] sm:$0xff] }
  0x51   :  { %2836 = vmatprep.mubr.f32.mxu1 %v36_v7  ;;  %v76_v27 = vld [vmem:[%s10020_s1 + $0x1a8] sm:$0xff]  ;;  %v75_v28 = vld [vmem:[%s10020_s1 + $0x1a0] sm:$0xff] }
  0x52   :  { %v80_v29 = vld [vmem:[%s10020_s1 + $0x1c8] sm:$0xff]  ;;  %v79_v30 = vld [vmem:[%s10020_s1 + $0x1c0] sm:$0xff] }
  0x53   :  { %1555 = vmatmul.mubr.f32.gmra.mrb[6].mxu0 %v35_v8  ;;  %v84_v31 = vld [vmem:[%s10020_s1 + $0x1e8] sm:$0xff]  ;;  %v83_v32 = vld [vmem:[%s10020_s1 + $0x1e0] sm:$0xff] }
  0x54   :  { %2837 = vmatmul.mubr.f32.gmra.mrb[6].mxu1 %v35_v8  ;;  %1560 = vmatprep.mubr.f32.mxu0 %v40_v9  ;;  %v88_v33 = vld [vmem:[%s10020_s1 + $0x208] sm:$0xff]  ;;  %v87_v34 = vld [vmem:[%s10020_s1 + $0x200] sm:$0xff] }
  0x55   :  { %2842 = vmatprep.mubr.f32.mxu1 %v40_v9  ;;  %v92_v35 = vld [vmem:[%s10020_s1 + $0x228] sm:$0xff]  ;;  %v91_v36 = vld [vmem:[%s10020_s1 + $0x220] sm:$0xff] }
  0x56   :  { %v96_v37 = vld [vmem:[%s10020_s1 + $0x248] sm:$0xff]  ;;  %v95_v38 = vld [vmem:[%s10020_s1 + $0x240] sm:$0xff] }
  0x57   :  { %1561 = vmatmul.mubr.f32.gmra.mrb[8].mxu0 %v39_v10  ;;  %v100_v39 = vld [vmem:[%s10020_s1 + $0x268] sm:$0xff]  ;;  %v99_v40 = vld [vmem:[%s10020_s1 + $0x260] sm:$0xff] }
  0x58   :  { %2843 = vmatmul.mubr.f32.gmra.mrb[8].mxu1 %v39_v10  ;;  %1566 = vmatprep.mubr.f32.mxu0 %v44_v11  ;;  %v104_v41 = vld [vmem:[%s10020_s1 + $0x288] sm:$0xff]  ;;  %v103_v42 = vld [vmem:[%s10020_s1 + $0x280] sm:$0xff] }
  0x59   :  { %2848 = vmatprep.mubr.f32.mxu1 %v44_v11  ;;  %v108_v43 = vld [vmem:[%s10020_s1 + $0x2a8] sm:$0xff]  ;;  %v107_v44 = vld [vmem:[%s10020_s1 + $0x2a0] sm:$0xff] }
  0x5a   :  { %v112_v45 = vld [vmem:[%s10020_s1 + $0x2c8] sm:$0xff]  ;;  %v111_v46 = vld [vmem:[%s10020_s1 + $0x2c0] sm:$0xff] }
  0x5b   :  { %1567 = vmatmul.mubr.f32.gmra.mrb[10].mxu0 %v43_v12  ;;  %v116_v47 = vld [vmem:[%s10020_s1 + $0x2e8] sm:$0xff]  ;;  %v115_v48 = vld [vmem:[%s10020_s1 + $0x2e0] sm:$0xff] }
  0x5c   :  { %2849 = vmatmul.mubr.f32.gmra.mrb[10].mxu1 %v43_v12  ;;  %1572 = vmatprep.mubr.f32.mxu0 %v48_v13  ;;  %v120_v49 = vld [vmem:[%s10020_s1 + $0x308] sm:$0xff]  ;;  %v119_v50 = vld [vmem:[%s10020_s1 + $0x300] sm:$0xff] }
  0x5d   :  { %2854 = vmatprep.mubr.f32.mxu1 %v48_v13  ;;  %v124_v51 = vld [vmem:[%s10020_s1 + $0x328] sm:$0xff]  ;;  %v123_v52 = vld [vmem:[%s10020_s1 + $0x320] sm:$0xff] }
  0x5e   :  { %v128_v53 = vld [vmem:[%s10020_s1 + $0x348] sm:$0xff]  ;;  %v127_v54 = vld [vmem:[%s10020_s1 + $0x340] sm:$0xff] }
  0x5f   :  { %1573 = vmatmul.mubr.f32.gmra.mrb[12].mxu0 %v47_v14  ;;  %v132_v55 = vld [vmem:[%s10020_s1 + $0x368] sm:$0xff]  ;;  %v131_v56 = vld [vmem:[%s10020_s1 + $0x360] sm:$0xff] }
  0x60   :  { %2855 = vmatmul.mubr.f32.gmra.mrb[12].mxu1 %v47_v14  ;;  %1578 = vmatprep.mubr.f32.mxu0 %v52_v15  ;;  %v136_v57 = vld [vmem:[%s10020_s1 + $0x388] sm:$0xff]  ;;  %v135_v58 = vld [vmem:[%s10020_s1 + $0x380] sm:$0xff] }
  0x61   :  { %2860 = vmatprep.mubr.f32.mxu1 %v52_v15  ;;  %v140_v59 = vld [vmem:[%s10020_s1 + $0x3a8] sm:$0xff]  ;;  %v139_v60 = vld [vmem:[%s10020_s1 + $0x3a0] sm:$0xff] }
  0x62   :  { %v144_v61 = vld [vmem:[%s10020_s1 + $0x3c8] sm:$0xff]  ;;  %v143_v62 = vld [vmem:[%s10020_s1 + $0x3c0] sm:$0xff] }
  0x63   :  { %1579 = vmatmul.mubr.f32.gmra.mrb[14].mxu0 %v51_v16  ;;  %v148_v63 = vld [vmem:[%s10020_s1 + $0x3e8] sm:$0xff]  ;;  %v147_v0 = vld [vmem:[%s10020_s1 + $0x3e0] sm:$0xff] }
  0x64   :  { %2861 = vmatmul.mubr.f32.gmra.mrb[14].mxu1 %v51_v16  ;;  %1584 = vmatprep.mubr.f32.mxu0 %v56_v17  ;;  %v152_v1 = vld [vmem:[%s10020_s1 + $0x408] sm:$0xff]  ;;  %v151_v2 = vld [vmem:[%s10020_s1 + $0x400] sm:$0xff] }
  0x65   :  { %2866 = vmatprep.mubr.f32.mxu1 %v56_v17  ;;  %v156_v3 = vld [vmem:[%s10020_s1 + $0x428] sm:$0xff]  ;;  %v155_v4 = vld [vmem:[%s10020_s1 + $0x420] sm:$0xff] }
  0x66   :  { %v160_v5 = vld [vmem:[%s10020_s1 + $0x448] sm:$0xff]  ;;  %v159_v6 = vld [vmem:[%s10020_s1 + $0x440] sm:$0xff] }
  0x67   :  { %1585 = vmatmul.mubr.f32.gmra.mrb[16].mxu0 %v55_v18  ;;  %v164_v7 = vld [vmem:[%s10020_s1 + $0x468] sm:$0xff]  ;;  %v163_v8 = vld [vmem:[%s10020_s1 + $0x460] sm:$0xff] }
  0x68   :  { %2867 = vmatmul.mubr.f32.gmra.mrb[16].mxu1 %v55_v18  ;;  %1590 = vmatprep.mubr.f32.mxu0 %v60_v19  ;;  %v168_v9 = vld [vmem:[%s10020_s1 + $0x488] sm:$0xff]  ;;  %v167_v10 = vld [vmem:[%s10020_s1 + $0x480] sm:$0xff] }
  0x69   :  { %2872 = vmatprep.mubr.f32.mxu1 %v60_v19  ;;  %v172_v11 = vld [vmem:[%s10020_s1 + $0x4a8] sm:$0xff]  ;;  %v171_v12 = vld [vmem:[%s10020_s1 + $0x4a0] sm:$0xff] }
  0x6a   :  { %v176_v13 = vld [vmem:[%s10020_s1 + $0x4c8] sm:$0xff]  ;;  %v175_v14 = vld [vmem:[%s10020_s1 + $0x4c0] sm:$0xff] }
  0x6b   :  { %1591 = vmatmul.mubr.f32.gmra.mrb[18].mxu0 %v59_v20  ;;  %v180_v15 = vld [vmem:[%s10020_s1 + $0x4e8] sm:$0xff]  ;;  %v179_v16 = vld [vmem:[%s10020_s1 + $0x4e0] sm:$0xff] }
  0x6c   :  { %2873 = vmatmul.mubr.f32.gmra.mrb[18].mxu1 %v59_v20  ;;  %1596 = vmatprep.mubr.f32.mxu0 %v64_v21  ;;  %v184_v17 = vld [vmem:[%s10020_s1 + $0x508] sm:$0xff]  ;;  %v183_v18 = vld [vmem:[%s10020_s1 + $0x500] sm:$0xff] }
  0x6d   :  { %2878 = vmatprep.mubr.f32.mxu1 %v64_v21  ;;  %v188_v19 = vld [vmem:[%s10020_s1 + $0x528] sm:$0xff]  ;;  %v187_v20 = vld [vmem:[%s10020_s1 + $0x520] sm:$0xff] }
  0x6e   :  { %v192_v21 = vld [vmem:[%s10020_s1 + $0x548] sm:$0xff] }
  0x6f   :  { %1597 = vmatmul.mubr.f32.gmra.mrb[20].mxu0 %v63_v22 }
  0x70   :  { %2879 = vmatmul.mubr.f32.gmra.mrb[20].mxu1 %v63_v22  ;;  %1602 = vmatprep.mubr.f32.mxu0 %v68_v23  ;;  %v191_v22 = vld [vmem:[%s10020_s1 + $0x540] sm:$0xff] }
  0x71   :  { %2884 = vmatprep.mubr.f32.mxu1 %v68_v23  ;;  %v196_v23 = vld [vmem:[%s10020_s1 + $0x568] sm:$0xff] }
  0x73   :  { %1603 = vmatmul.mubr.f32.gmra.mrb[22].mxu0 %v67_v24 }
  0x74   :  { %2885 = vmatmul.mubr.f32.gmra.mrb[22].mxu1 %v67_v24  ;;  %1608 = vmatprep.mubr.f32.mxu0 %v72_v25  ;;  %v195_v24 = vld [vmem:[%s10020_s1 + $0x560] sm:$0xff] }
  0x75   :  { %2890 = vmatprep.mubr.f32.mxu1 %v72_v25  ;;  %v200_v25 = vld [vmem:[%s10020_s1 + $0x588] sm:$0xff] }
  0x77   :  { %1609 = vmatmul.mubr.f32.gmra.mrb[24].mxu0 %v71_v26 }
  0x78   :  { %2891 = vmatmul.mubr.f32.gmra.mrb[24].mxu1 %v71_v26  ;;  %1614 = vmatprep.mubr.f32.mxu0 %v76_v27  ;;  %v199_v26 = vld [vmem:[%s10020_s1 + $0x580] sm:$0xff] }
  0x79   :  { %2896 = vmatprep.mubr.f32.mxu1 %v76_v27  ;;  %v204_v27 = vld [vmem:[%s10020_s1 + $0x5a8] sm:$0xff] }
  0x7b   :  { %1615 = vmatmul.mubr.f32.gmra.mrb[26].mxu0 %v75_v28 }
  0x7c   :  { %2897 = vmatmul.mubr.f32.gmra.mrb[26].mxu1 %v75_v28  ;;  %1620 = vmatprep.mubr.f32.mxu0 %v80_v29  ;;  %v203_v28 = vld [vmem:[%s10020_s1 + $0x5a0] sm:$0xff] }
  0x7d   :  { %2902 = vmatprep.mubr.f32.mxu1 %v80_v29  ;;  %v208_v29 = vld [vmem:[%s10020_s1 + $0x5c8] sm:$0xff] }
  0x7f   :  { %1621 = vmatmul.mubr.f32.gmra.mrb[28].mxu0 %v79_v30 }
  0x80   :  { %2903 = vmatmul.mubr.f32.gmra.mrb[28].mxu1 %v79_v30  ;;  %1626 = vmatprep.mubr.f32.mxu0 %v84_v31  ;;  %v207_v30 = vld [vmem:[%s10020_s1 + $0x5c0] sm:$0xff] }
  0x81   :  { %2908 = vmatprep.mubr.f32.mxu1 %v84_v31  ;;  %v212_v31 = vld [vmem:[%s10020_s1 + $0x5e8] sm:$0xff] }
  0x83   :  { %1627 = vmatmul.mubr.f32.gmra.mrb[30].mxu0 %v83_v32 }
  0x84   :  { %2909 = vmatmul.mubr.f32.gmra.mrb[30].mxu1 %v83_v32  ;;  %1632 = vmatprep.mubr.f32.mxu0 %v88_v33  ;;  %v211_v32 = vld [vmem:[%s10020_s1 + $0x5e0] sm:$0xff] }
  0x85   :  { %2914 = vmatprep.mubr.f32.mxu1 %v88_v33  ;;  %v216_v33 = vld [vmem:[%s10020_s1 + $0x608] sm:$0xff] }
  0x87   :  { %1633 = vmatmul.mubr.f32.gmra.mrb[32].mxu0 %v87_v34 }
  0x88   :  { %2915 = vmatmul.mubr.f32.gmra.mrb[32].mxu1 %v87_v34  ;;  %1638 = vmatprep.mubr.f32.mxu0 %v92_v35  ;;  %v215_v34 = vld [vmem:[%s10020_s1 + $0x600] sm:$0xff] }
  0x89   :  { %2920 = vmatprep.mubr.f32.mxu1 %v92_v35  ;;  %v220_v35 = vld [vmem:[%s10020_s1 + $0x628] sm:$0xff] }
  0x8b   :  { %1639 = vmatmul.mubr.f32.gmra.mrb[34].mxu0 %v91_v36 }
  0x8c   :  { %2921 = vmatmul.mubr.f32.gmra.mrb[34].mxu1 %v91_v36  ;;  %1644 = vmatprep.mubr.f32.mxu0 %v96_v37  ;;  %v219_v36 = vld [vmem:[%s10020_s1 + $0x620] sm:$0xff] }
  0x8d   :  { %2926 = vmatprep.mubr.f32.mxu1 %v96_v37  ;;  %v224_v37 = vld [vmem:[%s10020_s1 + $0x648] sm:$0xff] }
  0x8f   :  { %1645 = vmatmul.mubr.f32.gmra.mrb[36].mxu0 %v95_v38 }
  0x90   :  { %2927 = vmatmul.mubr.f32.gmra.mrb[36].mxu1 %v95_v38  ;;  %1650 = vmatprep.mubr.f32.mxu0 %v100_v39  ;;  %v223_v38 = vld [vmem:[%s10020_s1 + $0x640] sm:$0xff] }
  0x91   :  { %2932 = vmatprep.mubr.f32.mxu1 %v100_v39  ;;  %v228_v39 = vld [vmem:[%s10020_s1 + $0x668] sm:$0xff] }
  0x93   :  { %1651 = vmatmul.mubr.f32.gmra.mrb[38].mxu0 %v99_v40 }
  0x94   :  { %2933 = vmatmul.mubr.f32.gmra.mrb[38].mxu1 %v99_v40  ;;  %1656 = vmatprep.mubr.f32.mxu0 %v104_v41  ;;  %v227_v40 = vld [vmem:[%s10020_s1 + $0x660] sm:$0xff] }
  0x95   :  { %2938 = vmatprep.mubr.f32.mxu1 %v104_v41  ;;  %v232_v41 = vld [vmem:[%s10020_s1 + $0x688] sm:$0xff] }
  0x97   :  { %1657 = vmatmul.mubr.f32.gmra.mrb[40].mxu0 %v103_v42 }
  0x98   :  { %2939 = vmatmul.mubr.f32.gmra.mrb[40].mxu1 %v103_v42  ;;  %1662 = vmatprep.mubr.f32.mxu0 %v108_v43  ;;  %v231_v42 = vld [vmem:[%s10020_s1 + $0x680] sm:$0xff] }
  0x99   :  { %2944 = vmatprep.mubr.f32.mxu1 %v108_v43  ;;  %v236_v43 = vld [vmem:[%s10020_s1 + $0x6a8] sm:$0xff] }
  0x9b   :  { %1663 = vmatmul.mubr.f32.gmra.mrb[42].mxu0 %v107_v44 }
  0x9c   :  { %2945 = vmatmul.mubr.f32.gmra.mrb[42].mxu1 %v107_v44  ;;  %1668 = vmatprep.mubr.f32.mxu0 %v112_v45  ;;  %v235_v44 = vld [vmem:[%s10020_s1 + $0x6a0] sm:$0xff] }
  0x9d   :  { %2950 = vmatprep.mubr.f32.mxu1 %v112_v45  ;;  %v240_v45 = vld [vmem:[%s10020_s1 + $0x6c8] sm:$0xff] }
  0x9f   :  { %1669 = vmatmul.mubr.f32.gmra.mrb[44].mxu0 %v111_v46 }
  0xa0   :  { %2951 = vmatmul.mubr.f32.gmra.mrb[44].mxu1 %v111_v46  ;;  %1674 = vmatprep.mubr.f32.mxu0 %v116_v47  ;;  %v239_v46 = vld [vmem:[%s10020_s1 + $0x6c0] sm:$0xff] }
  0xa1   :  { %2956 = vmatprep.mubr.f32.mxu1 %v116_v47  ;;  %v244_v47 = vld [vmem:[%s10020_s1 + $0x6e8] sm:$0xff] }
  0xa3   :  { %1675 = vmatmul.mubr.f32.gmra.mrb[46].mxu0 %v115_v48 }
  0xa4   :  { %2957 = vmatmul.mubr.f32.gmra.mrb[46].mxu1 %v115_v48  ;;  %1680 = vmatprep.mubr.f32.mxu0 %v120_v49  ;;  %v243_v48 = vld [vmem:[%s10020_s1 + $0x6e0] sm:$0xff] }
  0xa5   :  { %2962 = vmatprep.mubr.f32.mxu1 %v120_v49  ;;  %v248_v49 = vld [vmem:[%s10020_s1 + $0x708] sm:$0xff] }
  0xa7   :  { %1681 = vmatmul.mubr.f32.gmra.mrb[48].mxu0 %v119_v50 }
  0xa8   :  { %2963 = vmatmul.mubr.f32.gmra.mrb[48].mxu1 %v119_v50  ;;  %1686 = vmatprep.mubr.f32.mxu0 %v124_v51  ;;  %v536_v50 = vld [vmem:[%s10019_s0 + $0x408] sm:$0xff] }
  0xa9   :  { %2968 = vmatprep.mubr.f32.mxu1 %v124_v51  ;;  %v540_v51 = vld [vmem:[%s10019_s0 + $0x428] sm:$0xff] }
  0xab   :  { %1687 = vmatmul.mubr.f32.gmra.mrb[50].mxu0 %v123_v52 }
  0xac   :  { %2969 = vmatmul.mubr.f32.gmra.mrb[50].mxu1 %v123_v52  ;;  %1692 = vmatprep.mubr.f32.mxu0 %v128_v53  ;;  %v5243_v52 = vpack.c.bf16 %v540_v51, %v536_v50  ;;  %v569_v50 = vld [vmem:[%s10019_s0 + $0x510] sm:$0xff] }
  0xad   :  { %2974 = vmatprep.mubr.f32.mxu1 %v128_v53  ;;  %v538_v53 = vld [vmem:[%s10019_s0 + $0x418] sm:$0xff]  ;;  %v573_v51 = vld [vmem:[%s10019_s0 + $0x530] sm:$0xff] }
  0xae   :  { %5244 = vmatprep.subr.bf16.mxu0 %v5243_v52  ;;  %v263_v52 = vld [vmem:[%s10020_s1 + $0x780] sm:$0xff] }
  0xaf   :  { %1693 = vmatmul.mubr.f32.gmra.mrb[52].mxu0 %v127_v54 }
  0xb0   :  { %2975 = vmatmul.mubr.f32.gmra.mrb[52].mxu1 %v127_v54  ;;  %1698 = vmatprep.mubr.f32.mxu0 %v132_v55  ;;  %v542_v54 = vld [vmem:[%s10019_s0 + $0x438] sm:$0xff] }
  0xb1   :  { %2980 = vmatprep.mubr.f32.mxu1 %v132_v55  ;;  %v535_v55 = vld [vmem:[%s10019_s0 + $0x400] sm:$0xff] }
  0xb3   :  { %1699 = vmatmul.mubr.f32.gmra.mrb[54].mxu0 %v131_v56 }
  0xb4   :  { %2981 = vmatmul.mubr.f32.gmra.mrb[54].mxu1 %v131_v56  ;;  %1704 = vmatprep.mubr.f32.mxu0 %v136_v57  ;;  %v5343_v56 = vpack.c.bf16 %v542_v54, %v538_v53  ;;  %v5361_v54 = vpack.c.bf16 %v573_v51, %v569_v50  ;;  %v287_v50 = vld [vmem:[%s10020_s1 + $0x840] sm:$0xff]  ;;  %v292_v51 = vld [vmem:[%s10020_s1 + $0x868] sm:$0xff] }
  0xb5   :  { %2986 = vmatprep.mubr.f32.mxu1 %v136_v57  ;;  %v539_v57 = vld [vmem:[%s10019_s0 + $0x420] sm:$0xff] }
  0xb6   :  { %5344 = vmatprep.subr.bf16.mxu1 %v5343_v56  ;;  %v576_v56 = vld [vmem:[%s10019_s0 + $0x548] sm:$0xff] }
  0xb7   :  { %1705 = vmatmul.mubr.f32.gmra.mrb[56].mxu0 %v135_v58 }
  0xb8   :  { %2987 = vmatmul.mubr.f32.gmra.mrb[56].mxu1 %v135_v58  ;;  %1710 = vmatprep.mubr.f32.mxu0 %v140_v59  ;;  %v537_v58 = vld [vmem:[%s10019_s0 + $0x410] sm:$0xff] }
  0xb9   :  { %2992 = vmatprep.mubr.f32.mxu1 %v140_v59  ;;  %v541_v59 = vld [vmem:[%s10019_s0 + $0x430] sm:$0xff] }
  0xbb   :  { %1711 = vmatmul.mubr.f32.gmra.mrb[58].mxu0 %v139_v60 }
  0xbc   :  { %2993 = vmatmul.mubr.f32.gmra.mrb[58].mxu1 %v139_v60  ;;  %1716 = vmatprep.mubr.f32.mxu0 %v144_v61  ;;  %v247_v60 = vld [vmem:[%s10020_s1 + $0x700] sm:$0xff] }
  0xbd   :  { %2998 = vmatprep.mubr.f32.mxu1 %v144_v61  ;;  %v5245_v61 = vpack.c.bf16 %v539_v57, %v535_v55  ;;  %v268_v55 = vld [vmem:[%s10020_s1 + $0x7a8] sm:$0xff] }
  0xbe   :  { %v580_v57 = vld [vmem:[%s10019_s0 + $0x568] sm:$0xff] }
  0xbf   :  { %1717 = vmatmul.mubr.f32.gmra.mrb[60].mxu0 %v143_v62 }
  0xc0   :  { %2999 = vmatmul.mubr.f32.gmra.mrb[60].mxu1 %v143_v62  ;;  %1722 = vmatprep.mubr.f32.mxu0 %v148_v63  ;;  %v5345_v62 = vpack.c.bf16 %v541_v59, %v537_v58  ;;  %v5263_v58 = vpack.c.bf16 %v580_v57, %v576_v56  ;;  %v578_v59 = vld [vmem:[%s10019_s0 + $0x558] sm:$0xff]  ;;  %v299_v56 = vld [vmem:[%s10020_s1 + $0x8a0] sm:$0xff]  ;;  %v304_v57 = vld [vmem:[%s10020_s1 + $0x8c8] sm:$0xff] }
  0xc1   :  { %3004 = vmatprep.mubr.f32.mxu1 %v148_v63  ;;  %v252_v63 = vld [vmem:[%s10020_s1 + $0x728] sm:$0xff]  ;;  %5246 = vmatpush1.bf16.msra.mxu0 %v5245_v61  ;;  %v575_v61 = vld [vmem:[%s10019_s0 + $0x540] sm:$0xff] }
  0xc2   :  { %5346 = vmatpush1.bf16.msra.mxu1 %v5345_v62 }
  0xc3   :  { %1723 = vmatmul.mubr.f32.gmra.mrb[62].mxu0 %v147_v0 }
  0xc4   :  { %3005 = vmatmul.mubr.f32.gmra.mrb[62].mxu1 %v147_v0  ;;  %1728 = vmatprep.mubr.f32.mxu0 %v152_v1  ;;  %v544_v0 = vld [vmem:[%s10019_s0 + $0x448] sm:$0xff] }
  0xc5   :  { %3010 = vmatprep.mubr.f32.mxu1 %v152_v1  ;;  %v548_v1 = vld [vmem:[%s10019_s0 + $0x468] sm:$0xff] }
  0xc7   :  { %1729 = vmatmul.mubr.f32.gmra.mrb[64].mxu0 %v151_v2 }
  0xc8   :  { %3011 = vmatmul.mubr.f32.gmra.mrb[64].mxu1 %v151_v2  ;;  %1734 = vmatprep.mubr.f32.mxu0 %v156_v3  ;;  %v5247_v2 = vpack.c.bf16 %v548_v1, %v544_v0  ;;  %v577_v0 = vld [vmem:[%s10019_s0 + $0x550] sm:$0xff] }
  0xc9   :  { %3016 = vmatprep.mubr.f32.mxu1 %v156_v3  ;;  %v546_v3 = vld [vmem:[%s10019_s0 + $0x458] sm:$0xff]  ;;  %v581_v1 = vld [vmem:[%s10019_s0 + $0x570] sm:$0xff] }
  0xca   :  { %5248 = vmatprep.subr.bf16.mxu0 %v5247_v2  ;;  %v267_v2 = vld [vmem:[%s10020_s1 + $0x7a0] sm:$0xff] }
  0xcb   :  { %1735 = vmatmul.mubr.f32.gmra.mrb[66].mxu0 %v155_v4 }
  0xcc   :  { %3017 = vmatmul.mubr.f32.gmra.mrb[66].mxu1 %v155_v4  ;;  %1740 = vmatprep.mubr.f32.mxu0 %v160_v5  ;;  %v550_v4 = vld [vmem:[%s10019_s0 + $0x478] sm:$0xff] }
  0xcd   :  { %3022 = vmatprep.mubr.f32.mxu1 %v160_v5  ;;  %v543_v5 = vld [vmem:[%s10019_s0 + $0x440] sm:$0xff] }
  0xcf   :  { %1741 = vmatmul.mubr.f32.gmra.mrb[68].mxu0 %v159_v6 }
  0xd0   :  { %3023 = vmatmul.mubr.f32.gmra.mrb[68].mxu1 %v159_v6  ;;  %1746 = vmatprep.mubr.f32.mxu0 %v164_v7  ;;  %v5347_v6 = vpack.c.bf16 %v550_v4, %v546_v3  ;;  %v5365_v4 = vpack.c.bf16 %v581_v1, %v577_v0  ;;  %v315_v0 = vld [vmem:[%s10020_s1 + $0x920] sm:$0xff]  ;;  %v320_v1 = vld [vmem:[%s10020_s1 + $0x948] sm:$0xff] }
  0xd1   :  { %3028 = vmatprep.mubr.f32.mxu1 %v164_v7  ;;  %v547_v7 = vld [vmem:[%s10019_s0 + $0x460] sm:$0xff] }
  0xd2   :  { %5348 = vmatprep.subr.bf16.mxu1 %v5347_v6  ;;  %v584_v6 = vld [vmem:[%s10019_s0 + $0x588] sm:$0xff] }
  0xd3   :  { %1747 = vmatmul.mubr.f32.gmra.mrb[70].mxu0 %v163_v8 }
  0xd4   :  { %3029 = vmatmul.mubr.f32.gmra.mrb[70].mxu1 %v163_v8  ;;  %1752 = vmatprep.mubr.f32.mxu0 %v168_v9  ;;  %v545_v8 = vld [vmem:[%s10019_s0 + $0x450] sm:$0xff] }
  0xd5   :  { %3034 = vmatprep.mubr.f32.mxu1 %v168_v9  ;;  %v549_v9 = vld [vmem:[%s10019_s0 + $0x470] sm:$0xff] }
  0xd7   :  { %1753 = vmatmul.mubr.f32.gmra.mrb[72].mxu0 %v167_v10 }
  0xd8   :  { %3035 = vmatmul.mubr.f32.gmra.mrb[72].mxu1 %v167_v10  ;;  %1758 = vmatprep.mubr.f32.mxu0 %v172_v11  ;;  %v251_v10 = vld [vmem:[%s10020_s1 + $0x720] sm:$0xff] }
  0xd9   :  { %3040 = vmatprep.mubr.f32.mxu1 %v172_v11  ;;  %v5249_v11 = vpack.c.bf16 %v547_v7, %v543_v5  ;;  %v272_v5 = vld [vmem:[%s10020_s1 + $0x7c8] sm:$0xff] }
  0xda   :  { %v588_v7 = vld [vmem:[%s10019_s0 + $0x5a8] sm:$0xff] }
  0xdb   :  { %1759 = vmatmul.mubr.f32.gmra.mrb[74].mxu0 %v171_v12 }
  0xdc   :  { %3041 = vmatmul.mubr.f32.gmra.mrb[74].mxu1 %v171_v12  ;;  %1764 = vmatprep.mubr.f32.mxu0 %v176_v13  ;;  %v5349_v12 = vpack.c.bf16 %v549_v9, %v545_v8  ;;  %v5267_v8 = vpack.c.bf16 %v588_v7, %v584_v6  ;;  %v586_v9 = vld [vmem:[%s10019_s0 + $0x598] sm:$0xff]  ;;  %v327_v6 = vld [vmem:[%s10020_s1 + $0x980] sm:$0xff]  ;;  %v332_v7 = vld [vmem:[%s10020_s1 + $0x9a8] sm:$0xff] }
  0xdd   :  { %3046 = vmatprep.mubr.f32.mxu1 %v176_v13  ;;  %v256_v13 = vld [vmem:[%s10020_s1 + $0x748] sm:$0xff]  ;;  %5250 = vmatpush1.bf16.msra.mxu0 %v5249_v11  ;;  %v583_v11 = vld [vmem:[%s10019_s0 + $0x580] sm:$0xff] }
  0xde   :  { %5350 = vmatpush1.bf16.msra.mxu1 %v5349_v12 }
  0xdf   :  { %1765 = vmatmul.mubr.f32.gmra.mrb[76].mxu0 %v175_v14 }
  0xe0   :  { %3047 = vmatmul.mubr.f32.gmra.mrb[76].mxu1 %v175_v14  ;;  %1770 = vmatprep.mubr.f32.mxu0 %v180_v15  ;;  %v552_v14 = vld [vmem:[%s10019_s0 + $0x488] sm:$0xff] }
  0xe1   :  { %3052 = vmatprep.mubr.f32.mxu1 %v180_v15  ;;  %v556_v15 = vld [vmem:[%s10019_s0 + $0x4a8] sm:$0xff] }
  0xe3   :  { %1771 = vmatmul.mubr.f32.gmra.mrb[78].mxu0 %v179_v16 }
  0xe4   :  { %3053 = vmatmul.mubr.f32.gmra.mrb[78].mxu1 %v179_v16  ;;  %1776 = vmatprep.mubr.f32.mxu0 %v184_v17  ;;  %v5251_v16 = vpack.c.bf16 %v556_v15, %v552_v14  ;;  %v585_v14 = vld [vmem:[%s10019_s0 + $0x590] sm:$0xff] }
  0xe5   :  { %3058 = vmatprep.mubr.f32.mxu1 %v184_v17  ;;  %v554_v17 = vld [vmem:[%s10019_s0 + $0x498] sm:$0xff]  ;;  %v589_v15 = vld [vmem:[%s10019_s0 + $0x5b0] sm:$0xff] }
  0xe6   :  { %5252 = vmatprep.subr.bf16.mxu0 %v5251_v16  ;;  %v271_v16 = vld [vmem:[%s10020_s1 + $0x7c0] sm:$0xff] }
  0xe7   :  { %1777 = vmatmul.mubr.f32.gmra.mrb[80].mxu0 %v183_v18 }
  0xe8   :  { %3059 = vmatmul.mubr.f32.gmra.mrb[80].mxu1 %v183_v18  ;;  %1782 = vmatprep.mubr.f32.mxu0 %v188_v19  ;;  %v558_v18 = vld [vmem:[%s10019_s0 + $0x4b8] sm:$0xff] }
  0xe9   :  { %3064 = vmatprep.mubr.f32.mxu1 %v188_v19  ;;  %v551_v19 = vld [vmem:[%s10019_s0 + $0x480] sm:$0xff] }
  0xeb   :  { %1783 = vmatmul.mubr.f32.gmra.mrb[82].mxu0 %v187_v20 }
  0xec   :  { %3065 = vmatmul.mubr.f32.gmra.mrb[82].mxu1 %v187_v20  ;;  %1788 = vmatprep.mubr.f32.mxu0 %v192_v21  ;;  %v5351_v20 = vpack.c.bf16 %v558_v18, %v554_v17  ;;  %v5369_v18 = vpack.c.bf16 %v589_v15, %v585_v14  ;;  %v343_v14 = vld [vmem:[%s10020_s1 + $0xa00] sm:$0xff]  ;;  %v348_v15 = vld [vmem:[%s10020_s1 + $0xa28] sm:$0xff] }
  0xed   :  { %3070 = vmatprep.mubr.f32.mxu1 %v192_v21  ;;  %v555_v21 = vld [vmem:[%s10019_s0 + $0x4a0] sm:$0xff] }
  0xee   :  { %5352 = vmatprep.subr.bf16.mxu1 %v5351_v20  ;;  %v592_v20 = vld [vmem:[%s10019_s0 + $0x5c8] sm:$0xff] }
  0xef   :  { %1789 = vmatmul.mubr.f32.gmra.mrb[84].mxu0 %v191_v22 }
  0xf0   :  { %3071 = vmatmul.mubr.f32.gmra.mrb[84].mxu1 %v191_v22  ;;  %1794 = vmatprep.mubr.f32.mxu0 %v196_v23  ;;  %v553_v22 = vld [vmem:[%s10019_s0 + $0x490] sm:$0xff] }
  0xf1   :  { %3076 = vmatprep.mubr.f32.mxu1 %v196_v23  ;;  %v557_v23 = vld [vmem:[%s10019_s0 + $0x4b0] sm:$0xff] }
  0xf3   :  { %1795 = vmatmul.mubr.f32.gmra.mrb[86].mxu0 %v195_v24 }
  0xf4   :  { %3077 = vmatmul.mubr.f32.gmra.mrb[86].mxu1 %v195_v24  ;;  %1800 = vmatprep.mubr.f32.mxu0 %v200_v25  ;;  %v255_v24 = vld [vmem:[%s10020_s1 + $0x740] sm:$0xff] }
  0xf5   :  { %3082 = vmatprep.mubr.f32.mxu1 %v200_v25  ;;  %v5253_v25 = vpack.c.bf16 %v555_v21, %v551_v19  ;;  %v276_v19 = vld [vmem:[%s10020_s1 + $0x7e8] sm:$0xff] }
  0xf6   :  { %v596_v21 = vld [vmem:[%s10019_s0 + $0x5e8] sm:$0xff] }
  0xf7   :  { %1801 = vmatmul.mubr.f32.gmra.mrb[88].mxu0 %v199_v26 }
  0xf8   :  { %3083 = vmatmul.mubr.f32.gmra.mrb[88].mxu1 %v199_v26  ;;  %1806 = vmatprep.mubr.f32.mxu0 %v204_v27  ;;  %v5353_v26 = vpack.c.bf16 %v557_v23, %v553_v22  ;;  %v5271_v22 = vpack.c.bf16 %v596_v21, %v592_v20  ;;  %v594_v23 = vld [vmem:[%s10019_s0 + $0x5d8] sm:$0xff]  ;;  %v355_v20 = vld [vmem:[%s10020_s1 + $0xa60] sm:$0xff]  ;;  %v360_v21 = vld [vmem:[%s10020_s1 + $0xa88] sm:$0xff] }
  0xf9   :  { %3088 = vmatprep.mubr.f32.mxu1 %v204_v27  ;;  %v260_v27 = vld [vmem:[%s10020_s1 + $0x768] sm:$0xff]  ;;  %5254 = vmatpush1.bf16.msra.mxu0 %v5253_v25  ;;  %v591_v25 = vld [vmem:[%s10019_s0 + $0x5c0] sm:$0xff] }
  0xfa   :  { %5354 = vmatpush1.bf16.msra.mxu1 %v5353_v26 }
  0xfb   :  { %1807 = vmatmul.mubr.f32.gmra.mrb[90].mxu0 %v203_v28 }
  0xfc   :  { %3089 = vmatmul.mubr.f32.gmra.mrb[90].mxu1 %v203_v28  ;;  %1812 = vmatprep.mubr.f32.mxu0 %v208_v29  ;;  %v560_v28 = vld [vmem:[%s10019_s0 + $0x4c8] sm:$0xff] }
  0xfd   :  { %3094 = vmatprep.mubr.f32.mxu1 %v208_v29  ;;  %v564_v29 = vld [vmem:[%s10019_s0 + $0x4e8] sm:$0xff] }
  0xff   :  { %1813 = vmatmul.mubr.f32.gmra.mrb[92].mxu0 %v207_v30 }
 0x100   :  { %3095 = vmatmul.mubr.f32.gmra.mrb[92].mxu1 %v207_v30  ;;  %1818 = vmatprep.mubr.f32.mxu0 %v212_v31  ;;  %v5255_v30 = vpack.c.bf16 %v564_v29, %v560_v28  ;;  %v593_v28 = vld [vmem:[%s10019_s0 + $0x5d0] sm:$0xff] }
 0x101   :  { %3100 = vmatprep.mubr.f32.mxu1 %v212_v31  ;;  %v562_v31 = vld [vmem:[%s10019_s0 + $0x4d8] sm:$0xff]  ;;  %v597_v29 = vld [vmem:[%s10019_s0 + $0x5f0] sm:$0xff] }
 0x102   :  { %5256 = vmatprep.subr.bf16.mxu0 %v5255_v30  ;;  %v275_v30 = vld [vmem:[%s10020_s1 + $0x7e0] sm:$0xff] }
 0x103   :  { %1819 = vmatmul.mubr.f32.gmra.mrb[94].mxu0 %v211_v32 }
 0x104   :  { %3101 = vmatmul.mubr.f32.gmra.mrb[94].mxu1 %v211_v32  ;;  %1824 = vmatprep.mubr.f32.mxu0 %v216_v33  ;;  %v566_v32 = vld [vmem:[%s10019_s0 + $0x4f8] sm:$0xff] }
 0x105   :  { %3106 = vmatprep.mubr.f32.mxu1 %v216_v33  ;;  %v559_v33 = vld [vmem:[%s10019_s0 + $0x4c0] sm:$0xff] }
 0x107   :  { %1825 = vmatmul.mubr.f32.gmra.mrb[96].mxu0 %v215_v34 }
 0x108   :  { %3107 = vmatmul.mubr.f32.gmra.mrb[96].mxu1 %v215_v34  ;;  %1830 = vmatprep.mubr.f32.mxu0 %v220_v35  ;;  %v5355_v34 = vpack.c.bf16 %v566_v32, %v562_v31  ;;  %v5373_v32 = vpack.c.bf16 %v597_v29, %v593_v28  ;;  %v367_v28 = vld [vmem:[%s10020_s1 + $0xac0] sm:$0xff]  ;;  %v372_v29 = vld [vmem:[%s10020_s1 + $0xae8] sm:$0xff] }
 0x109   :  { %3112 = vmatprep.mubr.f32.mxu1 %v220_v35  ;;  %v563_v35 = vld [vmem:[%s10019_s0 + $0x4e0] sm:$0xff] }
 0x10a   :  { %5356 = vmatprep.subr.bf16.mxu1 %v5355_v34  ;;  %v600_v34 = vld [vmem:[%s10019_s0 + $0x608] sm:$0xff] }
 0x10b   :  { %1831 = vmatmul.mubr.f32.gmra.mrb[98].mxu0 %v219_v36 }
 0x10c   :  { %3113 = vmatmul.mubr.f32.gmra.mrb[98].mxu1 %v219_v36  ;;  %1836 = vmatprep.mubr.f32.mxu0 %v224_v37  ;;  %v561_v36 = vld [vmem:[%s10019_s0 + $0x4d0] sm:$0xff] }
 0x10d   :  { %3118 = vmatprep.mubr.f32.mxu1 %v224_v37  ;;  %v565_v37 = vld [vmem:[%s10019_s0 + $0x4f0] sm:$0xff] }
 0x10f   :  { %1837 = vmatmul.mubr.f32.gmra.mrb[100].mxu0 %v223_v38 }
 0x110   :  { %3119 = vmatmul.mubr.f32.gmra.mrb[100].mxu1 %v223_v38  ;;  %1842 = vmatprep.mubr.f32.mxu0 %v228_v39  ;;  %v259_v38 = vld [vmem:[%s10020_s1 + $0x760] sm:$0xff] }
 0x111   :  { %3124 = vmatprep.mubr.f32.mxu1 %v228_v39  ;;  %v5257_v39 = vpack.c.bf16 %v563_v35, %v559_v33  ;;  %v280_v33 = vld [vmem:[%s10020_s1 + $0x808] sm:$0xff] }
 0x112   :  { %v604_v35 = vld [vmem:[%s10019_s0 + $0x628] sm:$0xff] }
 0x113   :  { %1843 = vmatmul.mubr.f32.gmra.mrb[102].mxu0 %v227_v40 }
 0x114   :  { %3125 = vmatmul.mubr.f32.gmra.mrb[102].mxu1 %v227_v40  ;;  %1848 = vmatprep.mubr.f32.mxu0 %v232_v41  ;;  %v5357_v40 = vpack.c.bf16 %v565_v37, %v561_v36  ;;  %v5275_v36 = vpack.c.bf16 %v604_v35, %v600_v34  ;;  %v602_v37 = vld [vmem:[%s10019_s0 + $0x618] sm:$0xff]  ;;  %v375_v34 = vld [vmem:[%s10020_s1 + $0xb00] sm:$0xff] }
 0x115   :  { %3130 = vmatprep.mubr.f32.mxu1 %v232_v41  ;;  %v264_v41 = vld [vmem:[%s10020_s1 + $0x788] sm:$0xff]  ;;  %5258 = vmatpush1.bf16.msra.mxu0 %v5257_v39  ;;  %v599_v39 = vld [vmem:[%s10019_s0 + $0x600] sm:$0xff]  ;;  %v610_v35 = vld [vmem:[%s10021_s2 + $0x18] sm:$0xff] }
 0x116   :  { %5358 = vmatpush1.bf16.msra.mxu1 %v5357_v40 }
 0x117   :  { %1849 = vmatmul.mubr.f32.gmra.mrb[104].mxu0 %v231_v42 }
 0x118   :  { %3131 = vmatmul.mubr.f32.gmra.mrb[104].mxu1 %v231_v42  ;;  %1854 = vmatprep.mubr.f32.mxu0 %v236_v43  ;;  %v568_v42 = vld [vmem:[%s10019_s0 + $0x508] sm:$0xff] }
 0x119   :  { %3136 = vmatprep.mubr.f32.mxu1 %v236_v43  ;;  %v572_v43 = vld [vmem:[%s10019_s0 + $0x528] sm:$0xff] }
 0x11b   :  { %1855 = vmatmul.mubr.f32.gmra.mrb[106].mxu0 %v235_v44 }
 0x11c   :  { %3137 = vmatmul.mubr.f32.gmra.mrb[106].mxu1 %v235_v44  ;;  %1860 = vmatprep.mubr.f32.mxu0 %v240_v45  ;;  %v5259_v44 = vpack.c.bf16 %v572_v43, %v568_v42  ;;  %v601_v42 = vld [vmem:[%s10019_s0 + $0x610] sm:$0xff] }
 0x11d   :  { %3142 = vmatprep.mubr.f32.mxu1 %v240_v45  ;;  %v570_v45 = vld [vmem:[%s10019_s0 + $0x518] sm:$0xff]  ;;  %v605_v43 = vld [vmem:[%s10019_s0 + $0x630] sm:$0xff] }
 0x11e   :  { %5260 = vmatprep.subr.bf16.mxu0 %v5259_v44  ;;  %v279_v44 = vld [vmem:[%s10020_s1 + $0x800] sm:$0xff] }
 0x11f   :  { %1861 = vmatmul.mubr.f32.gmra.mrb[108].mxu0 %v239_v46 }
 0x120   :  { %3143 = vmatmul.mubr.f32.gmra.mrb[108].mxu1 %v239_v46  ;;  %1866 = vmatprep.mubr.f32.mxu0 %v244_v47  ;;  %v574_v46 = vld [vmem:[%s10019_s0 + $0x538] sm:$0xff] }
 0x121   :  { %3148 = vmatprep.mubr.f32.mxu1 %v244_v47  ;;  %v567_v47 = vld [vmem:[%s10019_s0 + $0x500] sm:$0xff] }
 0x123   :  { %1867 = vmatmul.mubr.f32.gmra.mrb[110].mxu0 %v243_v48 }
 0x124   :  { %3149 = vmatmul.mubr.f32.gmra.mrb[110].mxu1 %v243_v48  ;;  %1872 = vmatprep.mubr.f32.mxu0 %v248_v49  ;;  %v5359_v48 = vpack.c.bf16 %v574_v46, %v570_v45  ;;  %v5377_v46 = vpack.c.bf16 %v605_v43, %v601_v42  ;;  %v383_v42 = vld [vmem:[%s10020_s1 + $0xb40] sm:$0xff]  ;;  %v614_v43 = vld [vmem:[%s10021_s2 + $0x38] sm:$0xff] }
 0x125   :  { %3154 = vmatprep.mubr.f32.mxu1 %v248_v49  ;;  %v571_v49 = vld [vmem:[%s10019_s0 + $0x520] sm:$0xff] }
 0x126   :  { %v5261_v53 = vpack.c.bf16 %v571_v49, %v567_v47  ;;  %5360 = vmatprep.subr.bf16.mxu1 %v5359_v48  ;;  %v284_v47 = vld [vmem:[%s10020_s1 + $0x828] sm:$0xff]  ;;  %v283_v48 = vld [vmem:[%s10020_s1 + $0x820] sm:$0xff] }
 0x127   :  { %1873 = vmatmul.mubr.f32.gmra.mrb[112].mxu0 %v247_v60  ;;  %5362 = vmatpush1.bf16.msra.mxu1 %v5361_v54  ;;  %v288_v49 = vld [vmem:[%s10020_s1 + $0x848] sm:$0xff]  ;;  %v295_v54 = vld [vmem:[%s10020_s1 + $0x880] sm:$0xff] }
 0x128   :  { %3155 = vmatmul.mubr.f32.gmra.mrb[112].mxu1 %v247_v60  ;;  %1878 = vmatprep.mubr.f32.mxu0 %v252_v63  ;;  %v582_v60 = vld [vmem:[%s10019_s0 + $0x578] sm:$0xff] }
 0x129   :  { %3160 = vmatprep.mubr.f32.mxu1 %v252_v63  ;;  %5262 = vmatpush1.bf16.msra.mxu0 %v5261_v53  ;;  %v5363_v62 = vpack.c.bf16 %v582_v60, %v578_v59  ;;  %v579_v63 = vld [vmem:[%s10019_s0 + $0x560] sm:$0xff]  ;;  %v296_v53 = vld [vmem:[%s10020_s1 + $0x888] sm:$0xff] }
 0x12a   :  { %v5265_v3 = vpack.c.bf16 %v579_v63, %v575_v61  ;;  %5264 = vmatprep.subr.bf16.mxu0 %v5263_v58  ;;  %v303_v58 = vld [vmem:[%s10020_s1 + $0x8c0] sm:$0xff]  ;;  %v308_v59 = vld [vmem:[%s10020_s1 + $0x8e8] sm:$0xff] }
 0x12b   :  { %1879 = vmatmul.mubr.f32.gmra.mrb[114].mxu0 %v251_v10  ;;  %5364 = vmatprep.subr.bf16.mxu1 %v5363_v62  ;;  %v307_v60 = vld [vmem:[%s10020_s1 + $0x8e0] sm:$0xff]  ;;  %v312_v61 = vld [vmem:[%s10020_s1 + $0x908] sm:$0xff] }
 0x12c   :  { %3161 = vmatmul.mubr.f32.gmra.mrb[114].mxu1 %v251_v10  ;;  %1884 = vmatprep.mubr.f32.mxu0 %v256_v13  ;;  %v590_v10 = vld [vmem:[%s10019_s0 + $0x5b8] sm:$0xff]  ;;  %v311_v62 = vld [vmem:[%s10020_s1 + $0x900] sm:$0xff]  ;;  %v316_v63 = vld [vmem:[%s10020_s1 + $0x928] sm:$0xff] }
 0x12d   :  { %3166 = vmatprep.mubr.f32.mxu1 %v256_v13  ;;  %5266 = vmatpush1.bf16.msra.mxu0 %v5265_v3  ;;  %v5367_v12 = vpack.c.bf16 %v590_v10, %v586_v9  ;;  %v587_v13 = vld [vmem:[%s10019_s0 + $0x5a0] sm:$0xff]  ;;  %v324_v3 = vld [vmem:[%s10020_s1 + $0x968] sm:$0xff] }
 0x12e   :  { %5366 = vmatpush1.bf16.msra.mxu1 %v5365_v4  ;;  %v5269_v17 = vpack.c.bf16 %v587_v13, %v583_v11  ;;  %5268 = vmatprep.subr.bf16.mxu0 %v5267_v8  ;;  %v323_v4 = vld [vmem:[%s10020_s1 + $0x960] sm:$0xff]  ;;  %v336_v9 = vld [vmem:[%s10020_s1 + $0x9c8] sm:$0xff] }
 0x12f   :  { %1885 = vmatmul.mubr.f32.gmra.mrb[116].mxu0 %v255_v24  ;;  %5368 = vmatprep.subr.bf16.mxu1 %v5367_v12  ;;  %v331_v8 = vld [vmem:[%s10020_s1 + $0x9a0] sm:$0xff]  ;;  %v340_v11 = vld [vmem:[%s10020_s1 + $0x9e8] sm:$0xff] }
 0x130   :  { %3167 = vmatmul.mubr.f32.gmra.mrb[116].mxu1 %v255_v24  ;;  %1890 = vmatprep.mubr.f32.mxu0 %v260_v27  ;;  %v598_v24 = vld [vmem:[%s10019_s0 + $0x5f8] sm:$0xff]  ;;  %v335_v10 = vld [vmem:[%s10020_s1 + $0x9c0] sm:$0xff]  ;;  %v344_v13 = vld [vmem:[%s10020_s1 + $0xa08] sm:$0xff] }
 0x131   :  { %3172 = vmatprep.mubr.f32.mxu1 %v260_v27  ;;  %5270 = vmatpush1.bf16.msra.mxu0 %v5269_v17  ;;  %v5371_v26 = vpack.c.bf16 %v598_v24, %v594_v23  ;;  %v595_v27 = vld [vmem:[%s10019_s0 + $0x5e0] sm:$0xff]  ;;  %v352_v17 = vld [vmem:[%s10020_s1 + $0xa48] sm:$0xff] }
 0x132   :  { %5370 = vmatpush1.bf16.msra.mxu1 %v5369_v18  ;;  %v5273_v31 = vpack.c.bf16 %v595_v27, %v591_v25  ;;  %5272 = vmatprep.subr.bf16.mxu0 %v5271_v22  ;;  %v339_v12 = vld [vmem:[%s10020_s1 + $0x9e0] sm:$0xff]  ;;  %v364_v23 = vld [vmem:[%s10020_s1 + $0xaa8] sm:$0xff] }
 0x133   :  { %1891 = vmatmul.mubr.f32.gmra.mrb[118].mxu0 %v259_v38  ;;  %5372 = vmatprep.subr.bf16.mxu1 %v5371_v26  ;;  %v351_v18 = vld [vmem:[%s10020_s1 + $0xa40] sm:$0xff]  ;;  %v368_v25 = vld [vmem:[%s10020_s1 + $0xac8] sm:$0xff]  ;;  %v6201_v26 = vmov 0  }
 0x134   :  { %3173 = vmatmul.mubr.f32.gmra.mrb[118].mxu1 %v259_v38  ;;  %1896 = vmatprep.mubr.f32.mxu0 %v264_v41  ;;  %v606_v38 = vld [vmem:[%s10019_s0 + $0x638] sm:$0xff]  ;;  %v359_v22 = vld [vmem:[%s10020_s1 + $0xa80] sm:$0xff] }
 0x135   :  { %3178 = vmatprep.mubr.f32.mxu1 %v264_v41  ;;  %5274 = vmatpush1.bf16.msra.mxu0 %v5273_v31  ;;  %v5375_v40 = vpack.c.bf16 %v606_v38, %v602_v37  ;;  %v603_v41 = vld [vmem:[%s10019_s0 + $0x620] sm:$0xff]  ;;  %v380_v37 = vld [vmem:[%s10020_s1 + $0xb28] sm:$0xff] }
 0x136   :  { %5374 = vmatpush1.bf16.msra.mxu1 %v5373_v32  ;;  %v5277_v45 = vpack.c.bf16 %v603_v41, %v599_v39  ;;  %5276 = vmatprep.subr.bf16.mxu0 %v5275_v36  ;;  %v363_v24 = vld [vmem:[%s10020_s1 + $0xaa0] sm:$0xff]  ;;  %v609_v32 = vld [vmem:[%s10021_s2 + $0x10] sm:$0xff]  ;;  %v612_v39 = vld [vmem:[%s10021_s2 + $0x28] sm:$0xff] }
 0x137   :  { %1897 = vmatmul.mubr.f32.gmra.mrb[120].mxu0 %v263_v52  ;;  %5376 = vmatprep.subr.bf16.mxu1 %v5375_v40  ;;  %v607_v27 = vld [vmem:[%s10021_s2] sm:$0xff]  ;;  %v613_v40 = vld [vmem:[%s10021_s2 + $0x30] sm:$0xff]  ;;  %v384_v41 = vld [vmem:[%s10020_s1 + $0xb48] sm:$0xff] }
 0x138   :  { %3179 = vmatmul.mubr.f32.gmra.mrb[120].mxu1 %v263_v52  ;;  %1902 = vmatprep.mubr.f32.mxu0 %v268_v55  ;;  %v291_v52 = vld [vmem:[%s10020_s1 + $0x860] sm:$0xff] }
 0x139   :  { %3184 = vmatprep.mubr.f32.mxu1 %v268_v55  ;;  %5278 = vmatpush1.bf16.msra.mxu0 %v5277_v45  ;;  %v300_v55 = vld [vmem:[%s10020_s1 + $0x8a8] sm:$0xff]  ;;  %v371_v31 = vld [vmem:[%s10020_s1 + $0xae0] sm:$0xff] }
 0x13a   :  { %5378 = vmatpush1.bf16.msra.mxu1 %v5377_v46  ;;  %6175 = vset.pattern.permute.xlu0 %v6201_v26  ;;  %v611_v36 = vld [vmem:[%s10021_s2 + $0x20] sm:$0xff]  ;;  %v388_v45 = vld [vmem:[%s10020_s1 + $0xb68] sm:$0xff] }
 0x13b   :  { %1903 = vmatmul.mubr.f32.gmra.mrb[122].mxu0 %v267_v2  ;;  %705 = vperm.xlu0 %6175, %v607_v27   ;;  %v379_v38 = vld [vmem:[%s10020_s1 + $0xb20] sm:$0xff]  ;;  %v630_v27 = vld [vmem:[%s10021_s2 + $0xb8] sm:$0xff] }
 0x13c   :  { %3185 = vmatmul.mubr.f32.gmra.mrb[122].mxu1 %v267_v2  ;;  %1908 = vmatprep.mubr.f32.mxu0 %v272_v5  ;;  %v319_v2 = vld [vmem:[%s10020_s1 + $0x940] sm:$0xff] }
 0x13d   :  { %3190 = vmatprep.mubr.f32.mxu1 %v272_v5  ;;  %v328_v5 = vld [vmem:[%s10020_s1 + $0x988] sm:$0xff]  ;;  %6176 = vset.pattern.permute.xlu1 %v6201_v26  ;;  %v387_v46 = vld [vmem:[%s10020_s1 + $0xb60] sm:$0xff]  ;;  %v49_v26 = vld [vmem:[%s10020_s1 + $0xd0] sm:$0xff] }
 0x13e   :  { %715 = vperm.xlu1 %6176, %v609_v32   ;;  %v649_v32 = vld [vmem:[%s10021_s2 + $0x150] sm:$0xff] }
 0x13f   :  { %1909 = vmatmul.mubr.f32.gmra.mrb[124].mxu0 %v271_v16 }
 0x140   :  { %3191 = vmatmul.mubr.f32.gmra.mrb[124].mxu1 %v271_v16  ;;  %1914 = vmatprep.mubr.f32.mxu0 %v276_v19  ;;  %v347_v16 = vld [vmem:[%s10020_s1 + $0xa20] sm:$0xff] }
 0x141   :  { %3196 = vmatprep.mubr.f32.mxu1 %v276_v19  ;;  %v356_v19 = vld [vmem:[%s10020_s1 + $0xa68] sm:$0xff] }
 0x142   :  { %720 = vperm.xlu1 %6176, %v610_v35   ;;  %v650_v35 = vld [vmem:[%s10021_s2 + $0x158] sm:$0xff] }
 0x143   :  { %1915 = vmatmul.mubr.f32.gmra.mrb[126].mxu0 %v275_v30 }
 0x144   :  { %3197 = vmatmul.mubr.f32.gmra.mrb[126].mxu1 %v275_v30  ;;  %1920 = vmatprep.mubr.f32.mxu0 %v280_v33  ;;  %v608_v30 = vld [vmem:[%s10021_s2 + $0x8] sm:$0xff] }
 0x145   :  { %3202 = vmatprep.mubr.f32.mxu1 %v280_v33  ;;  %710 = vperm.xlu0 %6175, %v608_v30   ;;  %v376_v33 = vld [vmem:[%s10020_s1 + $0xb08] sm:$0xff]  ;;  %v53_v30 = vld [vmem:[%s10020_s1 + $0xf0] sm:$0xff] }
 0x146   :  { %730 = vperm.xlu1 %6176, %v612_v39   ;;  %v636_v39 = vld [vmem:[%s10021_s2 + $0xe8] sm:$0xff] }
 0x147   :  { %1921 = vmatmul.mubr.f32.gmra.mrb[128].mxu0 %v279_v44 }
 0x148   :  { %3203 = vmatmul.mubr.f32.gmra.mrb[128].mxu1 %v279_v44  ;;  %1926 = vmatprep.mubr.f32.mxu0 %v284_v47  ;;  %v615_v44 = vld [vmem:[%s10021_s2 + $0x40] sm:$0xff] }
 0x149   :  { %3208 = vmatprep.mubr.f32.mxu1 %v284_v47  ;;  %725 = vperm.xlu0 %6175, %v611_v36   ;;  %v616_v47 = vld [vmem:[%s10021_s2 + $0x48] sm:$0xff]  ;;  %v635_v36 = vld [vmem:[%s10021_s2 + $0xe0] sm:$0xff] }
 0x14a   :  { %740 = vperm.xlu1 %6176, %v614_v43   ;;  %v646_v43 = vld [vmem:[%s10021_s2 + $0x138] sm:$0xff] }
 0x14b   :  { %1927 = vmatmul.mubr.f32.gmra.mrb[130].mxu0 %v283_v48 }
 0x14c   :  { %3209 = vmatmul.mubr.f32.gmra.mrb[130].mxu1 %v283_v48  ;;  %1932 = vmatprep.mubr.f32.mxu0 %v288_v49  ;;  %v617_v48 = vld [vmem:[%s10021_s2 + $0x50] sm:$0xff] }
 0x14d   :  { %3214 = vmatprep.mubr.f32.mxu1 %v288_v49  ;;  %735 = vperm.xlu0 %6175, %v613_v40   ;;  %v392_v49 = vld [vmem:[%s10020_s1 + $0xb88] sm:$0xff]  ;;  %v645_v40 = vld [vmem:[%s10021_s2 + $0x130] sm:$0xff] }
 0x14e   :  { %750 = vperm.xlu1 %6176, %v616_v47   ;;  %v656_v47 = vld [vmem:[%s10021_s2 + $0x188] sm:$0xff] }
 0x14f   :  { %1933 = vmatmul.mubr.f32.gmra.mrb[132].mxu0 %v287_v50 }
 0x150   :  { %3215 = vmatmul.mubr.f32.gmra.mrb[132].mxu1 %v287_v50  ;;  %1938 = vmatprep.mubr.f32.mxu0 %v292_v51  ;;  %v391_v50 = vld [vmem:[%s10020_s1 + $0xb80] sm:$0xff] }
 0x151   :  { %3220 = vmatprep.mubr.f32.mxu1 %v292_v51  ;;  %745 = vperm.xlu0 %6175, %v615_v44   ;;  %v618_v51 = vld [vmem:[%s10021_s2 + $0x58] sm:$0xff]  ;;  %v655_v44 = vld [vmem:[%s10021_s2 + $0x180] sm:$0xff] }
 0x152   :  { %760 = vperm.xlu1 %6176, %v618_v51   ;;  %v642_v51 = vld [vmem:[%s10021_s2 + $0x118] sm:$0xff] }
 0x153   :  { %1939 = vmatmul.mubr.f32.gmra.mrb[134].mxu0 %v291_v52 }
 0x154   :  { %3221 = vmatmul.mubr.f32.gmra.mrb[134].mxu1 %v291_v52  ;;  %1944 = vmatprep.mubr.f32.mxu0 %v296_v53  ;;  %v619_v52 = vld [vmem:[%s10021_s2 + $0x60] sm:$0xff] }
 0x155   :  { %3226 = vmatprep.mubr.f32.mxu1 %v296_v53  ;;  %755 = vperm.xlu0 %6175, %v617_v48   ;;  %v396_v53 = vld [vmem:[%s10020_s1 + $0xba8] sm:$0xff]  ;;  %v641_v48 = vld [vmem:[%s10021_s2 + $0x110] sm:$0xff] }
 0x157   :  { %1945 = vmatmul.mubr.f32.gmra.mrb[136].mxu0 %v295_v54 }
 0x158   :  { %3227 = vmatmul.mubr.f32.gmra.mrb[136].mxu1 %v295_v54  ;;  %1950 = vmatprep.mubr.f32.mxu0 %v300_v55  ;;  %v395_v54 = vld [vmem:[%s10020_s1 + $0xba0] sm:$0xff] }
 0x159   :  { %3232 = vmatprep.mubr.f32.mxu1 %v300_v55  ;;  %765 = vperm.xlu0 %6175, %v619_v52   ;;  %v620_v55 = vld [vmem:[%s10021_s2 + $0x68] sm:$0xff]  ;;  %v651_v52 = vld [vmem:[%s10021_s2 + $0x160] sm:$0xff] }
 0x15a   :  { %770 = vperm.xlu1 %6176, %v620_v55   ;;  %v652_v55 = vld [vmem:[%s10021_s2 + $0x168] sm:$0xff] }
 0x15b   :  { %1951 = vmatmul.mubr.f32.gmra.mrb[138].mxu0 %v299_v56 }
 0x15c   :  { %3233 = vmatmul.mubr.f32.gmra.mrb[138].mxu1 %v299_v56  ;;  %1956 = vmatprep.mubr.f32.mxu0 %v304_v57  ;;  %v625_v56 = vld [vmem:[%s10021_s2 + $0x90] sm:$0xff] }
 0x15d   :  { %3238 = vmatprep.mubr.f32.mxu1 %v304_v57  ;;  %v400_v57 = vld [vmem:[%s10020_s1 + $0xbc8] sm:$0xff]  ;;  %795 = vperm.xlu0 %6175, %v625_v56   ;;  %v661_v56 = vld [vmem:[%s10021_s2 + $0x1b0] sm:$0xff] }
 0x15f   :  { %1957 = vmatmul.mubr.f32.gmra.mrb[140].mxu0 %v303_v58 }
 0x160   :  { %3239 = vmatmul.mubr.f32.gmra.mrb[140].mxu1 %v303_v58  ;;  %1962 = vmatprep.mubr.f32.mxu0 %v308_v59  ;;  %v399_v58 = vld [vmem:[%s10020_s1 + $0xbc0] sm:$0xff] }
 0x161   :  { %3244 = vmatprep.mubr.f32.mxu1 %v308_v59  ;;  %v626_v59 = vld [vmem:[%s10021_s2 + $0x98] sm:$0xff] }
 0x162   :  { %800 = vperm.xlu1 %6176, %v626_v59   ;;  %v662_v59 = vld [vmem:[%s10021_s2 + $0x1b8] sm:$0xff] }
 0x163   :  { %1963 = vmatmul.mubr.f32.gmra.mrb[142].mxu0 %v307_v60 }
 0x164   :  { %3245 = vmatmul.mubr.f32.gmra.mrb[142].mxu1 %v307_v60  ;;  %1968 = vmatprep.mubr.f32.mxu0 %v312_v61  ;;  %v621_v60 = vld [vmem:[%s10021_s2 + $0x70] sm:$0xff] }
 0x165   :  { %3250 = vmatprep.mubr.f32.mxu1 %v312_v61  ;;  %v404_v61 = vld [vmem:[%s10020_s1 + $0xbe8] sm:$0xff]  ;;  %775 = vperm.xlu0 %6175, %v621_v60   ;;  %v647_v60 = vld [vmem:[%s10021_s2 + $0x140] sm:$0xff] }
 0x167   :  { %1969 = vmatmul.mubr.f32.gmra.mrb[144].mxu0 %v311_v62 }
 0x168   :  { %3251 = vmatmul.mubr.f32.gmra.mrb[144].mxu1 %v311_v62  ;;  %1974 = vmatprep.mubr.f32.mxu0 %v316_v63  ;;  %v403_v62 = vld [vmem:[%s10020_s1 + $0xbe0] sm:$0xff] }
 0x169   :  { %3256 = vmatprep.mubr.f32.mxu1 %v316_v63  ;;  %v622_v63 = vld [vmem:[%s10021_s2 + $0x78] sm:$0xff] }
 0x16a   :  { %780 = vperm.xlu1 %6176, %v622_v63   ;;  %v648_v63 = vld [vmem:[%s10021_s2 + $0x148] sm:$0xff] }
 0x16b   :  { %1975 = vmatmul.mubr.f32.gmra.mrb[146].mxu0 %v315_v0 }
 0x16c   :  { %3257 = vmatmul.mubr.f32.gmra.mrb[146].mxu1 %v315_v0  ;;  %1980 = vmatprep.mubr.f32.mxu0 %v320_v1  ;;  %v631_v0 = vld [vmem:[%s10021_s2 + $0xc0] sm:$0xff] }
 0x16d   :  { %3262 = vmatprep.mubr.f32.mxu1 %v320_v1  ;;  %v26_v1 = vld [vmem:[%s10020_s1 + $0x18] sm:$0xff]  ;;  %825 = vperm.xlu0 %6175, %v631_v0   ;;  %v657_v0 = vld [vmem:[%s10021_s2 + $0x190] sm:$0xff] }
 0x16f   :  { %1981 = vmatmul.mubr.f32.gmra.mrb[148].mxu0 %v319_v2 }
 0x170   :  { %3263 = vmatmul.mubr.f32.gmra.mrb[148].mxu1 %v319_v2  ;;  %1986 = vmatprep.mubr.f32.mxu0 %v324_v3  ;;  %v25_v2 = vld [vmem:[%s10020_s1 + $0x10] sm:$0xff] }
 0x171   :  { %3268 = vmatprep.mubr.f32.mxu1 %v324_v3  ;;  %v632_v3 = vld [vmem:[%s10021_s2 + $0xc8] sm:$0xff] }
 0x172   :  { %830 = vperm.xlu1 %6176, %v632_v3   ;;  %v658_v3 = vld [vmem:[%s10021_s2 + $0x198] sm:$0xff] }
 0x173   :  { %1987 = vmatmul.mubr.f32.gmra.mrb[150].mxu0 %v323_v4 }
 0x174   :  { %3269 = vmatmul.mubr.f32.gmra.mrb[150].mxu1 %v323_v4  ;;  %1992 = vmatprep.mubr.f32.mxu0 %v328_v5  ;;  %v627_v4 = vld [vmem:[%s10021_s2 + $0xa0] sm:$0xff] }
 0x175   :  { %3274 = vmatprep.mubr.f32.mxu1 %v328_v5  ;;  %v30_v5 = vld [vmem:[%s10020_s1 + $0x38] sm:$0xff]  ;;  %805 = vperm.xlu0 %6175, %v627_v4   ;;  %v667_v4 = vld [vmem:[%s10021_s2 + $0x1e0] sm:$0xff] }
 0x177   :  { %1993 = vmatmul.mubr.f32.gmra.mrb[152].mxu0 %v327_v6 }
 0x178   :  { %3275 = vmatmul.mubr.f32.gmra.mrb[152].mxu1 %v327_v6  ;;  %1998 = vmatprep.mubr.f32.mxu0 %v332_v7  ;;  %v29_v6 = vld [vmem:[%s10020_s1 + $0x30] sm:$0xff] }
 0x179   :  { %3280 = vmatprep.mubr.f32.mxu1 %v332_v7  ;;  %v628_v7 = vld [vmem:[%s10021_s2 + $0xa8] sm:$0xff] }
 0x17a   :  { %810 = vperm.xlu1 %6176, %v628_v7   ;;  %v668_v7 = vld [vmem:[%s10021_s2 + $0x1e8] sm:$0xff] }
 0x17b   :  { %1999 = vmatmul.mubr.f32.gmra.mrb[154].mxu0 %v331_v8 }
 0x17c   :  { %3281 = vmatmul.mubr.f32.gmra.mrb[154].mxu1 %v331_v8  ;;  %2004 = vmatprep.mubr.f32.mxu0 %v336_v9  ;;  %v637_v8 = vld [vmem:[%s10021_s2 + $0xf0] sm:$0xff] }
 0x17d   :  { %3286 = vmatprep.mubr.f32.mxu1 %v336_v9  ;;  %v34_v9 = vld [vmem:[%s10020_s1 + $0x58] sm:$0xff]  ;;  %855 = vperm.xlu0 %6175, %v637_v8   ;;  %v653_v8 = vld [vmem:[%s10021_s2 + $0x170] sm:$0xff] }
 0x17f   :  { %2005 = vmatmul.mubr.f32.gmra.mrb[156].mxu0 %v335_v10 }
 0x180   :  { %3287 = vmatmul.mubr.f32.gmra.mrb[156].mxu1 %v335_v10  ;;  %2010 = vmatprep.mubr.f32.mxu0 %v340_v11  ;;  %v33_v10 = vld [vmem:[%s10020_s1 + $0x50] sm:$0xff] }
 0x181   :  { %3292 = vmatprep.mubr.f32.mxu1 %v340_v11  ;;  %v638_v11 = vld [vmem:[%s10021_s2 + $0xf8] sm:$0xff] }
 0x182   :  { %860 = vperm.xlu1 %6176, %v638_v11   ;;  %v654_v11 = vld [vmem:[%s10021_s2 + $0x178] sm:$0xff] }
 0x183   :  { %2011 = vmatmul.mubr.f32.gmra.mrb[158].mxu0 %v339_v12 }
 0x184   :  { %3293 = vmatmul.mubr.f32.gmra.mrb[158].mxu1 %v339_v12  ;;  %2016 = vmatprep.mubr.f32.mxu0 %v344_v13  ;;  %v623_v12 = vld [vmem:[%s10021_s2 + $0x80] sm:$0xff] }
 0x185   :  { %3298 = vmatprep.mubr.f32.mxu1 %v344_v13  ;;  %v38_v13 = vld [vmem:[%s10020_s1 + $0x78] sm:$0xff]  ;;  %785 = vperm.xlu0 %6175, %v623_v12   ;;  %v663_v12 = vld [vmem:[%s10021_s2 + $0x1c0] sm:$0xff] }
 0x187   :  { %2017 = vmatmul.mubr.f32.gmra.mrb[160].mxu0 %v343_v14 }
 0x188   :  { %3299 = vmatmul.mubr.f32.gmra.mrb[160].mxu1 %v343_v14  ;;  %2022 = vmatprep.mubr.f32.mxu0 %v348_v15  ;;  %v37_v14 = vld [vmem:[%s10020_s1 + $0x70] sm:$0xff] }
 0x189   :  { %3304 = vmatprep.mubr.f32.mxu1 %v348_v15  ;;  %v624_v15 = vld [vmem:[%s10021_s2 + $0x88] sm:$0xff] }
 0x18a   :  { %790 = vperm.xlu1 %6176, %v624_v15   ;;  %v664_v15 = vld [vmem:[%s10021_s2 + $0x1c8] sm:$0xff] }
 0x18b   :  { %2023 = vmatmul.mubr.f32.gmra.mrb[162].mxu0 %v347_v16 }
 0x18c   :  { %3305 = vmatmul.mubr.f32.gmra.mrb[162].mxu1 %v347_v16  ;;  %2028 = vmatprep.mubr.f32.mxu0 %v352_v17  ;;  %v633_v16 = vld [vmem:[%s10021_s2 + $0xd0] sm:$0xff] }
 0x18d   :  { %3310 = vmatprep.mubr.f32.mxu1 %v352_v17  ;;  %v42_v17 = vld [vmem:[%s10020_s1 + $0x98] sm:$0xff]  ;;  %835 = vperm.xlu0 %6175, %v633_v16   ;;  %v673_v16 = vld [vmem:[%s10021_s2 + $0x210] sm:$0xff] }
 0x18f   :  { %2029 = vmatmul.mubr.f32.gmra.mrb[164].mxu0 %v351_v18 }
 0x190   :  { %3311 = vmatmul.mubr.f32.gmra.mrb[164].mxu1 %v351_v18  ;;  %2034 = vmatprep.mubr.f32.mxu0 %v356_v19  ;;  %v41_v18 = vld [vmem:[%s10020_s1 + $0x90] sm:$0xff] }
 0x191   :  { %3316 = vmatprep.mubr.f32.mxu1 %v356_v19  ;;  %v634_v19 = vld [vmem:[%s10021_s2 + $0xd8] sm:$0xff] }
 0x192   :  { %840 = vperm.xlu1 %6176, %v634_v19   ;;  %v674_v19 = vld [vmem:[%s10021_s2 + $0x218] sm:$0xff] }
 0x193   :  { %2035 = vmatmul.mubr.f32.gmra.mrb[166].mxu0 %v355_v20 }
 0x194   :  { %3317 = vmatmul.mubr.f32.gmra.mrb[166].mxu1 %v355_v20  ;;  %2040 = vmatprep.mubr.f32.mxu0 %v360_v21  ;;  %v643_v20 = vld [vmem:[%s10021_s2 + $0x120] sm:$0xff] }
 0x195   :  { %3322 = vmatprep.mubr.f32.mxu1 %v360_v21  ;;  %v46_v21 = vld [vmem:[%s10020_s1 + $0xb8] sm:$0xff]  ;;  %885 = vperm.xlu0 %6175, %v643_v20   ;;  %v659_v20 = vld [vmem:[%s10021_s2 + $0x1a0] sm:$0xff] }
 0x197   :  { %2041 = vmatmul.mubr.f32.gmra.mrb[168].mxu0 %v359_v22 }
 0x198   :  { %3323 = vmatmul.mubr.f32.gmra.mrb[168].mxu1 %v359_v22  ;;  %2046 = vmatprep.mubr.f32.mxu0 %v364_v23  ;;  %v45_v22 = vld [vmem:[%s10020_s1 + $0xb0] sm:$0xff] }
 0x199   :  { %3328 = vmatprep.mubr.f32.mxu1 %v364_v23  ;;  %v644_v23 = vld [vmem:[%s10021_s2 + $0x128] sm:$0xff] }
 0x19a   :  { %890 = vperm.xlu1 %6176, %v644_v23   ;;  %v660_v23 = vld [vmem:[%s10021_s2 + $0x1a8] sm:$0xff] }
 0x19b   :  { %2047 = vmatmul.mubr.f32.gmra.mrb[170].mxu0 %v363_v24 }
 0x19c   :  { %3329 = vmatmul.mubr.f32.gmra.mrb[170].mxu1 %v363_v24  ;;  %2052 = vmatprep.mubr.f32.mxu0 %v368_v25  ;;  %v629_v24 = vld [vmem:[%s10021_s2 + $0xb0] sm:$0xff] }
 0x19d   :  { %3334 = vmatprep.mubr.f32.mxu1 %v368_v25  ;;  %v50_v25 = vld [vmem:[%s10020_s1 + $0xd8] sm:$0xff]  ;;  %815 = vperm.xlu0 %6175, %v629_v24   ;;  %v669_v24 = vld [vmem:[%s10021_s2 + $0x1f0] sm:$0xff] }
 0x19e   :  { %820 = vperm.xlu1 %6176, %v630_v27   ;;  %v670_v27 = vld [vmem:[%s10021_s2 + $0x1f8] sm:$0xff] }
 0x19f   :  { %2053 = vmatmul.mubr.f32.gmra.mrb[172].mxu0 %v367_v28 }
 0x1a0   :  { %3335 = vmatmul.mubr.f32.gmra.mrb[172].mxu1 %v367_v28  ;;  %2058 = vmatprep.mubr.f32.mxu0 %v372_v29  ;;  %v639_v28 = vld [vmem:[%s10021_s2 + $0x100] sm:$0xff] }
 0x1a1   :  { %3340 = vmatprep.mubr.f32.mxu1 %v372_v29  ;;  %v54_v29 = vld [vmem:[%s10020_s1 + $0xf8] sm:$0xff]  ;;  %865 = vperm.xlu0 %6175, %v639_v28   ;;  %v679_v28 = vld [vmem:[%s10021_s2 + $0x240] sm:$0xff] }
 0x1a3   :  { %2059 = vmatmul.mubr.f32.gmra.mrb[174].mxu0 %v371_v31 }
 0x1a4   :  { %3341 = vmatmul.mubr.f32.gmra.mrb[174].mxu1 %v371_v31  ;;  %2064 = vmatprep.mubr.f32.mxu0 %v376_v33  ;;  %v640_v31 = vld [vmem:[%s10021_s2 + $0x108] sm:$0xff] }
 0x1a5   :  { %3346 = vmatprep.mubr.f32.mxu1 %v376_v33  ;;  %v58_v33 = vld [vmem:[%s10020_s1 + $0x118] sm:$0xff]  ;;  %870 = vperm.xlu1 %6176, %v640_v31   ;;  %v680_v31 = vld [vmem:[%s10021_s2 + $0x248] sm:$0xff] }
 0x1a6   :  { %915 = vperm.xlu0 %6175, %v649_v32   ;;  %v665_v32 = vld [vmem:[%s10021_s2 + $0x1d0] sm:$0xff] }
 0x1a7   :  { %2065 = vmatmul.mubr.f32.gmra.mrb[176].mxu0 %v375_v34 }
 0x1a8   :  { %3347 = vmatmul.mubr.f32.gmra.mrb[176].mxu1 %v375_v34  ;;  %2070 = vmatprep.mubr.f32.mxu0 %v380_v37  ;;  %v57_v34 = vld [vmem:[%s10020_s1 + $0x110] sm:$0xff] }
 0x1a9   :  { %3352 = vmatprep.mubr.f32.mxu1 %v380_v37  ;;  %v62_v37 = vld [vmem:[%s10020_s1 + $0x138] sm:$0xff]  ;;  %920 = vperm.xlu1 %6176, %v650_v35  }
 0x1aa   :  { %845 = vperm.xlu0 %6175, %v635_v36   ;;  %v666_v35 = vld [vmem:[%s10021_s2 + $0x1d8] sm:$0xff]  ;;  %v675_v36 = vld [vmem:[%s10021_s2 + $0x220] sm:$0xff] }
 0x1ab   :  { %2071 = vmatmul.mubr.f32.gmra.mrb[178].mxu0 %v379_v38 }
 0x1ac   :  { %3353 = vmatmul.mubr.f32.gmra.mrb[178].mxu1 %v379_v38  ;;  %2076 = vmatprep.mubr.f32.mxu0 %v384_v41  ;;  %v61_v38 = vld [vmem:[%s10020_s1 + $0x130] sm:$0xff] }
 0x1ad   :  { %3358 = vmatprep.mubr.f32.mxu1 %v384_v41  ;;  %v66_v41 = vld [vmem:[%s10020_s1 + $0x158] sm:$0xff]  ;;  %850 = vperm.xlu1 %6176, %v636_v39   ;;  %v676_v39 = vld [vmem:[%s10021_s2 + $0x228] sm:$0xff] }
 0x1ae   :  { %895 = vperm.xlu0 %6175, %v645_v40   ;;  %v685_v40 = vld [vmem:[%s10021_s2 + $0x270] sm:$0xff] }
 0x1af   :  { %2077 = vmatmul.mubr.f32.gmra.mrb[180].mxu0 %v383_v42 }
 0x1b0   :  { %3359 = vmatmul.mubr.f32.gmra.mrb[180].mxu1 %v383_v42  ;;  %2082 = vmatprep.mubr.f32.mxu0 %v388_v45  ;;  %v65_v42 = vld [vmem:[%s10020_s1 + $0x150] sm:$0xff] }
 0x1b1   :  { %3364 = vmatprep.mubr.f32.mxu1 %v388_v45  ;;  %v70_v45 = vld [vmem:[%s10020_s1 + $0x178] sm:$0xff]  ;;  %900 = vperm.xlu1 %6176, %v646_v43  }
 0x1b2   :  { %945 = vperm.xlu0 %6175, %v655_v44   ;;  %v686_v43 = vld [vmem:[%s10021_s2 + $0x278] sm:$0xff]  ;;  %v671_v44 = vld [vmem:[%s10021_s2 + $0x200] sm:$0xff] }
 0x1b3   :  { %2083 = vmatmul.mubr.f32.gmra.mrb[182].mxu0 %v387_v46 }
 0x1b4   :  { %3365 = vmatmul.mubr.f32.gmra.mrb[182].mxu1 %v387_v46  ;;  %2088 = vmatprep.mubr.f32.mxu0 %v392_v49  ;;  %v69_v46 = vld [vmem:[%s10020_s1 + $0x170] sm:$0xff] }
 0x1b5   :  { %3370 = vmatprep.mubr.f32.mxu1 %v392_v49  ;;  %v74_v49 = vld [vmem:[%s10020_s1 + $0x198] sm:$0xff]  ;;  %950 = vperm.xlu1 %6176, %v656_v47   ;;  %v672_v47 = vld [vmem:[%s10021_s2 + $0x208] sm:$0xff] }
 0x1b6   :  { %875 = vperm.xlu0 %6175, %v641_v48   ;;  %v681_v48 = vld [vmem:[%s10021_s2 + $0x250] sm:$0xff] }
 0x1b7   :  { %2089 = vmatmul.mubr.f32.gmra.mrb[184].mxu0 %v391_v50 }
 0x1b8   :  { %3371 = vmatmul.mubr.f32.gmra.mrb[184].mxu1 %v391_v50  ;;  %2094 = vmatprep.mubr.f32.mxu0 %v396_v53  ;;  %v73_v50 = vld [vmem:[%s10020_s1 + $0x190] sm:$0xff] }
 0x1b9   :  { %3376 = vmatprep.mubr.f32.mxu1 %v396_v53  ;;  %v78_v53 = vld [vmem:[%s10020_s1 + $0x1b8] sm:$0xff]  ;;  %880 = vperm.xlu1 %6176, %v642_v51  }
 0x1ba   :  { %925 = vperm.xlu0 %6175, %v651_v52   ;;  %v682_v51 = vld [vmem:[%s10021_s2 + $0x258] sm:$0xff]  ;;  %v691_v52 = vld [vmem:[%s10021_s2 + $0x2a0] sm:$0xff] }
 0x1bb   :  { %2095 = vmatmul.mubr.f32.gmra.mrb[186].mxu0 %v395_v54 }
 0x1bc   :  { %3377 = vmatmul.mubr.f32.gmra.mrb[186].mxu1 %v395_v54  ;;  %2100 = vmatprep.mubr.f32.mxu0 %v400_v57  ;;  %v77_v54 = vld [vmem:[%s10020_s1 + $0x1b0] sm:$0xff] }
 0x1bd   :  { %3382 = vmatprep.mubr.f32.mxu1 %v400_v57  ;;  %v82_v57 = vld [vmem:[%s10020_s1 + $0x1d8] sm:$0xff]  ;;  %930 = vperm.xlu1 %6176, %v652_v55   ;;  %v692_v55 = vld [vmem:[%s10021_s2 + $0x2a8] sm:$0xff] }
 0x1be   :  { %975 = vperm.xlu0 %6175, %v661_v56   ;;  %v677_v56 = vld [vmem:[%s10021_s2 + $0x230] sm:$0xff] }
 0x1bf   :  { %2101 = vmatmul.mubr.f32.gmra.mrb[188].mxu0 %v399_v58 }
 0x1c0   :  { %3383 = vmatmul.mubr.f32.gmra.mrb[188].mxu1 %v399_v58  ;;  %2106 = vmatprep.mubr.f32.mxu0 %v404_v61  ;;  %v81_v58 = vld [vmem:[%s10020_s1 + $0x1d0] sm:$0xff] }
 0x1c1   :  { %3388 = vmatprep.mubr.f32.mxu1 %v404_v61  ;;  %v86_v61 = vld [vmem:[%s10020_s1 + $0x1f8] sm:$0xff]  ;;  %980 = vperm.xlu1 %6176, %v662_v59  }
 0x1c2   :  { %905 = vperm.xlu0 %6175, %v647_v60   ;;  %v678_v59 = vld [vmem:[%s10021_s2 + $0x238] sm:$0xff]  ;;  %v687_v60 = vld [vmem:[%s10021_s2 + $0x280] sm:$0xff] }
 0x1c3   :  { %2107 = vmatmul.mubr.f32.gmra.mrb[190].mxu0 %v403_v62 }
 0x1c4   :  { %3389 = vmatmul.mubr.f32.gmra.mrb[190].mxu1 %v403_v62  ;;  %4985 = vmatprep.mubr.msk.f32.mxu0 %vm1183_vm0, %v26_v1  ;;  %v85_v62 = vld [vmem:[%s10020_s1 + $0x1f0] sm:$0xff] }
 0x1c5   :  { %5081 = vmatprep.mubr.msk.f32.mxu1 %vm1183_vm0, %v26_v1  ;;  %v90_v1 = vld [vmem:[%s10020_s1 + $0x218] sm:$0xff]  ;;  %910 = vperm.xlu1 %6176, %v648_v63   ;;  %v688_v63 = vld [vmem:[%s10021_s2 + $0x288] sm:$0xff] }
 0x1c6   :  { %955 = vperm.xlu0 %6175, %v657_v0   ;;  %v697_v0 = vld [vmem:[%s10021_s2 + $0x2d0] sm:$0xff] }
 0x1c7   :  { %2178 = vmatmul.mubr.f32.vlgmr.msra.gmra.mrb[0].mxu0 %v25_v2 }
 0x1c8   :  { %3460 = vmatmul.mubr.f32.vlgmr.msra.gmra.mrb[0].mxu1 %v25_v2  ;;  %4986 = vmatprep.mubr.msk.f32.mxu0 %vm1183_vm0, %v30_v5  ;;  %v89_v2 = vld [vmem:[%s10020_s1 + $0x210] sm:$0xff] }
 0x1c9   :  { %5082 = vmatprep.mubr.msk.f32.mxu1 %vm1183_vm0, %v30_v5  ;;  %v94_v5 = vld [vmem:[%s10020_s1 + $0x238] sm:$0xff]  ;;  %960 = vperm.xlu1 %6176, %v658_v3  }
 0x1ca   :  { %1005 = vperm.xlu0 %6175, %v667_v4   ;;  %v698_v3 = vld [vmem:[%s10021_s2 + $0x2d8] sm:$0xff]  ;;  %v683_v4 = vld [vmem:[%s10021_s2 + $0x260] sm:$0xff] }
 0x1cb   :  { %2184 = vmatmul.mubr.f32.gmra.mrb[2].mxu0 %v29_v6 }
 0x1cc   :  { %3466 = vmatmul.mubr.f32.gmra.mrb[2].mxu1 %v29_v6  ;;  %4987 = vmatprep.mubr.msk.f32.mxu0 %vm1183_vm0, %v34_v9  ;;  %v93_v6 = vld [vmem:[%s10020_s1 + $0x230] sm:$0xff] }
 0x1cd   :  { %5083 = vmatprep.mubr.msk.f32.mxu1 %vm1183_vm0, %v34_v9  ;;  %v98_v9 = vld [vmem:[%s10020_s1 + $0x258] sm:$0xff]  ;;  %1010 = vperm.xlu1 %6176, %v668_v7   ;;  %v684_v7 = vld [vmem:[%s10021_s2 + $0x268] sm:$0xff] }
 0x1ce   :  { %935 = vperm.xlu0 %6175, %v653_v8   ;;  %v693_v8 = vld [vmem:[%s10021_s2 + $0x2b0] sm:$0xff] }
 0x1cf   :  { %2190 = vmatmul.mubr.f32.gmra.mrb[4].mxu0 %v33_v10 }
 0x1d0   :  { %3472 = vmatmul.mubr.f32.gmra.mrb[4].mxu1 %v33_v10  ;;  %4988 = vmatprep.mubr.msk.f32.mxu0 %vm1183_vm0, %v38_v13  ;;  %v97_v10 = vld [vmem:[%s10020_s1 + $0x250] sm:$0xff] }
 0x1d1   :  { %5084 = vmatprep.mubr.msk.f32.mxu1 %vm1183_vm0, %v38_v13  ;;  %v102_v13 = vld [vmem:[%s10020_s1 + $0x278] sm:$0xff]  ;;  %940 = vperm.xlu1 %6176, %v654_v11  }
 0x1d2   :  { %985 = vperm.xlu0 %6175, %v663_v12   ;;  %v694_v11 = vld [vmem:[%s10021_s2 + $0x2b8] sm:$0xff]  ;;  %v689_v12 = vld [vmem:[%s10021_s2 + $0x290] sm:$0xff] }
 0x1d3   :  { %2196 = vmatmul.mubr.f32.gmra.mrb[6].mxu0 %v37_v14 }
 0x1d4   :  { %3478 = vmatmul.mubr.f32.gmra.mrb[6].mxu1 %v37_v14  ;;  %4989 = vmatprep.mubr.msk.f32.mxu0 %vm1183_vm0, %v42_v17  ;;  %v101_v14 = vld [vmem:[%s10020_s1 + $0x270] sm:$0xff] }
 0x1d5   :  { %5085 = vmatprep.mubr.msk.f32.mxu1 %vm1183_vm0, %v42_v17  ;;  %v106_v17 = vld [vmem:[%s10020_s1 + $0x298] sm:$0xff]  ;;  %990 = vperm.xlu1 %6176, %v664_v15  }
 0x1d6   :  { %1035 = vperm.xlu0 %6175, %v673_v16   ;;  %v690_v15 = vld [vmem:[%s10021_s2 + $0x298] sm:$0xff]  ;;  %v699_v16 = vld [vmem:[%s10021_s2 + $0x2e0] sm:$0xff] }
 0x1d7   :  { %2202 = vmatmul.mubr.f32.gmra.mrb[8].mxu0 %v41_v18 }
 0x1d8   :  { %3484 = vmatmul.mubr.f32.gmra.mrb[8].mxu1 %v41_v18  ;;  %4990 = vmatprep.mubr.msk.f32.mxu0 %vm1183_vm0, %v46_v21  ;;  %v105_v18 = vld [vmem:[%s10020_s1 + $0x290] sm:$0xff] }
 0x1d9   :  { %5086 = vmatprep.mubr.msk.f32.mxu1 %vm1183_vm0, %v46_v21  ;;  %v110_v21 = vld [vmem:[%s10020_s1 + $0x2b8] sm:$0xff]  ;;  %1040 = vperm.xlu1 %6176, %v674_v19   ;;  %v700_v19 = vld [vmem:[%s10021_s2 + $0x2e8] sm:$0xff] }
 0x1da   :  { %965 = vperm.xlu0 %6175, %v659_v20   ;;  %v695_v20 = vld [vmem:[%s10021_s2 + $0x2c0] sm:$0xff] }
 0x1db   :  { %2208 = vmatmul.mubr.f32.gmra.mrb[10].mxu0 %v45_v22 }
 0x1dc   :  { %3490 = vmatmul.mubr.f32.gmra.mrb[10].mxu1 %v45_v22  ;;  %4991 = vmatprep.mubr.msk.f32.mxu0 %vm1183_vm0, %v50_v25  ;;  %v109_v22 = vld [vmem:[%s10020_s1 + $0x2b0] sm:$0xff] }
 0x1dd   :  { %5087 = vmatprep.mubr.msk.f32.mxu1 %vm1183_vm0, %v50_v25  ;;  %v114_v25 = vld [vmem:[%s10020_s1 + $0x2d8] sm:$0xff]  ;;  %970 = vperm.xlu1 %6176, %v660_v23   ;;  %v696_v23 = vld [vmem:[%s10021_s2 + $0x2c8] sm:$0xff] }
 0x1de   :  { %1015 = vperm.xlu0 %6175, %v669_v24   ;;  %v701_v24 = vld [vmem:[%s10021_s2 + $0x2f0] sm:$0xff] }
 0x1df   :  { %2214 = vmatmul.mubr.f32.gmra.mrb[12].mxu0 %v49_v26 }
 0x1e0   :  { %3496 = vmatmul.mubr.f32.gmra.mrb[12].mxu1 %v49_v26  ;;  %4992 = vmatprep.mubr.msk.f32.mxu0 %vm1183_vm0, %v54_v29  ;;  %v113_v26 = vld [vmem:[%s10020_s1 + $0x2d0] sm:$0xff] }
 0x1e1   :  { %5088 = vmatprep.mubr.msk.f32.mxu1 %vm1183_vm0, %v54_v29  ;;  %v118_v29 = vld [vmem:[%s10020_s1 + $0x2f8] sm:$0xff]  ;;  %1020 = vperm.xlu1 %6176, %v670_v27  }
 0x1e2   :  { %1065 = vperm.xlu0 %6175, %v679_v28   ;;  %v702_v27 = vld [vmem:[%s10021_s2 + $0x2f8] sm:$0xff]  ;;  %v4781_v28 = vld [vmem:[#allocation2] sm:$0x1] }
 0x1e3   :  { %2220 = vmatmul.mubr.f32.gmra.mrb[14].mxu0 %v53_v30 }
 0x1e4   :  { %3502 = vmatmul.mubr.f32.gmra.mrb[14].mxu1 %v53_v30  ;;  %4993 = vmatprep.mubr.msk.f32.mxu0 %vm1183_vm0, %v58_v33  ;;  %v117_v30 = vld [vmem:[%s10020_s1 + $0x2f0] sm:$0xff] }
 0x1e5   :  { %5089 = vmatprep.mubr.msk.f32.mxu1 %vm1183_vm0, %v58_v33  ;;  %v122_v33 = vld [vmem:[%s10020_s1 + $0x318] sm:$0xff]  ;;  %1070 = vperm.xlu1 %6176, %v680_v31  }
 0x1e6   :  { %995 = vperm.xlu0 %6175, %v665_v32   ;;  %v186_v31 = vld [vmem:[%s10020_s1 + $0x518] sm:$0xff]  ;;  %v185_v32 = vld [vmem:[%s10020_s1 + $0x510] sm:$0xff] }
 0x1e7   :  { %2226 = vmatmul.mubr.f32.gmra.mrb[16].mxu0 %v57_v34 }
 0x1e8   :  { %3508 = vmatmul.mubr.f32.gmra.mrb[16].mxu1 %v57_v34  ;;  %4994 = vmatprep.mubr.msk.f32.mxu0 %vm1183_vm0, %v62_v37  ;;  %v121_v34 = vld [vmem:[%s10020_s1 + $0x310] sm:$0xff] }
 0x1e9   :  { %5090 = vmatprep.mubr.msk.f32.mxu1 %vm1183_vm0, %v62_v37  ;;  %v126_v37 = vld [vmem:[%s10020_s1 + $0x338] sm:$0xff]  ;;  %1000 = vperm.xlu1 %6176, %v666_v35  }
 0x1ea   :  { %1045 = vperm.xlu0 %6175, %v675_v36   ;;  %v194_v35 = vld [vmem:[%s10020_s1 + $0x558] sm:$0xff]  ;;  %v193_v36 = vld [vmem:[%s10020_s1 + $0x550] sm:$0xff] }
 0x1eb   :  { %2232 = vmatmul.mubr.f32.gmra.mrb[18].mxu0 %v61_v38 }
 0x1ec   :  { %3514 = vmatmul.mubr.f32.gmra.mrb[18].mxu1 %v61_v38  ;;  %4995 = vmatprep.mubr.msk.f32.mxu0 %vm1183_vm0, %v66_v41  ;;  %v125_v38 = vld [vmem:[%s10020_s1 + $0x330] sm:$0xff] }
 0x1ed   :  { %5091 = vmatprep.mubr.msk.f32.mxu1 %vm1183_vm0, %v66_v41  ;;  %v130_v41 = vld [vmem:[%s10020_s1 + $0x358] sm:$0xff]  ;;  %1050 = vperm.xlu1 %6176, %v676_v39  }
 0x1ee   :  { %1095 = vperm.xlu0 %6175, %v685_v40   ;;  %v202_v39 = vld [vmem:[%s10020_s1 + $0x598] sm:$0xff]  ;;  %v201_v40 = vld [vmem:[%s10020_s1 + $0x590] sm:$0xff] }
 0x1ef   :  { %2238 = vmatmul.mubr.f32.gmra.mrb[20].mxu0 %v65_v42 }
 0x1f0   :  { %3520 = vmatmul.mubr.f32.gmra.mrb[20].mxu1 %v65_v42  ;;  %4996 = vmatprep.mubr.msk.f32.mxu0 %vm1183_vm0, %v70_v45  ;;  %v129_v42 = vld [vmem:[%s10020_s1 + $0x350] sm:$0xff] }
 0x1f1   :  { %5092 = vmatprep.mubr.msk.f32.mxu1 %vm1183_vm0, %v70_v45  ;;  %v134_v45 = vld [vmem:[%s10020_s1 + $0x378] sm:$0xff]  ;;  %1100 = vperm.xlu1 %6176, %v686_v43  }
 0x1f2   :  { %1025 = vperm.xlu0 %6175, %v671_v44   ;;  %v210_v43 = vld [vmem:[%s10020_s1 + $0x5d8] sm:$0xff]  ;;  %v209_v44 = vld [vmem:[%s10020_s1 + $0x5d0] sm:$0xff] }
 0x1f3   :  { %2244 = vmatmul.mubr.f32.gmra.mrb[22].mxu0 %v69_v46 }
 0x1f4   :  { %3526 = vmatmul.mubr.f32.gmra.mrb[22].mxu1 %v69_v46  ;;  %4997 = vmatprep.mubr.msk.f32.mxu0 %vm1183_vm0, %v74_v49  ;;  %v133_v46 = vld [vmem:[%s10020_s1 + $0x370] sm:$0xff] }
 0x1f5   :  { %5093 = vmatprep.mubr.msk.f32.mxu1 %vm1183_vm0, %v74_v49  ;;  %v138_v49 = vld [vmem:[%s10020_s1 + $0x398] sm:$0xff]  ;;  %1030 = vperm.xlu1 %6176, %v672_v47  }
 0x1f6   :  { %1075 = vperm.xlu0 %6175, %v681_v48   ;;  %v218_v47 = vld [vmem:[%s10020_s1 + $0x618] sm:$0xff]  ;;  %v217_v48 = vld [vmem:[%s10020_s1 + $0x610] sm:$0xff] }
 0x1f7   :  { %2250 = vmatmul.mubr.f32.gmra.mrb[24].mxu0 %v73_v50 }
 0x1f8   :  { %3532 = vmatmul.mubr.f32.gmra.mrb[24].mxu1 %v73_v50  ;;  %4998 = vmatprep.mubr.msk.f32.mxu0 %vm1183_vm0, %v78_v53  ;;  %v137_v50 = vld [vmem:[%s10020_s1 + $0x390] sm:$0xff] }
 0x1f9   :  { %5094 = vmatprep.mubr.msk.f32.mxu1 %vm1183_vm0, %v78_v53  ;;  %v142_v53 = vld [vmem:[%s10020_s1 + $0x3b8] sm:$0xff]  ;;  %1080 = vperm.xlu1 %6176, %v682_v51  }
 0x1fa   :  { %1125 = vperm.xlu0 %6175, %v691_v52   ;;  %v226_v51 = vld [vmem:[%s10020_s1 + $0x658] sm:$0xff]  ;;  %v225_v52 = vld [vmem:[%s10020_s1 + $0x650] sm:$0xff] }
 0x1fb   :  { %2256 = vmatmul.mubr.f32.gmra.mrb[26].mxu0 %v77_v54 }
 0x1fc   :  { %3538 = vmatmul.mubr.f32.gmra.mrb[26].mxu1 %v77_v54  ;;  %4999 = vmatprep.mubr.msk.f32.mxu0 %vm1183_vm0, %v82_v57  ;;  %v141_v54 = vld [vmem:[%s10020_s1 + $0x3b0] sm:$0xff] }
 0x1fd   :  { %5095 = vmatprep.mubr.msk.f32.mxu1 %vm1183_vm0, %v82_v57  ;;  %v146_v57 = vld [vmem:[%s10020_s1 + $0x3d8] sm:$0xff]  ;;  %1130 = vperm.xlu1 %6176, %v692_v55  }
 0x1fe   :  { %1055 = vperm.xlu0 %6175, %v677_v56   ;;  %v234_v55 = vld [vmem:[%s10020_s1 + $0x698] sm:$0xff]  ;;  %v8121_v56 = vpop.permute.xlu0 %705 }
 0x1ff   :  { %2262 = vmatmul.mubr.f32.gmra.mrb[28].mxu0 %v81_v58 }
 0x200   :  { %3544 = vmatmul.mubr.f32.gmra.mrb[28].mxu1 %v81_v58  ;;  %5000 = vmatprep.mubr.msk.f32.mxu0 %vm1183_vm0, %v86_v61  ;;  %v145_v58 = vld [vmem:[%s10020_s1 + $0x3d0] sm:$0xff] }
 0x201   :  { %5096 = vmatprep.mubr.msk.f32.mxu1 %vm1183_vm0, %v86_v61  ;;  %v150_v61 = vld [vmem:[%s10020_s1 + $0x3f8] sm:$0xff]  ;;  %1060 = vperm.xlu1 %6176, %v678_v59   ;;  %v8131_v59 = vpop.permute.xlu1 %715 }
 0x202   :  { %1105 = vperm.xlu0 %6175, %v687_v60   ;;  %v237_v60 = vld [vmem:[%s10020_s1 + $0x6b0] sm:$0xff] }
 0x203   :  { %2268 = vmatmul.mubr.f32.gmra.mrb[30].mxu0 %v85_v62 }
 0x204   :  { %3550 = vmatmul.mubr.f32.gmra.mrb[30].mxu1 %v85_v62  ;;  %5001 = vmatprep.mubr.msk.f32.mxu0 %vm1183_vm0, %v90_v1  ;;  %v149_v62 = vld [vmem:[%s10020_s1 + $0x3f0] sm:$0xff] }
 0x205   :  { %5097 = vmatprep.mubr.msk.f32.mxu1 %vm1183_vm0, %v90_v1  ;;  %v154_v1 = vld [vmem:[%s10020_s1 + $0x418] sm:$0xff]  ;;  %1110 = vperm.xlu1 %6176, %v688_v63  }
 0x206   :  { %1155 = vperm.xlu0 %6175, %v697_v0  }
 0x207   :  { %2274 = vmatmul.mubr.f32.gmra.mrb[32].mxu0 %v89_v2 }
 0x208   :  { %3556 = vmatmul.mubr.f32.gmra.mrb[32].mxu1 %v89_v2  ;;  %5002 = vmatprep.mubr.msk.f32.mxu0 %vm1183_vm0, %v94_v5  ;;  %v153_v2 = vld [vmem:[%s10020_s1 + $0x410] sm:$0xff] }
 0x209   :  { %5098 = vmatprep.mubr.msk.f32.mxu1 %vm1183_vm0, %v94_v5  ;;  %v158_v5 = vld [vmem:[%s10020_s1 + $0x438] sm:$0xff]  ;;  %1160 = vperm.xlu1 %6176, %v698_v3   ;;  %v241_v3 = vld [vmem:[%s10020_s1 + $0x6d0] sm:$0xff] }
 0x20a   :  { %1085 = vperm.xlu0 %6175, %v683_v4   ;;  %v8147_v4 = vpop.permute.xlu1 %720 }
 0x20b   :  { %2280 = vmatmul.mubr.f32.gmra.mrb[34].mxu0 %v93_v6 }
 0x20c   :  { %3562 = vmatmul.mubr.f32.gmra.mrb[34].mxu1 %v93_v6  ;;  %5003 = vmatprep.mubr.msk.f32.mxu0 %vm1183_vm0, %v98_v9  ;;  %v157_v6 = vld [vmem:[%s10020_s1 + $0x430] sm:$0xff] }
 0x20d   :  { %5099 = vmatprep.mubr.msk.f32.mxu1 %vm1183_vm0, %v98_v9  ;;  %v162_v9 = vld [vmem:[%s10020_s1 + $0x458] sm:$0xff]  ;;  %1090 = vperm.xlu1 %6176, %v684_v7  }
 0x20e   :  { %1135 = vperm.xlu0 %6175, %v693_v8  }
 0x20f   :  { %2286 = vmatmul.mubr.f32.gmra.mrb[36].mxu0 %v97_v10 }
 0x210   :  { %3568 = vmatmul.mubr.f32.gmra.mrb[36].mxu1 %v97_v10  ;;  %5004 = vmatprep.mubr.msk.f32.mxu0 %vm1183_vm0, %v102_v13  ;;  %v161_v10 = vld [vmem:[%s10020_s1 + $0x450] sm:$0xff] }
 0x211   :  { %5100 = vmatprep.mubr.msk.f32.mxu1 %vm1183_vm0, %v102_v13  ;;  %v166_v13 = vld [vmem:[%s10020_s1 + $0x478] sm:$0xff]  ;;  %1140 = vperm.xlu1 %6176, %v694_v11   ;;  %v245_v11 = vld [vmem:[%s10020_s1 + $0x6f0] sm:$0xff] }
 0x212   :  { %1115 = vperm.xlu0 %6175, %v689_v12   ;;  %v250_v12 = vld [vmem:[%s10020_s1 + $0x718] sm:$0xff] }
 0x213   :  { %2292 = vmatmul.mubr.f32.gmra.mrb[38].mxu0 %v101_v14 }
 0x214   :  { %3574 = vmatmul.mubr.f32.gmra.mrb[38].mxu1 %v101_v14  ;;  %5005 = vmatprep.mubr.msk.f32.mxu0 %vm1183_vm0, %v106_v17  ;;  %v165_v14 = vld [vmem:[%s10020_s1 + $0x470] sm:$0xff] }
 0x215   :  { %5101 = vmatprep.mubr.msk.f32.mxu1 %vm1183_vm0, %v106_v17  ;;  %v170_v17 = vld [vmem:[%s10020_s1 + $0x498] sm:$0xff]  ;;  %1120 = vperm.xlu1 %6176, %v690_v15  }
 0x216   :  { %1165 = vperm.xlu0 %6175, %v699_v16  }
 0x217   :  { %2298 = vmatmul.mubr.f32.gmra.mrb[40].mxu0 %v105_v18 }
 0x218   :  { %3580 = vmatmul.mubr.f32.gmra.mrb[40].mxu1 %v105_v18  ;;  %5006 = vmatprep.mubr.msk.f32.mxu0 %vm1183_vm0, %v110_v21  ;;  %v169_v18 = vld [vmem:[%s10020_s1 + $0x490] sm:$0xff] }
 0x219   :  { %5102 = vmatprep.mubr.msk.f32.mxu1 %vm1183_vm0, %v110_v21  ;;  %v174_v21 = vld [vmem:[%s10020_s1 + $0x4b8] sm:$0xff]  ;;  %1170 = vperm.xlu1 %6176, %v700_v19  }
 0x21a   :  { %1145 = vperm.xlu0 %6175, %v695_v20   ;;  %v254_v20 = vld [vmem:[%s10020_s1 + $0x738] sm:$0xff] }
 0x21b   :  { %2304 = vmatmul.mubr.f32.gmra.mrb[42].mxu0 %v109_v22 }
 0x21c   :  { %3586 = vmatmul.mubr.f32.gmra.mrb[42].mxu1 %v109_v22  ;;  %5007 = vmatprep.mubr.msk.f32.mxu0 %vm1183_vm0, %v114_v25  ;;  %v173_v22 = vld [vmem:[%s10020_s1 + $0x4b0] sm:$0xff] }
 0x21d   :  { %5103 = vmatprep.mubr.msk.f32.mxu1 %vm1183_vm0, %v114_v25  ;;  %v178_v25 = vld [vmem:[%s10020_s1 + $0x4d8] sm:$0xff]  ;;  %1150 = vperm.xlu1 %6176, %v696_v23  }
 0x21e   :  { %1175 = vperm.xlu0 %6175, %v701_v24  }
 0x21f   :  { %2310 = vmatmul.mubr.f32.gmra.mrb[44].mxu0 %v113_v26 }
 0x220   :  { %3592 = vmatmul.mubr.f32.gmra.mrb[44].mxu1 %v113_v26  ;;  %5008 = vmatprep.mubr.msk.f32.mxu0 %vm1183_vm0, %v118_v29  ;;  %v177_v26 = vld [vmem:[%s10020_s1 + $0x4d0] sm:$0xff] }
 0x221   :  { %5104 = vmatprep.mubr.msk.f32.mxu1 %vm1183_vm0, %v118_v29  ;;  %v182_v29 = vld [vmem:[%s10020_s1 + $0x4f8] sm:$0xff]  ;;  %1180 = vperm.xlu1 %6176, %v702_v27  }
 0x222   :  { %4784 = vperm.xlu0 %6175, %v4781_v28   ;;  %v258_v27 = vld [vmem:[%s10020_s1 + $0x758] sm:$0xff] }
 0x223   :  { %2316 = vmatmul.mubr.f32.gmra.mrb[46].mxu0 %v117_v30 }
 0x224   :  { %3598 = vmatmul.mubr.f32.gmra.mrb[46].mxu1 %v117_v30  ;;  %5009 = vmatprep.mubr.msk.f32.mxu0 %vm1183_vm0, %v122_v33  ;;  %v181_v30 = vld [vmem:[%s10020_s1 + $0x4f0] sm:$0xff] }
 0x225   :  { %5105 = vmatprep.mubr.msk.f32.mxu1 %vm1183_vm0, %v122_v33  ;;  %v190_v33 = vld [vmem:[%s10020_s1 + $0x538] sm:$0xff] }
 0x227   :  { %2322 = vmatmul.mubr.f32.gmra.mrb[48].mxu0 %v121_v34 }
 0x228   :  { %3604 = vmatmul.mubr.f32.gmra.mrb[48].mxu1 %v121_v34  ;;  %5010 = vmatprep.mubr.msk.f32.mxu0 %vm1183_vm0, %v126_v37  ;;  %v189_v34 = vld [vmem:[%s10020_s1 + $0x530] sm:$0xff] }
 0x229   :  { %5106 = vmatprep.mubr.msk.f32.mxu1 %vm1183_vm0, %v126_v37  ;;  %v198_v37 = vld [vmem:[%s10020_s1 + $0x578] sm:$0xff] }
 0x22b   :  { %2328 = vmatmul.mubr.f32.gmra.mrb[50].mxu0 %v125_v38 }
 0x22c   :  { %3610 = vmatmul.mubr.f32.gmra.mrb[50].mxu1 %v125_v38  ;;  %5011 = vmatprep.mubr.msk.f32.mxu0 %vm1183_vm0, %v130_v41  ;;  %v197_v38 = vld [vmem:[%s10020_s1 + $0x570] sm:$0xff] }
 0x22d   :  { %5107 = vmatprep.mubr.msk.f32.mxu1 %vm1183_vm0, %v130_v41  ;;  %v206_v41 = vld [vmem:[%s10020_s1 + $0x5b8] sm:$0xff] }
 0x22f   :  { %2334 = vmatmul.mubr.f32.gmra.mrb[52].mxu0 %v129_v42 }
 0x230   :  { %3616 = vmatmul.mubr.f32.gmra.mrb[52].mxu1 %v129_v42  ;;  %5012 = vmatprep.mubr.msk.f32.mxu0 %vm1183_vm0, %v134_v45  ;;  %v205_v42 = vld [vmem:[%s10020_s1 + $0x5b0] sm:$0xff] }
 0x231   :  { %5108 = vmatprep.mubr.msk.f32.mxu1 %vm1183_vm0, %v134_v45  ;;  %v214_v45 = vld [vmem:[%s10020_s1 + $0x5f8] sm:$0xff] }
 0x233   :  { %2340 = vmatmul.mubr.f32.gmra.mrb[54].mxu0 %v133_v46 }
 0x234   :  { %3622 = vmatmul.mubr.f32.gmra.mrb[54].mxu1 %v133_v46  ;;  %5013 = vmatprep.mubr.msk.f32.mxu0 %vm1183_vm0, %v138_v49  ;;  %v213_v46 = vld [vmem:[%s10020_s1 + $0x5f0] sm:$0xff] }
 0x235   :  { %5109 = vmatprep.mubr.msk.f32.mxu1 %vm1183_vm0, %v138_v49  ;;  %v222_v49 = vld [vmem:[%s10020_s1 + $0x638] sm:$0xff] }
 0x237   :  { %2346 = vmatmul.mubr.f32.gmra.mrb[56].mxu0 %v137_v50 }
 0x238   :  { %3628 = vmatmul.mubr.f32.gmra.mrb[56].mxu1 %v137_v50  ;;  %5014 = vmatprep.mubr.msk.f32.mxu0 %vm1183_vm0, %v142_v53  ;;  %v221_v50 = vld [vmem:[%s10020_s1 + $0x630] sm:$0xff] }
 0x239   :  { %5110 = vmatprep.mubr.msk.f32.mxu1 %vm1183_vm0, %v142_v53  ;;  %v230_v53 = vld [vmem:[%s10020_s1 + $0x678] sm:$0xff] }
 0x23b   :  { %2352 = vmatmul.mubr.f32.gmra.mrb[58].mxu0 %v141_v54 }
 0x23c   :  { %3634 = vmatmul.mubr.f32.gmra.mrb[58].mxu1 %v141_v54  ;;  %5015 = vmatprep.mubr.msk.f32.mxu0 %vm1183_vm0, %v146_v57  ;;  %v229_v54 = vld [vmem:[%s10020_s1 + $0x670] sm:$0xff] }
 0x23d   :  { %5111 = vmatprep.mubr.msk.f32.mxu1 %vm1183_vm0, %v146_v57  ;;  %v233_v57 = vld [vmem:[%s10020_s1 + $0x690] sm:$0xff] }
 0x23f   :  { %2358 = vmatmul.mubr.f32.gmra.mrb[60].mxu0 %v145_v58 }
 0x240   :  { %3640 = vmatmul.mubr.f32.gmra.mrb[60].mxu1 %v145_v58  ;;  %5016 = vmatprep.mubr.msk.f32.mxu0 %vm1183_vm0, %v150_v61  ;;  %v238_v58 = vld [vmem:[%s10020_s1 + $0x6b8] sm:$0xff] }
 0x241   :  { %5112 = vmatprep.mubr.msk.f32.mxu1 %vm1183_vm0, %v150_v61  ;;  %v8137_v61 = vpop.permute.xlu0 %710 }
 0x243   :  { %2364 = vmatmul.mubr.f32.gmra.mrb[62].mxu0 %v149_v62 }
 0x244   :  { %3646 = vmatmul.mubr.f32.gmra.mrb[62].mxu1 %v149_v62  ;;  %5017 = vmatprep.mubr.msk.f32.mxu0 %vm1183_vm0, %v154_v1  ;;  %v242_v62 = vld [vmem:[%s10020_s1 + $0x6d8] sm:$0xff] }
 0x245   :  { %5113 = vmatprep.mubr.msk.f32.mxu1 %vm1183_vm0, %v154_v1  ;;  %v8153_v7 = vpop.permute.xlu0 %725 }
 0x247   :  { %2370 = vmatmul.mubr.f32.gmra.mrb[64].mxu0 %v153_v2 }
 0x248   :  { %3652 = vmatmul.mubr.f32.gmra.mrb[64].mxu1 %v153_v2  ;;  %5018 = vmatprep.mubr.msk.f32.mxu0 %vm1183_vm0, %v158_v5 }
 0x249   :  { %5114 = vmatprep.mubr.msk.f32.mxu1 %vm1183_vm0, %v158_v5  ;;  %v246_v5 = vld [vmem:[%s10020_s1 + $0x6f8] sm:$0xff]  ;;  %v8169_v19 = vpop.permute.xlu0 %735 }
 0x24b   :  { %2376 = vmatmul.mubr.f32.gmra.mrb[66].mxu0 %v157_v6 }
 0x24c   :  { %3658 = vmatmul.mubr.f32.gmra.mrb[66].mxu1 %v157_v6  ;;  %5019 = vmatprep.mubr.msk.f32.mxu0 %vm1183_vm0, %v162_v9 }
 0x24d   :  { %5115 = vmatprep.mubr.msk.f32.mxu1 %vm1183_vm0, %v162_v9 }
 0x24f   :  { %2382 = vmatmul.mubr.f32.gmra.mrb[68].mxu0 %v161_v10 }
 0x250   :  { %3664 = vmatmul.mubr.f32.gmra.mrb[68].mxu1 %v161_v10  ;;  %5020 = vmatprep.mubr.msk.f32.mxu0 %vm1183_vm0, %v166_v13 }
 0x251   :  { %5116 = vmatprep.mubr.msk.f32.mxu1 %vm1183_vm0, %v166_v13 }
 0x253   :  { %2388 = vmatmul.mubr.f32.gmra.mrb[70].mxu0 %v165_v14 }
 0x254   :  { %3670 = vmatmul.mubr.f32.gmra.mrb[70].mxu1 %v165_v14  ;;  %5021 = vmatprep.mubr.msk.f32.mxu0 %vm1183_vm0, %v170_v17  ;;  %v8163_v14 = vpop.permute.xlu1 %730 }
 0x255   :  { %5117 = vmatprep.mubr.msk.f32.mxu1 %vm1183_vm0, %v170_v17 }
 0x257   :  { %2394 = vmatmul.mubr.f32.gmra.mrb[72].mxu0 %v169_v18 }
 0x258   :  { %3676 = vmatmul.mubr.f32.gmra.mrb[72].mxu1 %v169_v18  ;;  %5022 = vmatprep.mubr.msk.f32.mxu0 %vm1183_vm0, %v174_v21  ;;  %v249_v18 = vld [vmem:[%s10020_s1 + $0x710] sm:$0xff] }
 0x259   :  { %5118 = vmatprep.mubr.msk.f32.mxu1 %vm1183_vm0, %v174_v21 }
 0x25b   :  { %2400 = vmatmul.mubr.f32.gmra.mrb[74].mxu0 %v173_v22 }
 0x25c   :  { %3682 = vmatmul.mubr.f32.gmra.mrb[74].mxu1 %v173_v22  ;;  %5023 = vmatprep.mubr.msk.f32.mxu0 %vm1183_vm0, %v178_v25 }
 0x25d   :  { %5119 = vmatprep.mubr.msk.f32.mxu1 %vm1183_vm0, %v178_v25  ;;  %v253_v25 = vld [vmem:[%s10020_s1 + $0x730] sm:$0xff] }
 0x25f   :  { %2406 = vmatmul.mubr.f32.gmra.mrb[76].mxu0 %v177_v26 }
 0x260   :  { %3688 = vmatmul.mubr.f32.gmra.mrb[76].mxu1 %v177_v26  ;;  %5024 = vmatprep.mubr.msk.f32.mxu0 %vm1183_vm0, %v182_v29  ;;  %v8187_v26 = vpop.permute.xlu1 %740 }
 0x261   :  { %5120 = vmatprep.mubr.msk.f32.mxu1 %vm1183_vm0, %v182_v29  ;;  %v8195_v29 = vpop.permute.xlu0 %745 }
 0x263   :  { %2412 = vmatmul.mubr.f32.gmra.mrb[78].mxu0 %v181_v30 }
 0x264   :  { %3694 = vmatmul.mubr.f32.gmra.mrb[78].mxu1 %v181_v30  ;;  %5025 = vmatprep.mubr.msk.f32.mxu0 %vm1183_vm0, %v186_v31 }
 0x265   :  { %5121 = vmatprep.mubr.msk.f32.mxu1 %vm1183_vm0, %v186_v31 }
 0x267   :  { %2418 = vmatmul.mubr.f32.gmra.mrb[80].mxu0 %v185_v32 }
 0x268   :  { %3700 = vmatmul.mubr.f32.gmra.mrb[80].mxu1 %v185_v32  ;;  %5026 = vmatprep.mubr.msk.f32.mxu0 %vm1183_vm0, %v190_v33 }
 0x269   :  { %5122 = vmatprep.mubr.msk.f32.mxu1 %vm1183_vm0, %v190_v33  ;;  %v257_v33 = vld [vmem:[%s10020_s1 + $0x750] sm:$0xff] }
 0x26b   :  { %2424 = vmatmul.mubr.f32.gmra.mrb[82].mxu0 %v189_v34 }
 0x26c   :  { %3706 = vmatmul.mubr.f32.gmra.mrb[82].mxu1 %v189_v34  ;;  %5027 = vmatprep.mubr.msk.f32.mxu0 %vm1183_vm0, %v194_v35 }
 0x26d   :  { %5123 = vmatprep.mubr.msk.f32.mxu1 %vm1183_vm0, %v194_v35 }
 0x26f   :  { %2430 = vmatmul.mubr.f32.gmra.mrb[84].mxu0 %v193_v36 }
 0x270   :  { %3712 = vmatmul.mubr.f32.gmra.mrb[84].mxu1 %v193_v36  ;;  %5028 = vmatprep.mubr.msk.f32.mxu0 %vm1183_vm0, %v198_v37  ;;  %v262_v36 = vld [vmem:[%s10020_s1 + $0x778] sm:$0xff] }
 0x271   :  { %5124 = vmatprep.mubr.msk.f32.mxu1 %vm1183_vm0, %v198_v37 }
 0x273   :  { %2436 = vmatmul.mubr.f32.gmra.mrb[86].mxu0 %v197_v38 }
 0x274   :  { %3718 = vmatmul.mubr.f32.gmra.mrb[86].mxu1 %v197_v38  ;;  %5029 = vmatprep.mubr.msk.f32.mxu0 %vm1183_vm0, %v202_v39 }
 0x275   :  { %5125 = vmatprep.mubr.msk.f32.mxu1 %vm1183_vm0, %v202_v39 }
 0x277   :  { %2442 = vmatmul.mubr.f32.gmra.mrb[88].mxu0 %v201_v40 }
 0x278   :  { %3724 = vmatmul.mubr.f32.gmra.mrb[88].mxu1 %v201_v40  ;;  %5030 = vmatprep.mubr.msk.f32.mxu0 %vm1183_vm0, %v206_v41 }
 0x279   :  { %5126 = vmatprep.mubr.msk.f32.mxu1 %vm1183_vm0, %v206_v41 }
 0x27b   :  { %2448 = vmatmul.mubr.f32.gmra.mrb[90].mxu0 %v205_v42 }
 0x27c   :  { %3730 = vmatmul.mubr.f32.gmra.mrb[90].mxu1 %v205_v42  ;;  %5031 = vmatprep.mubr.msk.f32.mxu0 %vm1183_vm0, %v210_v43  ;;  %v8231_v42 = vpop.permute.xlu1 %750 }
 0x27d   :  { %5127 = vmatprep.mubr.msk.f32.mxu1 %vm1183_vm0, %v210_v43 }
 0x27f   :  { %2454 = vmatmul.mubr.f32.gmra.mrb[92].mxu0 %v209_v44 }
 0x280   :  { %3736 = vmatmul.mubr.f32.gmra.mrb[92].mxu1 %v209_v44  ;;  %5032 = vmatprep.mubr.msk.f32.mxu0 %vm1183_vm0, %v214_v45 }
 0x281   :  { %5128 = vmatprep.mubr.msk.f32.mxu1 %vm1183_vm0, %v214_v45 }
 0x283   :  { %2460 = vmatmul.mubr.f32.gmra.mrb[94].mxu0 %v213_v46 }
 0x284   :  { %3742 = vmatmul.mubr.f32.gmra.mrb[94].mxu1 %v213_v46  ;;  %5033 = vmatprep.mubr.msk.f32.mxu0 %vm1183_vm0, %v218_v47 }
 0x285   :  { %5129 = vmatprep.mubr.msk.f32.mxu1 %vm1183_vm0, %v218_v47 }
 0x287   :  { %2466 = vmatmul.mubr.f32.gmra.mrb[96].mxu0 %v217_v48 }
 0x288   :  { %3748 = vmatmul.mubr.f32.gmra.mrb[96].mxu1 %v217_v48  ;;  %5034 = vmatprep.mubr.msk.f32.mxu0 %vm1183_vm0, %v222_v49 }
 0x289   :  { %5130 = vmatprep.mubr.msk.f32.mxu1 %vm1183_vm0, %v222_v49 }
 0x28b   :  { %2472 = vmatmul.mubr.f32.gmra.mrb[98].mxu0 %v221_v50 }
 0x28c   :  { %3754 = vmatmul.mubr.f32.gmra.mrb[98].mxu1 %v221_v50  ;;  %5035 = vmatprep.mubr.msk.f32.mxu0 %vm1183_vm0, %v226_v51 }
 0x28d   :  { %5131 = vmatprep.mubr.msk.f32.mxu1 %vm1183_vm0, %v226_v51  ;;  %v261_v51 = vld [vmem:[%s10020_s1 + $0x770] sm:$0xff] }
 0x28f   :  { %2478 = vmatmul.mubr.f32.gmra.mrb[100].mxu0 %v225_v52 }
 0x290   :  { %3760 = vmatmul.mubr.f32.gmra.mrb[100].mxu1 %v225_v52  ;;  %5036 = vmatprep.mubr.msk.f32.mxu0 %vm1183_vm0, %v230_v53  ;;  %v8258_v52 = vpop.permute.xlu0 %755 }
 0x291   :  { %5132 = vmatprep.mubr.msk.f32.mxu1 %vm1183_vm0, %v230_v53 }
 0x293   :  { %2484 = vmatmul.mubr.f32.gmra.mrb[102].mxu0 %v229_v54 }
 0x294   :  { %3766 = vmatmul.mubr.f32.gmra.mrb[102].mxu1 %v229_v54  ;;  %5037 = vmatprep.mubr.msk.f32.mxu0 %vm1183_vm0, %v234_v55 }
 0x295   :  { %5133 = vmatprep.mubr.msk.f32.mxu1 %vm1183_vm0, %v234_v55 }
 0x297   :  { %2490 = vmatmul.mubr.f32.gmra.mrb[104].mxu0 %v233_v57 }
 0x298   :  { %3772 = vmatmul.mubr.f32.gmra.mrb[104].mxu1 %v233_v57  ;;  %5038 = vmatprep.mubr.msk.f32.mxu0 %vm1183_vm0, %v238_v58 }
 0x299   :  { %5134 = vmatprep.mubr.msk.f32.mxu1 %vm1183_vm0, %v238_v58 }
 0x29a   :  { %v2179_v63 = vpop.f32.mrb[0].mxu0 }
 0x29b   :  { %v3461_v0 = vpop.f32.mrb[0].mxu1  ;;  %v2181_v1 = vpop.f32.mrb[1].mxu0  ;;  %2496 = vmatmul.mubr.f32.gmra.mrb[106].mxu0 %v237_v60  ;;  %v8208_v34 = vadd.f32 %v2179_v63, %v8121_v56 }
 0x29c   :  { %v3463_v2 = vpop.f32.mrb[1].mxu1  ;;  %3778 = vmatmul.mubr.f32.gmra.mrb[106].mxu1 %v237_v60  ;;  %5039 = vmatprep.mubr.msk.f32.mxu0 %vm1183_vm0, %v242_v62  ;;  %v8211_v35 = vadd.f32 %v3461_v0, %v8121_v56  ;;  %v8218_v37 = vadd.f32 %v2181_v1, %v8121_v56 }
 0x29d   :  { %5135 = vmatprep.mubr.msk.f32.mxu1 %vm1183_vm0, %v242_v62  ;;  %v8221_v38 = vadd.f32 %v3463_v2, %v8121_v56  ;;  %v4036_v53 = vmax.f32 %v8208_v34, 0.0  ;;  %v266_v56 = vld [vmem:[%s10020_s1 + $0x798] sm:$0xff]  ;;  %v8305_v34 = vpop.permute.xlu0 %765 }
 0x29e   :  { %v2185_v6 = vpop.f32.mrb[2].mxu0  ;;  %v4038_v54 = vmax.f32 %v8211_v35, 0.0  ;;  %v4037_v57 = vmax.f32 %v8218_v37, 0.0 }
 0x29f   :  { %v3467_v8 = vpop.f32.mrb[2].mxu1  ;;  %v2187_v9 = vpop.f32.mrb[3].mxu0  ;;  %2502 = vmatmul.mubr.f32.gmra.mrb[108].mxu0 %v241_v3  ;;  %v8224_v39 = vadd.f32 %v2185_v6, %v8137_v61  ;;  %v4039_v58 = vmax.f32 %v8221_v38, 0.0 }
 0x2a0   :  { %v3469_v10 = vpop.f32.mrb[3].mxu1  ;;  %3784 = vmatmul.mubr.f32.gmra.mrb[108].mxu1 %v241_v3  ;;  %5040 = vmatprep.mubr.msk.f32.mxu0 %vm1183_vm0, %v246_v5  ;;  %v8227_v40 = vadd.f32 %v3467_v8, %v8137_v61  ;;  %v8234_v43 = vadd.f32 %v2187_v9, %v8137_v61 }
 0x2a1   :  { %5136 = vmatprep.mubr.msk.f32.mxu1 %vm1183_vm0, %v246_v5  ;;  %v8237_v44 = vadd.f32 %v3469_v10, %v8137_v61  ;;  %v4040_v60 = vmax.f32 %v8224_v39, 0.0 }
 0x2a2   :  { %v2191_v13 = vpop.f32.mrb[4].mxu0  ;;  %v4042_v61 = vmax.f32 %v8227_v40, 0.0  ;;  %v4041_v63 = vmax.f32 %v8234_v43, 0.0 }
 0x2a3   :  { %v3473_v15 = vpop.f32.mrb[4].mxu1  ;;  %v2193_v16 = vpop.f32.mrb[5].mxu0  ;;  %2508 = vmatmul.mubr.f32.gmra.mrb[110].mxu0 %v245_v11  ;;  %v8240_v45 = vadd.f32 %v2191_v13, %v8131_v59 }
 0x2a4   :  { %v3475_v17 = vpop.f32.mrb[5].mxu1  ;;  %3790 = vmatmul.mubr.f32.gmra.mrb[110].mxu1 %v245_v11  ;;  %5041 = vmatprep.mubr.msk.f32.mxu0 %vm1183_vm0, %v250_v12  ;;  %v8247_v48 = vadd.f32 %v3473_v15, %v8131_v59  ;;  %v8250_v49 = vadd.f32 %v2193_v16, %v8131_v59  ;;  %v265_v11 = vld [vmem:[%s10020_s1 + $0x790] sm:$0xff] }
 0x2a5   :  { %5137 = vmatprep.mubr.msk.f32.mxu1 %vm1183_vm0, %v250_v12  ;;  %v8263_v55 = vadd.f32 %v3475_v17, %v8131_v59  ;;  %v4043_v59 = vmax.f32 %v8237_v44, 0.0  ;;  %v4044_v0 = vmax.f32 %v8240_v45, 0.0  ;;  %v8285_v12 = vpop.permute.xlu1 %760 }
 0x2a6   :  { %v8175_v21 = vpop.f32.mrb[6].mxu0  ;;  %v4046_v5 = vmax.f32 %v8247_v48, 0.0  ;;  %v4045_v6 = vmax.f32 %v8250_v49, 0.0 }
 0x2a7   :  { %v8177_v22 = vpop.f32.mrb[6].mxu1  ;;  %v8179_v23 = vpop.f32.mrb[7].mxu0  ;;  %2514 = vmatmul.mubr.f32.gmra.mrb[112].mxu0 %v249_v18  ;;  %v4047_v13 = vmax.f32 %v8263_v55, 0.0  ;;  %v8290_v15 = vadd.f32 %v8175_v21, %v8147_v4  ;;  %v270_v21 = vld [vmem:[%s10020_s1 + $0x7b8] sm:$0xff] }
 0x2a8   :  { %v8181_v24 = vpop.f32.mrb[7].mxu1  ;;  %3796 = vmatmul.mubr.f32.gmra.mrb[112].mxu1 %v249_v18  ;;  %5042 = vmatprep.mubr.msk.f32.mxu0 %vm1183_vm0, %v254_v20  ;;  %v8296_v18 = vadd.f32 %v8177_v22, %v8147_v4  ;;  %v282_v55 = vld [vmem:[%s10020_s1 + $0x818] sm:$0xff] }
 0x2a9   :  { %5138 = vmatprep.mubr.msk.f32.mxu1 %vm1183_vm0, %v254_v20  ;;  %v8300_v20 = vadd.f32 %v8179_v23, %v8147_v4 }
 0x2aa   :  { %v8193_v28 = vpop.f32.mrb[8].mxu0 }
 0x2ab   :  { %v8197_v30 = vpop.f32.mrb[8].mxu1  ;;  %v8199_v31 = vpop.f32.mrb[9].mxu0  ;;  %2520 = vmatmul.mubr.f32.gmra.mrb[114].mxu0 %v253_v25  ;;  %v8357_v40 = vadd.f32 %v8193_v28, %v8153_v7 }
 0x2ac   :  { %v8201_v32 = vpop.f32.mrb[9].mxu1  ;;  %3802 = vmatmul.mubr.f32.gmra.mrb[114].mxu1 %v253_v25  ;;  %5043 = vmatprep.mubr.msk.f32.mxu0 %vm1183_vm0, %v258_v27 }
 0x2ad   :  { %5139 = vmatprep.mubr.msk.f32.mxu1 %vm1183_vm0, %v258_v27  ;;  %v4052_v48 = vmax.f32 %v8357_v40, 0.0 }
 0x2ae   :  { %v8229_v41 = vpop.f32.mrb[10].mxu0 }
 0x2af   :  { %v8242_v46 = vpop.f32.mrb[10].mxu1  ;;  %v8244_v47 = vpop.f32.mrb[11].mxu0  ;;  %2526 = vmatmul.mubr.f32.gmra.mrb[116].mxu0 %v257_v33 }
 0x2b0   :  { %v8252_v50 = vpop.f32.mrb[11].mxu1  ;;  %3808 = vmatmul.mubr.f32.gmra.mrb[116].mxu1 %v257_v33  ;;  %5044 = vmatprep.mubr.msk.f32.mxu0 %vm1183_vm0, %v262_v36 }
 0x2b1   :  { %5140 = vmatprep.mubr.msk.f32.mxu1 %vm1183_vm0, %v262_v36 }
 0x2b2   :  { %v2215_v62 = vpop.f32.mrb[12].mxu0 }
 0x2b3   :  { %v5415_v1 = vadd.f32 %v2215_v62, %v8169_v19  ;;  %v3497_v2 = vpop.f32.mrb[12].mxu1  ;;  %v2217_v3 = vpop.f32.mrb[13].mxu0  ;;  %2532 = vmatmul.mubr.f32.gmra.mrb[118].mxu0 %v261_v51 }
 0x2b4   :  { %v5607_v8 = vadd.f32 %v3497_v2, %v8169_v19  ;;  %v5416_v9 = vadd.f32 %v2217_v3, %v8169_v19  ;;  %v3499_v10 = vpop.f32.mrb[13].mxu1  ;;  %3814 = vmatmul.mubr.f32.gmra.mrb[118].mxu1 %v261_v51  ;;  %5045 = vmatprep.mubr.msk.f32.mxu0 %vm1183_vm0, %v266_v56  ;;  %v4049_v2 = vmax.f32 %v8300_v20, 0.0 }
 0x2b5   :  { %v4060_v16 = vmax.f32 %v5415_v1, 0.0  ;;  %v5608_v17 = vadd.f32 %v3499_v10, %v8169_v19  ;;  %5141 = vmatprep.mubr.msk.f32.mxu1 %vm1183_vm0, %v266_v56  ;;  %v8309_v19 = vadd.f32 %v8181_v24, %v8147_v4  ;;  %v269_v4 = vld [vmem:[%s10020_s1 + $0x7b0] sm:$0xff]  ;;  %v4048_v24 = vmax.f32 %v8290_v15, 0.0  ;;  %v274_v10 = vld [vmem:[%s10020_s1 + $0x7d8] sm:$0xff] }
 0x2b6   :  { %v4062_v25 = vmax.f32 %v5607_v8, 0.0  ;;  %v4061_v27 = vmax.f32 %v5416_v9, 0.0  ;;  %v2221_v33 = vpop.f32.mrb[14].mxu0 }
 0x2b7   :  { %v8311_v35 = vmax.f32 %v4036_v53, %v4060_v16  ;;  %v4063_v22 = vmax.f32 %v5608_v17, 0.0  ;;  %v5417_v36 = vadd.f32 %v2221_v33, %v8187_v26  ;;  %v3503_v23 = vpop.f32.mrb[14].mxu1  ;;  %v2223_v37 = vpop.f32.mrb[15].mxu0  ;;  %2538 = vmatmul.mubr.f32.gmra.mrb[120].mxu0 %v265_v11 }
 0x2b8   :  { %v8314_v38 = vmax.f32 %v4038_v54, %v4062_v25  ;;  %v8316_v39 = vmax.f32 %v4037_v57, %v4061_v27  ;;  %v5609_v51 = vadd.f32 %v3503_v23, %v8187_v26  ;;  %v5418_v56 = vadd.f32 %v2223_v37, %v8187_v26  ;;  %v3505_v62 = vpop.f32.mrb[15].mxu1  ;;  %3820 = vmatmul.mubr.f32.gmra.mrb[120].mxu1 %v265_v11  ;;  %v8350_v23 = vpop.permute.xlu0 %795  ;;  %v273_v37 = vld [vmem:[%s10020_s1 + $0x7d0] sm:$0xff] }
 0x2b9   :  { %v8324_v53 = vmax.f32 %v4039_v58, %v4063_v22  ;;  %v4064_v1 = vmax.f32 %v5417_v36, 0.0  ;;  %v5610_v54 = vadd.f32 %v3505_v62, %v8187_v26  ;;  %5046 = vmatprep.mubr.msk.f32.mxu0 %vm1183_vm0, %v270_v21  ;;  %5142 = vmatprep.mubr.msk.f32.mxu1 %vm1183_vm0, %v270_v21  ;;  %v4050_v57 = vmax.f32 %v8296_v18, 0.0  ;;  %v8334_v58 = vpop.permute.xlu1 %770 }
 0x2ba   :  { %v4066_v3 = vmax.f32 %v5609_v51, 0.0  ;;  %v4065_v8 = vmax.f32 %v5418_v56, 0.0  ;;  %v2227_v9 = vpop.f32.mrb[16].mxu0  ;;  %v4051_v11 = vmax.f32 %v8309_v19, 0.0  ;;  %v8368_v51 = vadd.f32 %v8197_v30, %v8153_v7  ;;  %v286_v19 = vld [vmem:[%s10020_s1 + $0x838] sm:$0xff] }
 0x2bb   :  { %v8337_v26 = vmax.f32 %v4040_v60, %v4064_v1  ;;  %v4067_v16 = vmax.f32 %v5610_v54, 0.0  ;;  %v5419_v17 = vadd.f32 %v2227_v9, %v8195_v29  ;;  %v3509_v25 = vpop.f32.mrb[16].mxu1  ;;  %v2229_v27 = vpop.f32.mrb[17].mxu0  ;;  %2544 = vmatmul.mubr.f32.gmra.mrb[122].mxu0 %v269_v4  ;;  %v8372_v56 = vadd.f32 %v8199_v31, %v8153_v7  ;;  %v277_v9 = vld [vmem:[%s10020_s1 + $0x7f0] sm:$0xff] }
 0x2bc   :  { %v8342_v33 = vmax.f32 %v4042_v61, %v4066_v3  ;;  %v8346_v21 = vmax.f32 %v4041_v63, %v4065_v8  ;;  %v5611_v22 = vadd.f32 %v3509_v25, %v8195_v29  ;;  %v5420_v36 = vadd.f32 %v2229_v27, %v8195_v29  ;;  %v3511_v60 = vpop.f32.mrb[17].mxu1  ;;  %3826 = vmatmul.mubr.f32.gmra.mrb[122].mxu1 %v269_v4 }
 0x2bd   :  { %v8361_v43 = vmax.f32 %v4043_v59, %v4067_v16  ;;  %v4068_v61 = vmax.f32 %v5419_v17, 0.0  ;;  %v5612_v63 = vadd.f32 %v3511_v60, %v8195_v29  ;;  %5047 = vmatprep.mubr.msk.f32.mxu0 %vm1183_vm0, %v274_v10  ;;  %5143 = vmatprep.mubr.msk.f32.mxu1 %vm1183_vm0, %v274_v10  ;;  %v278_v59 = vld [vmem:[%s10020_s1 + $0x7f8] sm:$0xff]  ;;  %v8379_v29 = vadd.f32 %v8201_v32, %v8153_v7 }
 0x2be   :  { %v4070_v28 = vmax.f32 %v5611_v22, 0.0  ;;  %v4069_v62 = vmax.f32 %v5420_v36, 0.0  ;;  %v2233_v44 = vpop.f32.mrb[18].mxu0  ;;  %v4054_v10 = vmax.f32 %v8368_v51, 0.0  ;;  %v4053_v16 = vmax.f32 %v8372_v56, 0.0  ;;  %v8411_v22 = vpop.permute.xlu0 %775  ;;  %v281_v56 = vld [vmem:[%s10020_s1 + $0x810] sm:$0xff] }
 0x2bf   :  { %v8383_v4 = vmax.f32 %v4044_v0, %v4068_v61  ;;  %v4071_v30 = vmax.f32 %v5612_v63, 0.0  ;;  %v5421_v1 = vadd.f32 %v2233_v44, %v8231_v42  ;;  %v3515_v31 = vpop.f32.mrb[18].mxu1  ;;  %v2235_v54 = vpop.f32.mrb[19].mxu0  ;;  %2550 = vmatmul.mubr.f32.gmra.mrb[124].mxu0 %v273_v37 }
 0x2c0   :  { %v8388_v3 = vmax.f32 %v4046_v5, %v4070_v28  ;;  %v8392_v8 = vmax.f32 %v4045_v6, %v4069_v62  ;;  %v5613_v7 = vadd.f32 %v3515_v31, %v8231_v42  ;;  %v5422_v32 = vadd.f32 %v2235_v54, %v8231_v42  ;;  %v3517_v45 = vpop.f32.mrb[19].mxu1  ;;  %3832 = vmatmul.mubr.f32.gmra.mrb[124].mxu1 %v273_v37  ;;  %v8396_v0 = vpop.permute.xlu1 %800 }
 0x2c1   :  { %v8404_v5 = vmax.f32 %v4047_v13, %v4071_v30  ;;  %v4072_v49 = vmax.f32 %v5421_v1, 0.0  ;;  %v5614_v6 = vadd.f32 %v3517_v45, %v8231_v42  ;;  %5048 = vmatprep.mubr.msk.f32.mxu0 %vm1183_vm0, %v278_v59  ;;  %5144 = vmatprep.mubr.msk.f32.mxu1 %vm1183_vm0, %v278_v59  ;;  %v4055_v13 = vmax.f32 %v8379_v29, 0.0 }
 0x2c2   :  { %v4074_v17 = vmax.f32 %v5613_v7, 0.0  ;;  %v4073_v25 = vmax.f32 %v5422_v32, 0.0  ;;  %v2239_v27 = vpop.f32.mrb[20].mxu0  ;;  %v5413_v28 = vadd.f32 %v8229_v41, %v8163_v14  ;;  %v5414_v62 = vadd.f32 %v8244_v47, %v8163_v14  ;;  %v8463_v32 = vpop.permute.xlu0 %825 }
 0x2c3   :  { %v8419_v42 = vmax.f32 %v4048_v24, %v4072_v49  ;;  %v4075_v36 = vmax.f32 %v5614_v6, 0.0  ;;  %v5423_v60 = vadd.f32 %v2239_v27, %v8258_v52  ;;  %v3521_v37 = vpop.f32.mrb[20].mxu1  ;;  %v2241_v40 = vpop.f32.mrb[21].mxu0  ;;  %2556 = vmatmul.mubr.f32.gmra.mrb[126].mxu0 %v277_v9 }
 0x2c4   :  { %v8424_v61 = vmax.f32 %v4050_v57, %v4074_v17  ;;  %v8428_v63 = vmax.f32 %v4049_v2, %v4073_v25  ;;  %v5615_v51 = vadd.f32 %v3521_v37, %v8258_v52  ;;  %v5424_v15 = vadd.f32 %v2241_v40, %v8258_v52  ;;  %v3523_v24 = vpop.f32.mrb[21].mxu1  ;;  %3838 = vmatmul.mubr.f32.gmra.mrb[126].mxu1 %v277_v9  ;;  %v8448_v29 = vpop.permute.xlu1 %780 }
 0x2c5   :  { %v8439_v18 = vmax.f32 %v4051_v11, %v4075_v36  ;;  %v4076_v20 = vmax.f32 %v5423_v60, 0.0  ;;  %v5616_v57 = vadd.f32 %v3523_v24, %v8258_v52  ;;  %5049 = vmatprep.mubr.msk.f32.mxu0 %vm1183_vm0, %v282_v55  ;;  %5145 = vmatprep.mubr.msk.f32.mxu1 %vm1183_vm0, %v282_v55  ;;  %v5605_v2 = vadd.f32 %v8242_v46, %v8163_v14  ;;  %v290_v55 = vld [vmem:[%s10020_s1 + $0x858] sm:$0xff] }
 0x2c6   :  { %v4078_v44 = vmax.f32 %v5615_v51, 0.0  ;;  %v4077_v59 = vmax.f32 %v5424_v15, 0.0  ;;  %v2245_v41 = vpop.f32.mrb[22].mxu0  ;;  %v5606_v52 = vadd.f32 %v8252_v50, %v8163_v14  ;;  %v285_v14 = vld [vmem:[%s10020_s1 + $0x830] sm:$0xff]  ;;  %v4056_v50 = vmax.f32 %v5413_v28, 0.0 }
 0x2c7   :  { %v8455_v11 = vmax.f32 %v4052_v48, %v4076_v20  ;;  %v4079_v30 = vmax.f32 %v5616_v57, 0.0  ;;  %v5425_v46 = vadd.f32 %v2245_v41, %v8285_v12  ;;  %v3527_v1 = vpop.f32.mrb[22].mxu1  ;;  %v2247_v31 = vpop.f32.mrb[23].mxu0  ;;  %2562 = vmatmul.mubr.f32.gmra.mrb[128].mxu0 %v281_v56  ;;  %v289_v57 = vld [vmem:[%s10020_s1 + $0x850] sm:$0xff] }
 0x2c8   :  { %v8458_v47 = vmax.f32 %v4054_v10, %v4078_v44  ;;  %v8460_v54 = vmax.f32 %v4053_v16, %v4077_v59  ;;  %v5617_v7 = vadd.f32 %v3527_v1, %v8285_v12  ;;  %v5426_v45 = vadd.f32 %v2247_v31, %v8285_v12  ;;  %v3529_v9 = vpop.f32.mrb[23].mxu1  ;;  %3844 = vmatmul.mubr.f32.gmra.mrb[128].mxu1 %v281_v56  ;;  %v8485_v56 = vpop.permute.xlu1 %830 }
 0x2c9   :  { %v8469_v48 = vmax.f32 %v4055_v13, %v4079_v30  ;;  %v4080_v49 = vmax.f32 %v5425_v46, 0.0  ;;  %v5618_v6 = vadd.f32 %v3529_v9, %v8285_v12  ;;  %5050 = vmatprep.mubr.msk.f32.mxu0 %vm1183_vm0, %v286_v19  ;;  %5146 = vmatprep.mubr.msk.f32.mxu1 %vm1183_vm0, %v286_v19  ;;  %v4058_v10 = vmax.f32 %v5605_v2, 0.0  ;;  %v8496_v41 = vpop.permute.xlu0 %805  ;;  %v294_v30 = vld [vmem:[%s10020_s1 + $0x878] sm:$0xff] }
 0x2ca   :  { %v4057_v16 = vmax.f32 %v5414_v62, 0.0  ;;  %v4082_v17 = vmax.f32 %v5617_v7, 0.0  ;;  %v4081_v25 = vmax.f32 %v5426_v45, 0.0  ;;  %v2251_v27 = vpop.f32.mrb[24].mxu0  ;;  %v4059_v36 = vmax.f32 %v5606_v52, 0.0 }
 0x2cb   :  { %v8477_v60 = vmax.f32 %v4056_v50, %v4080_v49  ;;  %v4083_v13 = vmax.f32 %v5618_v6, 0.0  ;;  %v5427_v37 = vadd.f32 %v2251_v27, %v8305_v34  ;;  %v3533_v12 = vpop.f32.mrb[24].mxu1  ;;  %v2253_v40 = vpop.f32.mrb[25].mxu0  ;;  %2568 = vmatmul.mubr.f32.gmra.mrb[130].mxu0 %v285_v14  ;;  %v298_v27 = vld [vmem:[%s10020_s1 + $0x898] sm:$0xff] }
 0x2cc   :  { %v8480_v51 = vmax.f32 %v4058_v10, %v4082_v17  ;;  %v8482_v15 = vmax.f32 %v4057_v16, %v4081_v25  ;;  %v5619_v24 = vadd.f32 %v3533_v12, %v8305_v34  ;;  %v5428_v28 = vadd.f32 %v2253_v40, %v8305_v34  ;;  %v3535_v20 = vpop.f32.mrb[25].mxu1  ;;  %3850 = vmatmul.mubr.f32.gmra.mrb[130].mxu1 %v285_v14  ;;  %v8522_v16 = vpop.permute.xlu1 %810 }
 0x2cd   :  { %v8491_v2 = vmax.f32 %v4059_v36, %v4083_v13  ;;  %v4084_v62 = vmax.f32 %v5427_v37, 0.0  ;;  %v5620_v44 = vadd.f32 %v3535_v20, %v8305_v34  ;;  %5051 = vmatprep.mubr.msk.f32.mxu0 %vm1183_vm0, %v290_v55  ;;  %5147 = vmatprep.mubr.msk.f32.mxu1 %vm1183_vm0, %v290_v55  ;;  %v8534_v12 = vpop.permute.xlu0 %855  ;;  %v297_v20 = vld [vmem:[%s10020_s1 + $0x890] sm:$0xff] }
 0x2ce   :  { %v4086_v59 = vmax.f32 %v5619_v24, 0.0  ;;  %v4085_v19 = vmax.f32 %v5428_v28, 0.0  ;;  %v2257_v52 = vpop.f32.mrb[26].mxu0 }
 0x2cf   :  { %v8502_v46 = vmax.f32 %v8311_v35, %v4084_v62  ;;  %v4087_v1 = vmax.f32 %v5620_v44, 0.0  ;;  %v5429_v31 = vadd.f32 %v2257_v52, %v8334_v58  ;;  %v3539_v34 = vpop.f32.mrb[26].mxu1  ;;  %v2259_v7 = vpop.f32.mrb[27].mxu0  ;;  %2574 = vmatmul.mubr.f32.gmra.mrb[132].mxu0 %v289_v57  ;;  %v293_v35 = vld [vmem:[%s10020_s1 + $0x870] sm:$0xff] }
 0x2d0   :  { %v8506_v45 = vmax.f32 %v8314_v38, %v4086_v59  ;;  %v8509_v9 = vmax.f32 %v8316_v39, %v4085_v19  ;;  %v5621_v14 = vadd.f32 %v3539_v34, %v8334_v58  ;;  %v5430_v50 = vadd.f32 %v2259_v7, %v8334_v58  ;;  %v3541_v49 = vpop.f32.mrb[27].mxu1  ;;  %3856 = vmatmul.mubr.f32.gmra.mrb[132].mxu1 %v289_v57  ;;  %v302_v19 = vld [vmem:[%s10020_s1 + $0x8b8] sm:$0xff]  ;;  %v8560_v34 = vpop.permute.xlu1 %860 }
 0x2d1   :  { %v8517_v6 = vmax.f32 %v8324_v53, %v4087_v1  ;;  %v4088_v10 = vmax.f32 %v5429_v31, 0.0  ;;  %v5622_v38 = vadd.f32 %v3541_v49, %v8334_v58  ;;  %5052 = vmatprep.mubr.msk.f32.mxu0 %vm1183_vm0, %v294_v30  ;;  %5148 = vmatprep.mubr.msk.f32.mxu1 %vm1183_vm0, %v294_v30  ;;  %v301_v49 = vld [vmem:[%s10020_s1 + $0x8b0] sm:$0xff] }
 0x2d2   :  { %v4090_v39 = vmax.f32 %v5621_v14, 0.0  ;;  %v4089_v17 = vmax.f32 %v5430_v50, 0.0  ;;  %v2263_v25 = vpop.f32.mrb[28].mxu0 }
 0x2d3   :  { %v8528_v55 = vmax.f32 %v8337_v26, %v4088_v10  ;;  %v4091_v53 = vmax.f32 %v5622_v38, 0.0  ;;  %v5431_v36 = vadd.f32 %v2263_v25, %v8411_v22  ;;  %v3545_v58 = vpop.f32.mrb[28].mxu1  ;;  %v2265_v13 = vpop.f32.mrb[29].mxu0  ;;  %2580 = vmatmul.mubr.f32.gmra.mrb[134].mxu0 %v293_v35  ;;  %v306_v25 = vld [vmem:[%s10020_s1 + $0x8d8] sm:$0xff] }
 0x2d4   :  { %v8532_v37 = vmax.f32 %v8342_v33, %v4090_v39  ;;  %v8537_v40 = vmax.f32 %v8346_v21, %v4089_v17  ;;  %v5623_v24 = vadd.f32 %v3545_v58, %v8411_v22  ;;  %v5432_v28 = vadd.f32 %v2265_v13, %v8411_v22  ;;  %v3547_v26 = vpop.f32.mrb[29].mxu1  ;;  %3862 = vmatmul.mubr.f32.gmra.mrb[134].mxu1 %v293_v35 }
 0x2d5   :  { %v8545_v57 = vmax.f32 %v8361_v43, %v4091_v53  ;;  %v4092_v33 = vmax.f32 %v5431_v36, 0.0  ;;  %v5624_v62 = vadd.f32 %v3547_v26, %v8411_v22  ;;  %5053 = vmatprep.mubr.msk.f32.mxu0 %vm1183_vm0, %v298_v27  ;;  %5149 = vmatprep.mubr.msk.f32.mxu1 %vm1183_vm0, %v298_v27 }
 0x2d6   :  { %v4094_v21 = vmax.f32 %v5623_v24, 0.0  ;;  %v4093_v44 = vmax.f32 %v5432_v28, 0.0  ;;  %v2269_v59 = vpop.f32.mrb[30].mxu0 }
 0x2d7   :  { %v8554_v52 = vmax.f32 %v8383_v4, %v4092_v33  ;;  %v4095_v30 = vmax.f32 %v5624_v62, 0.0  ;;  %v5433_v43 = vadd.f32 %v2269_v59, %v8448_v29  ;;  %v3551_v1 = vpop.f32.mrb[30].mxu1  ;;  %v2271_v31 = vpop.f32.mrb[31].mxu0  ;;  %2586 = vmatmul.mubr.f32.gmra.mrb[136].mxu0 %v297_v20  ;;  %v310_v59 = vld [vmem:[%s10020_s1 + $0x8f8] sm:$0xff] }
 0x2d8   :  { %v8558_v22 = vmax.f32 %v8388_v3, %v4094_v21  ;;  %v8563_v7 = vmax.f32 %v8392_v8, %v4093_v44  ;;  %v5625_v14 = vadd.f32 %v3551_v1, %v8448_v29  ;;  %v5434_v50 = vadd.f32 %v2271_v31, %v8448_v29  ;;  %v3553_v4 = vpop.f32.mrb[31].mxu1  ;;  %3868 = vmatmul.mubr.f32.gmra.mrb[136].mxu1 %v297_v20  ;;  %v786_v8 = vpop.permute.xlu0 %785 }
 0x2d9   :  { %v8571_v35 = vmax.f32 %v8404_v5, %v4095_v30  ;;  %v4096_v3 = vmax.f32 %v5433_v43, 0.0  ;;  %v5626_v10 = vadd.f32 %v3553_v4, %v8448_v29  ;;  %5054 = vmatprep.mubr.msk.f32.mxu0 %vm1183_vm0, %v302_v19  ;;  %5150 = vmatprep.mubr.msk.f32.mxu1 %vm1183_vm0, %v302_v19 }
 0x2da   :  { %v4098_v38 = vmax.f32 %v5625_v14, 0.0  ;;  %v4097_v39 = vmax.f32 %v5434_v50, 0.0  ;;  %v2275_v17 = vpop.f32.mrb[32].mxu0 }
 0x2db   :  { %v8580_v27 = vmax.f32 %v8419_v42, %v4096_v3  ;;  %v4099_v5 = vmax.f32 %v5626_v10, 0.0  ;;  %v5435_v53 = vadd.f32 %v2275_v17, %v786_v8  ;;  %v3557_v36 = vpop.f32.mrb[32].mxu1  ;;  %v2277_v58 = vpop.f32.mrb[33].mxu0  ;;  %2592 = vmatmul.mubr.f32.gmra.mrb[138].mxu0 %v301_v49  ;;  %v305_v42 = vld [vmem:[%s10020_s1 + $0x8d0] sm:$0xff] }
 0x2dc   :  { %v8583_v29 = vmax.f32 %v8424_v61, %v4098_v38  ;;  %v8586_v13 = vmax.f32 %v8428_v63, %v4097_v39  ;;  %v5627_v24 = vadd.f32 %v3557_v36, %v786_v8  ;;  %v5436_v28 = vadd.f32 %v2277_v58, %v786_v8  ;;  %v3559_v26 = vpop.f32.mrb[33].mxu1  ;;  %3874 = vmatmul.mubr.f32.gmra.mrb[138].mxu1 %v301_v49  ;;  %v791_v61 = vpop.permute.xlu1 %790  ;;  %v314_v39 = vld [vmem:[%s10020_s1 + $0x918] sm:$0xff] }
 0x2dd   :  { %v8592_v20 = vmax.f32 %v8439_v18, %v4099_v5  ;;  %v4100_v33 = vmax.f32 %v5435_v53, 0.0  ;;  %v5628_v62 = vadd.f32 %v3559_v26, %v786_v8  ;;  %5055 = vmatprep.mubr.msk.f32.mxu0 %vm1183_vm0, %v306_v25  ;;  %5151 = vmatprep.mubr.msk.f32.mxu1 %vm1183_vm0, %v306_v25 }
 0x2de   :  { %v4102_v63 = vmax.f32 %v5627_v24, 0.0  ;;  %v4101_v21 = vmax.f32 %v5436_v28, 0.0  ;;  %v2281_v44 = vpop.f32.mrb[34].mxu0 }
 0x2df   :  { %v8600_v19 = vmax.f32 %v8455_v11, %v4100_v33  ;;  %v4103_v30 = vmax.f32 %v5628_v62, 0.0  ;;  %v5437_v18 = vadd.f32 %v2281_v44, %v791_v61  ;;  %v3563_v43 = vpop.f32.mrb[34].mxu1  ;;  %v2283_v1 = vpop.f32.mrb[35].mxu0  ;;  %2598 = vmatmul.mubr.f32.gmra.mrb[140].mxu0 %v305_v42  ;;  %v309_v11 = vld [vmem:[%s10020_s1 + $0x8f0] sm:$0xff] }
 0x2e0   :  { %v8603_v31 = vmax.f32 %v8458_v47, %v4102_v63  ;;  %v8606_v14 = vmax.f32 %v8460_v54, %v4101_v21  ;;  %v5629_v50 = vadd.f32 %v3563_v43, %v791_v61  ;;  %v5438_v4 = vadd.f32 %v2283_v1, %v791_v61  ;;  %v3565_v49 = vpop.f32.mrb[35].mxu1  ;;  %3880 = vmatmul.mubr.f32.gmra.mrb[140].mxu1 %v305_v42  ;;  %v318_v21 = vld [vmem:[%s10020_s1 + $0x938] sm:$0xff] }
 0x2e1   :  { %v8612_v3 = vmax.f32 %v8469_v48, %v4103_v30  ;;  %v4104_v10 = vmax.f32 %v5437_v18, 0.0  ;;  %v5630_v8 = vadd.f32 %v3565_v49, %v791_v61  ;;  %5056 = vmatprep.mubr.msk.f32.mxu0 %vm1183_vm0, %v310_v59  ;;  %5152 = vmatprep.mubr.msk.f32.mxu1 %vm1183_vm0, %v310_v59 }
 0x2e2   :  { %v4106_v47 = vmax.f32 %v5629_v50, 0.0  ;;  %v4105_v54 = vmax.f32 %v5438_v4, 0.0  ;;  %v2287_v38 = vpop.f32.mrb[36].mxu0 }
 0x2e3   :  { %v8620_v17 = vmax.f32 %v8477_v60, %v4104_v10  ;;  %v4107_v25 = vmax.f32 %v5630_v8, 0.0  ;;  %v5439_v48 = vadd.f32 %v2287_v38, %v8350_v23  ;;  %v3569_v5 = vpop.f32.mrb[36].mxu1  ;;  %v2289_v53 = vpop.f32.mrb[37].mxu0  ;;  %2604 = vmatmul.mubr.f32.gmra.mrb[142].mxu0 %v309_v11  ;;  %v313_v60 = vld [vmem:[%s10020_s1 + $0x910] sm:$0xff] }
 0x2e4   :  { %v8624_v36 = vmax.f32 %v8480_v51, %v4106_v47  ;;  %v8627_v58 = vmax.f32 %v8482_v15, %v4105_v54  ;;  %v5631_v24 = vadd.f32 %v3569_v5, %v8350_v23  ;;  %v5440_v28 = vadd.f32 %v2289_v53, %v8350_v23  ;;  %v3571_v26 = vpop.f32.mrb[37].mxu1  ;;  %3886 = vmatmul.mubr.f32.gmra.mrb[142].mxu1 %v309_v11  ;;  %v8640_v15 = vpop.permute.xlu0 %835  ;;  %v322_v54 = vld [vmem:[%s10020_s1 + $0x958] sm:$0xff] }
 0x2e5   :  { %v8635_v42 = vmax.f32 %v8491_v2, %v4107_v25  ;;  %v4108_v33 = vmax.f32 %v5439_v48, 0.0  ;;  %v5632_v51 = vadd.f32 %v3571_v26, %v8350_v23  ;;  %5057 = vmatprep.mubr.msk.f32.mxu0 %vm1183_vm0, %v314_v39  ;;  %5153 = vmatprep.mubr.msk.f32.mxu1 %vm1183_vm0, %v314_v39  ;;  %v321_v26 = vld [vmem:[%s10020_s1 + $0x950] sm:$0xff] }
 0x2e6   :  { %v4110_v62 = vmax.f32 %v5631_v24, 0.0  ;;  %v4109_v61 = vmax.f32 %v5440_v28, 0.0  ;;  %v2293_v63 = vpop.f32.mrb[38].mxu0 }
 0x2e7   :  { %v8646_v44 = vmax.f32 %v8502_v46, %v4108_v33  ;;  %v4111_v2 = vmax.f32 %v5632_v51, 0.0  ;;  %v5441_v59 = vadd.f32 %v2293_v63, %v8396_v0  ;;  %v3575_v23 = vpop.f32.mrb[38].mxu1  ;;  %v2295_v30 = vpop.f32.mrb[39].mxu0  ;;  %2610 = vmatmul.mubr.f32.gmra.mrb[144].mxu0 %v313_v60  ;;  %v317_v46 = vld [vmem:[%s10020_s1 + $0x930] sm:$0xff] }
 0x2e8   :  { %v8650_v18 = vmax.f32 %v8506_v45, %v4110_v62  ;;  %v8653_v43 = vmax.f32 %v8509_v9, %v4109_v61  ;;  %v5633_v1 = vadd.f32 %v3575_v23, %v8396_v0  ;;  %v5442_v50 = vadd.f32 %v2295_v30, %v8396_v0  ;;  %v3577_v4 = vpop.f32.mrb[39].mxu1  ;;  %3892 = vmatmul.mubr.f32.gmra.mrb[144].mxu1 %v313_v60  ;;  %v8666_v9 = vpop.permute.xlu1 %840  ;;  %v326_v61 = vld [vmem:[%s10020_s1 + $0x978] sm:$0xff] }
 0x2e9   :  { %v8661_v49 = vmax.f32 %v8517_v6, %v4111_v2  ;;  %v4112_v11 = vmax.f32 %v5441_v59, 0.0  ;;  %v5634_v45 = vadd.f32 %v3577_v4, %v8396_v0  ;;  %5058 = vmatprep.mubr.msk.f32.mxu0 %vm1183_vm0, %v318_v21  ;;  %5154 = vmatprep.mubr.msk.f32.mxu1 %vm1183_vm0, %v318_v21  ;;  %v8675_v48 = vpop.permute.xlu0 %885  ;;  %v325_v4 = vld [vmem:[%s10020_s1 + $0x970] sm:$0xff] }
 0x2ea   :  { %v4114_v10 = vmax.f32 %v5633_v1, 0.0  ;;  %v4113_v8 = vmax.f32 %v5442_v50, 0.0  ;;  %v2299_v47 = vpop.f32.mrb[40].mxu0 }
 0x2eb   :  { %v8672_v38 = vmax.f32 %v8528_v55, %v4112_v11  ;;  %v4115_v6 = vmax.f32 %v5634_v45, 0.0  ;;  %v5443_v39 = vadd.f32 %v2299_v47, %v8496_v41  ;;  %v3581_v0 = vpop.f32.mrb[40].mxu1  ;;  %v2301_v25 = vpop.f32.mrb[41].mxu0  ;;  %2616 = vmatmul.mubr.f32.gmra.mrb[146].mxu0 %v317_v46  ;;  %v330_v47 = vld [vmem:[%s10020_s1 + $0x998] sm:$0xff] }
 0x2ec   :  { %v8678_v5 = vmax.f32 %v8532_v37, %v4114_v10  ;;  %v8681_v53 = vmax.f32 %v8537_v40, %v4113_v8  ;;  %v5635_v24 = vadd.f32 %v3581_v0, %v8496_v41  ;;  %v5444_v28 = vadd.f32 %v2301_v25, %v8496_v41  ;;  %v3583_v55 = vpop.f32.mrb[41].mxu1  ;;  %3898 = vmatmul.mubr.f32.gmra.mrb[146].mxu1 %v317_v46 }
 0x2ed   :  { %v8689_v60 = vmax.f32 %v8545_v57, %v4115_v6  ;;  %v4116_v33 = vmax.f32 %v5443_v39, 0.0  ;;  %v5636_v37 = vadd.f32 %v3583_v55, %v8496_v41  ;;  %5059 = vmatprep.mubr.msk.f32.mxu0 %vm1183_vm0, %v322_v54  ;;  %5155 = vmatprep.mubr.msk.f32.mxu1 %vm1183_vm0, %v322_v54  ;;  %v8701_v41 = vpop.permute.xlu1 %890 }
 0x2ee   :  { %v4118_v40 = vmax.f32 %v5635_v24, 0.0  ;;  %v4117_v51 = vmax.f32 %v5444_v28, 0.0  ;;  %v2305_v62 = vpop.f32.mrb[42].mxu0 }
 0x2ef   :  { %v8698_v63 = vmax.f32 %v8554_v52, %v4116_v33  ;;  %v4119_v21 = vmax.f32 %v5636_v37, 0.0  ;;  %v5445_v57 = vadd.f32 %v2305_v62, %v8522_v16  ;;  %v3587_v2 = vpop.f32.mrb[42].mxu1  ;;  %v2307_v59 = vpop.f32.mrb[43].mxu0  ;;  %2622 = vmatmul.mubr.f32.gmra.mrb[148].mxu0 %v321_v26  ;;  %v334_v62 = vld [vmem:[%s10020_s1 + $0x9b8] sm:$0xff] }
 0x2f0   :  { %v8704_v23 = vmax.f32 %v8558_v22, %v4118_v40  ;;  %v8707_v30 = vmax.f32 %v8563_v7, %v4117_v51  ;;  %v5637_v1 = vadd.f32 %v3587_v2, %v8522_v16  ;;  %v5446_v50 = vadd.f32 %v2307_v59, %v8522_v16  ;;  %v3589_v52 = vpop.f32.mrb[43].mxu1  ;;  %3904 = vmatmul.mubr.f32.gmra.mrb[148].mxu1 %v321_v26  ;;  %v816_v7 = vpop.permute.xlu0 %815 }
 0x2f1   :  { %v8715_v46 = vmax.f32 %v8571_v35, %v4119_v21  ;;  %v4120_v11 = vmax.f32 %v5445_v57, 0.0  ;;  %v5638_v22 = vadd.f32 %v3589_v52, %v8522_v16  ;;  %5060 = vmatprep.mubr.msk.f32.mxu0 %vm1183_vm0, %v326_v61  ;;  %5156 = vmatprep.mubr.msk.f32.mxu1 %vm1183_vm0, %v326_v61 }
 0x2f2   :  { %v4122_v45 = vmax.f32 %v5637_v1, 0.0  ;;  %v4121_v10 = vmax.f32 %v5446_v50, 0.0  ;;  %v2311_v8 = vpop.f32.mrb[44].mxu0 }
 0x2f3   :  { %v8724_v54 = vmax.f32 %v8580_v27, %v4120_v11  ;;  %v4123_v35 = vmax.f32 %v5638_v22, 0.0  ;;  %v5447_v6 = vadd.f32 %v2311_v8, %v816_v7  ;;  %v3593_v39 = vpop.f32.mrb[44].mxu1  ;;  %v2313_v0 = vpop.f32.mrb[45].mxu0  ;;  %2628 = vmatmul.mubr.f32.gmra.mrb[150].mxu0 %v325_v4  ;;  %v329_v27 = vld [vmem:[%s10020_s1 + $0x990] sm:$0xff] }
 0x2f4   :  { %v8727_v16 = vmax.f32 %v8583_v29, %v4122_v45  ;;  %v8730_v25 = vmax.f32 %v8586_v13, %v4121_v10  ;;  %v5639_v24 = vadd.f32 %v3593_v39, %v816_v7  ;;  %v5448_v28 = vadd.f32 %v2313_v0, %v816_v7  ;;  %v3595_v55 = vpop.f32.mrb[45].mxu1  ;;  %3910 = vmatmul.mubr.f32.gmra.mrb[150].mxu1 %v325_v4  ;;  %v821_v29 = vpop.permute.xlu1 %820  ;;  %v338_v10 = vld [vmem:[%s10020_s1 + $0x9d8] sm:$0xff] }
 0x2f5   :  { %v8736_v26 = vmax.f32 %v8592_v20, %v4123_v35  ;;  %v4124_v33 = vmax.f32 %v5447_v6, 0.0  ;;  %v5640_v37 = vadd.f32 %v3595_v55, %v816_v7  ;;  %5061 = vmatprep.mubr.msk.f32.mxu0 %vm1183_vm0, %v330_v47  ;;  %5157 = vmatprep.mubr.msk.f32.mxu1 %vm1183_vm0, %v330_v47 }
 0x2f6   :  { %v4126_v13 = vmax.f32 %v5639_v24, 0.0  ;;  %v4125_v40 = vmax.f32 %v5448_v28, 0.0  ;;  %v2317_v51 = vpop.f32.mrb[46].mxu0 }
 0x2f7   :  { %v8744_v61 = vmax.f32 %v8600_v19, %v4124_v33  ;;  %v4127_v21 = vmax.f32 %v5640_v37, 0.0  ;;  %v5449_v20 = vadd.f32 %v2317_v51, %v821_v29  ;;  %v3599_v57 = vpop.f32.mrb[46].mxu1  ;;  %v2319_v2 = vpop.f32.mrb[47].mxu0  ;;  %2634 = vmatmul.mubr.f32.gmra.mrb[152].mxu0 %v329_v27  ;;  %v333_v19 = vld [vmem:[%s10020_s1 + $0x9b0] sm:$0xff] }
 0x2f8   :  { %v8747_v59 = vmax.f32 %v8603_v31, %v4126_v13  ;;  %v8750_v1 = vmax.f32 %v8606_v14, %v4125_v40  ;;  %v5641_v50 = vadd.f32 %v3599_v57, %v821_v29  ;;  %v5450_v52 = vadd.f32 %v2319_v2, %v821_v29  ;;  %v3601_v4 = vpop.f32.mrb[47].mxu1  ;;  %3916 = vmatmul.mubr.f32.gmra.mrb[152].mxu1 %v329_v27  ;;  %v342_v40 = vld [vmem:[%s10020_s1 + $0x9f8] sm:$0xff] }
 0x2f9   :  { %v8756_v11 = vmax.f32 %v8612_v3, %v4127_v21  ;;  %v4128_v22 = vmax.f32 %v5449_v20, 0.0  ;;  %v5642_v7 = vadd.f32 %v3601_v4, %v821_v29  ;;  %5062 = vmatprep.mubr.msk.f32.mxu0 %vm1183_vm0, %v334_v62  ;;  %5158 = vmatprep.mubr.msk.f32.mxu1 %vm1183_vm0, %v334_v62 }
 0x2fa   :  { %v4130_v31 = vmax.f32 %v5641_v50, 0.0  ;;  %v4129_v14 = vmax.f32 %v5450_v52, 0.0  ;;  %v2323_v45 = vpop.f32.mrb[48].mxu0 }
 0x2fb   :  { %v8764_v8 = vmax.f32 %v8620_v17, %v4128_v22  ;;  %v4131_v47 = vmax.f32 %v5642_v7, 0.0  ;;  %v5451_v3 = vadd.f32 %v2323_v45, %v8463_v32  ;;  %v3605_v35 = vpop.f32.mrb[48].mxu1  ;;  %v2325_v6 = vpop.f32.mrb[49].mxu0  ;;  %2640 = vmatmul.mubr.f32.gmra.mrb[154].mxu0 %v333_v19  ;;  %v337_v17 = vld [vmem:[%s10020_s1 + $0x9d0] sm:$0xff] }
 0x2fc   :  { %v8768_v39 = vmax.f32 %v8624_v36, %v4130_v31  ;;  %v8771_v0 = vmax.f32 %v8627_v58, %v4129_v14  ;;  %v5643_v24 = vadd.f32 %v3605_v35, %v8463_v32  ;;  %v5452_v28 = vadd.f32 %v2325_v6, %v8463_v32  ;;  %v3607_v55 = vpop.f32.mrb[49].mxu1  ;;  %3922 = vmatmul.mubr.f32.gmra.mrb[154].mxu1 %v333_v19  ;;  %v8784_v58 = vpop.permute.xlu0 %865  ;;  %v346_v14 = vld [vmem:[%s10020_s1 + $0xa18] sm:$0xff] }
 0x2fd   :  { %v8779_v27 = vmax.f32 %v8635_v42, %v4131_v47  ;;  %v4132_v33 = vmax.f32 %v5451_v3, 0.0  ;;  %v5644_v36 = vadd.f32 %v3607_v55, %v8463_v32  ;;  %5063 = vmatprep.mubr.msk.f32.mxu0 %vm1183_vm0, %v338_v10  ;;  %5159 = vmatprep.mubr.msk.f32.mxu1 %vm1183_vm0, %v338_v10  ;;  %v345_v55 = vld [vmem:[%s10020_s1 + $0xa10] sm:$0xff] }
 0x2fe   :  { %v4134_v37 = vmax.f32 %v5643_v24, 0.0  ;;  %v4133_v29 = vmax.f32 %v5452_v28, 0.0  ;;  %v2329_v13 = vpop.f32.mrb[50].mxu0 }
 0x2ff   :  { %v8790_v51 = vmax.f32 %v8646_v44, %v4132_v33  ;;  %v4135_v42 = vmax.f32 %v5644_v36, 0.0  ;;  %v5453_v62 = vadd.f32 %v2329_v13, %v8485_v56  ;;  %v3611_v32 = vpop.f32.mrb[50].mxu1  ;;  %v2331_v21 = vpop.f32.mrb[51].mxu0  ;;  %2646 = vmatmul.mubr.f32.gmra.mrb[156].mxu0 %v337_v17  ;;  %v341_v44 = vld [vmem:[%s10020_s1 + $0x9f0] sm:$0xff] }
 0x300   :  { %v8794_v20 = vmax.f32 %v8650_v18, %v4134_v37  ;;  %v8797_v57 = vmax.f32 %v8653_v43, %v4133_v29  ;;  %v5645_v2 = vadd.f32 %v3611_v32, %v8485_v56  ;;  %v5454_v50 = vadd.f32 %v2331_v21, %v8485_v56  ;;  %v3613_v52 = vpop.f32.mrb[51].mxu1  ;;  %3928 = vmatmul.mubr.f32.gmra.mrb[156].mxu1 %v337_v17  ;;  %v8810_v43 = vpop.permute.xlu1 %870  ;;  %v350_v29 = vld [vmem:[%s10020_s1 + $0xa38] sm:$0xff] }
 0x301   :  { %v8805_v4 = vmax.f32 %v8661_v49, %v4135_v42  ;;  %v4136_v19 = vmax.f32 %v5453_v62, 0.0  ;;  %v5646_v18 = vadd.f32 %v3613_v52, %v8485_v56  ;;  %5064 = vmatprep.mubr.msk.f32.mxu0 %vm1183_vm0, %v342_v40  ;;  %5160 = vmatprep.mubr.msk.f32.mxu1 %vm1183_vm0, %v342_v40  ;;  %v8819_v3 = vpop.permute.xlu0 %915  ;;  %v349_v52 = vld [vmem:[%s10020_s1 + $0xa30] sm:$0xff] }
 0x302   :  { %v4138_v22 = vmax.f32 %v5645_v2, 0.0  ;;  %v4137_v7 = vmax.f32 %v5454_v50, 0.0  ;;  %v2335_v31 = vpop.f32.mrb[52].mxu0 }
 0x303   :  { %v8816_v45 = vmax.f32 %v8672_v38, %v4136_v19  ;;  %v4139_v49 = vmax.f32 %v5646_v18, 0.0  ;;  %v5455_v10 = vadd.f32 %v2335_v31, %v8640_v15  ;;  %v3617_v56 = vpop.f32.mrb[52].mxu1  ;;  %v2337_v47 = vpop.f32.mrb[53].mxu0  ;;  %2652 = vmatmul.mubr.f32.gmra.mrb[158].mxu0 %v341_v44  ;;  %v354_v31 = vld [vmem:[%s10020_s1 + $0xa58] sm:$0xff] }
 0x304   :  { %v8822_v35 = vmax.f32 %v8678_v5, %v4138_v22  ;;  %v8825_v6 = vmax.f32 %v8681_v53, %v4137_v7  ;;  %v5647_v24 = vadd.f32 %v3617_v56, %v8640_v15  ;;  %v5456_v28 = vadd.f32 %v2337_v47, %v8640_v15  ;;  %v3619_v38 = vpop.f32.mrb[53].mxu1  ;;  %3934 = vmatmul.mubr.f32.gmra.mrb[158].mxu1 %v341_v44 }
 0x305   :  { %v8833_v17 = vmax.f32 %v8689_v60, %v4139_v49  ;;  %v4140_v33 = vmax.f32 %v5455_v10, 0.0  ;;  %v5648_v5 = vadd.f32 %v3619_v38, %v8640_v15  ;;  %5065 = vmatprep.mubr.msk.f32.mxu0 %vm1183_vm0, %v346_v14  ;;  %5161 = vmatprep.mubr.msk.f32.mxu1 %vm1183_vm0, %v346_v14  ;;  %v8845_v15 = vpop.permute.xlu1 %920 }
 0x306   :  { %v4142_v53 = vmax.f32 %v5647_v24, 0.0  ;;  %v4141_v36 = vmax.f32 %v5456_v28, 0.0  ;;  %v2341_v37 = vpop.f32.mrb[54].mxu0 }
 0x307   :  { %v8842_v13 = vmax.f32 %v8698_v63, %v4140_v33  ;;  %v4143_v40 = vmax.f32 %v5648_v5, 0.0  ;;  %v5457_v60 = vadd.f32 %v2341_v37, %v8666_v9  ;;  %v3623_v42 = vpop.f32.mrb[54].mxu1  ;;  %v2343_v62 = vpop.f32.mrb[55].mxu0  ;;  %2658 = vmatmul.mubr.f32.gmra.mrb[160].mxu0 %v345_v55  ;;  %v358_v37 = vld [vmem:[%s10020_s1 + $0xa78] sm:$0xff] }
 0x308   :  { %v8848_v32 = vmax.f32 %v8704_v23, %v4142_v53  ;;  %v8851_v21 = vmax.f32 %v8707_v30, %v4141_v36  ;;  %v5649_v2 = vadd.f32 %v3623_v42, %v8666_v9  ;;  %v5458_v50 = vadd.f32 %v2343_v62, %v8666_v9  ;;  %v3625_v63 = vpop.f32.mrb[55].mxu1  ;;  %3940 = vmatmul.mubr.f32.gmra.mrb[160].mxu1 %v345_v55  ;;  %v846_v30 = vpop.permute.xlu0 %845 }
 0x309   :  { %v8859_v44 = vmax.f32 %v8715_v46, %v4143_v40  ;;  %v4144_v19 = vmax.f32 %v5457_v60, 0.0  ;;  %v5650_v23 = vadd.f32 %v3625_v63, %v8666_v9  ;;  %5066 = vmatprep.mubr.msk.f32.mxu0 %vm1183_vm0, %v350_v29  ;;  %5162 = vmatprep.mubr.msk.f32.mxu1 %vm1183_vm0, %v350_v29 }
 0x30a   :  { %v4146_v18 = vmax.f32 %v5649_v2, 0.0  ;;  %v4145_v22 = vmax.f32 %v5458_v50, 0.0  ;;  %v2347_v7 = vpop.f32.mrb[56].mxu0 }
 0x30b   :  { %v8868_v14 = vmax.f32 %v8724_v54, %v4144_v19  ;;  %v4147_v46 = vmax.f32 %v5650_v23, 0.0  ;;  %v5459_v49 = vadd.f32 %v2347_v7, %v846_v30  ;;  %v3629_v10 = vpop.f32.mrb[56].mxu1  ;;  %v2349_v56 = vpop.f32.mrb[57].mxu0  ;;  %2664 = vmatmul.mubr.f32.gmra.mrb[162].mxu0 %v349_v52  ;;  %v353_v54 = vld [vmem:[%s10020_s1 + $0xa50] sm:$0xff] }
 0x30c   :  { %v8871_v9 = vmax.f32 %v8727_v16, %v4146_v18  ;;  %v8874_v47 = vmax.f32 %v8730_v25, %v4145_v22  ;;  %v5651_v24 = vadd.f32 %v3629_v10, %v846_v30  ;;  %v5460_v28 = vadd.f32 %v2349_v56, %v846_v30  ;;  %v3631_v38 = vpop.f32.mrb[57].mxu1  ;;  %3946 = vmatmul.mubr.f32.gmra.mrb[162].mxu1 %v349_v52  ;;  %v851_v16 = vpop.permute.xlu1 %850  ;;  %v362_v22 = vld [vmem:[%s10020_s1 + $0xa98] sm:$0xff] }
 0x30d   :  { %v8880_v55 = vmax.f32 %v8736_v26, %v4147_v46  ;;  %v4148_v33 = vmax.f32 %v5459_v49, 0.0  ;;  %v5652_v5 = vadd.f32 %v3631_v38, %v846_v30  ;;  %5067 = vmatprep.mubr.msk.f32.mxu0 %vm1183_vm0, %v354_v31  ;;  %5163 = vmatprep.mubr.msk.f32.mxu1 %vm1183_vm0, %v354_v31 }
 0x30e   :  { %v4150_v25 = vmax.f32 %v5651_v24, 0.0  ;;  %v4149_v53 = vmax.f32 %v5460_v28, 0.0  ;;  %v2353_v36 = vpop.f32.mrb[58].mxu0 }
 0x30f   :  { %v8888_v29 = vmax.f32 %v8744_v61, %v4148_v33  ;;  %v4151_v40 = vmax.f32 %v5652_v5, 0.0  ;;  %v5461_v26 = vadd.f32 %v2353_v36, %v851_v16  ;;  %v3635_v60 = vpop.f32.mrb[58].mxu1  ;;  %v2355_v42 = vpop.f32.mrb[59].mxu0  ;;  %2670 = vmatmul.mubr.f32.gmra.mrb[164].mxu0 %v353_v54  ;;  %v357_v61 = vld [vmem:[%s10020_s1 + $0xa70] sm:$0xff] }
 0x310   :  { %v8891_v62 = vmax.f32 %v8747_v59, %v4150_v25  ;;  %v8894_v2 = vmax.f32 %v8750_v1, %v4149_v53  ;;  %v5653_v50 = vadd.f32 %v3635_v60, %v851_v16  ;;  %v5462_v63 = vadd.f32 %v2355_v42, %v851_v16  ;;  %v3637_v52 = vpop.f32.mrb[59].mxu1  ;;  %3952 = vmatmul.mubr.f32.gmra.mrb[164].mxu1 %v353_v54  ;;  %v366_v53 = vld [vmem:[%s10020_s1 + $0xab8] sm:$0xff] }
 0x311   :  { %v8900_v19 = vmax.f32 %v8756_v11, %v4151_v40  ;;  %v4152_v23 = vmax.f32 %v5461_v26, 0.0  ;;  %v5654_v30 = vadd.f32 %v3637_v52, %v851_v16  ;;  %5068 = vmatprep.mubr.msk.f32.mxu0 %vm1183_vm0, %v358_v37  ;;  %5164 = vmatprep.mubr.msk.f32.mxu1 %vm1183_vm0, %v358_v37 }
 0x312   :  { %v4154_v59 = vmax.f32 %v5653_v50, 0.0  ;;  %v4153_v1 = vmax.f32 %v5462_v63, 0.0  ;;  %v2359_v18 = vpop.f32.mrb[60].mxu0 }
 0x313   :  { %v8908_v7 = vmax.f32 %v8764_v8, %v4152_v23  ;;  %v4155_v31 = vmax.f32 %v5654_v30, 0.0  ;;  %v5463_v11 = vadd.f32 %v2359_v18, %v8534_v12  ;;  %v3641_v46 = vpop.f32.mrb[60].mxu1  ;;  %v2361_v49 = vpop.f32.mrb[61].mxu0  ;;  %2676 = vmatmul.mubr.f32.gmra.mrb[166].mxu0 %v357_v61  ;;  %v361_v8 = vld [vmem:[%s10020_s1 + $0xa90] sm:$0xff] }
 0x314   :  { %v8912_v10 = vmax.f32 %v8768_v39, %v4154_v59  ;;  %v8915_v56 = vmax.f32 %v8771_v0, %v4153_v1  ;;  %v5655_v24 = vadd.f32 %v3641_v46, %v8534_v12  ;;  %v5464_v28 = vadd.f32 %v2361_v49, %v8534_v12  ;;  %v3643_v38 = vpop.f32.mrb[61].mxu1  ;;  %3958 = vmatmul.mubr.f32.gmra.mrb[166].mxu1 %v357_v61  ;;  %v8928_v0 = vpop.permute.xlu0 %895  ;;  %v370_v1 = vld [vmem:[%s10020_s1 + $0xad8] sm:$0xff] }
 0x315   :  { %v8923_v54 = vmax.f32 %v8779_v27, %v4155_v31  ;;  %v4156_v33 = vmax.f32 %v5463_v11, 0.0  ;;  %v5656_v39 = vadd.f32 %v3643_v38, %v8534_v12  ;;  %5069 = vmatprep.mubr.msk.f32.mxu0 %vm1183_vm0, %v362_v22  ;;  %5165 = vmatprep.mubr.msk.f32.mxu1 %vm1183_vm0, %v362_v22  ;;  %v369_v38 = vld [vmem:[%s10020_s1 + $0xad0] sm:$0xff] }
 0x316   :  { %v4158_v5 = vmax.f32 %v5655_v24, 0.0  ;;  %v4157_v16 = vmax.f32 %v5464_v28, 0.0  ;;  %v2365_v25 = vpop.f32.mrb[62].mxu0 }
 0x317   :  { %v8934_v36 = vmax.f32 %v8790_v51, %v4156_v33  ;;  %v4159_v27 = vmax.f32 %v5656_v39, 0.0  ;;  %v5465_v37 = vadd.f32 %v2365_v25, %v8560_v34  ;;  %v3647_v12 = vpop.f32.mrb[62].mxu1  ;;  %v2367_v40 = vpop.f32.mrb[63].mxu0  ;;  %2682 = vmatmul.mubr.f32.gmra.mrb[168].mxu0 %v361_v8  ;;  %v365_v51 = vld [vmem:[%s10020_s1 + $0xab0] sm:$0xff] }
 0x318   :  { %v8938_v26 = vmax.f32 %v8794_v20, %v4158_v5  ;;  %v8941_v60 = vmax.f32 %v8797_v57, %v4157_v16  ;;  %v5657_v42 = vadd.f32 %v3647_v12, %v8560_v34  ;;  %v5466_v50 = vadd.f32 %v2367_v40, %v8560_v34  ;;  %v3649_v63 = vpop.f32.mrb[63].mxu1  ;;  %3964 = vmatmul.mubr.f32.gmra.mrb[168].mxu1 %v361_v8  ;;  %v8954_v57 = vpop.permute.xlu1 %900  ;;  %v374_v16 = vld [vmem:[%s10020_s1 + $0xaf8] sm:$0xff] }
 0x319   :  { %v8949_v52 = vmax.f32 %v8805_v4, %v4159_v27  ;;  %v4160_v61 = vmax.f32 %v5465_v37, 0.0  ;;  %v5658_v20 = vadd.f32 %v3649_v63, %v8560_v34  ;;  %5070 = vmatprep.mubr.msk.f32.mxu0 %vm1183_vm0, %v366_v53  ;;  %5166 = vmatprep.mubr.msk.f32.mxu1 %vm1183_vm0, %v366_v53  ;;  %v8963_v11 = vpop.permute.xlu0 %945  ;;  %v373_v63 = vld [vmem:[%s10020_s1 + $0xaf0] sm:$0xff] }
 0x31a   :  { %v4162_v23 = vmax.f32 %v5657_v42, 0.0  ;;  %v4161_v30 = vmax.f32 %v5466_v50, 0.0  ;;  %v2371_v59 = vpop.f32.mrb[64].mxu0 }
 0x31b   :  { %v8960_v18 = vmax.f32 %v8816_v45, %v4160_v61  ;;  %v4163_v4 = vmax.f32 %v5658_v20, 0.0  ;;  %v5467_v22 = vadd.f32 %v2371_v59, %v8784_v58  ;;  %v3653_v34 = vpop.f32.mrb[64].mxu1  ;;  %v2373_v31 = vpop.f32.mrb[65].mxu0  ;;  %2688 = vmatmul.mubr.f32.gmra.mrb[170].mxu0 %v365_v51  ;;  %v378_v59 = vld [vmem:[%s10020_s1 + $0xb18] sm:$0xff] }
 0x31c   :  { %v8966_v46 = vmax.f32 %v8822_v35, %v4162_v23  ;;  %v8969_v49 = vmax.f32 %v8825_v6, %v4161_v30  ;;  %v5659_v24 = vadd.f32 %v3653_v34, %v8784_v58  ;;  %v5468_v28 = vadd.f32 %v2373_v31, %v8784_v58  ;;  %v3655_v45 = vpop.f32.mrb[65].mxu1  ;;  %3970 = vmatmul.mubr.f32.gmra.mrb[170].mxu1 %v365_v51 }
 0x31d   :  { %v8977_v8 = vmax.f32 %v8833_v17, %v4163_v4  ;;  %v4164_v33 = vmax.f32 %v5467_v22, 0.0  ;;  %v5660_v35 = vadd.f32 %v3655_v45, %v8784_v58  ;;  %5071 = vmatprep.mubr.msk.f32.mxu0 %vm1183_vm0, %v370_v1  ;;  %5167 = vmatprep.mubr.msk.f32.mxu1 %vm1183_vm0, %v370_v1  ;;  %v8989_v58 = vpop.permute.xlu1 %950 }
 0x31e   :  { %v4166_v6 = vmax.f32 %v5659_v24, 0.0  ;;  %v4165_v39 = vmax.f32 %v5468_v28, 0.0  ;;  %v2377_v5 = vpop.f32.mrb[66].mxu0 }
 0x31f   :  { %v8986_v25 = vmax.f32 %v8842_v13, %v4164_v33  ;;  %v4167_v53 = vmax.f32 %v5660_v35, 0.0  ;;  %v5469_v17 = vadd.f32 %v2377_v5, %v8810_v43  ;;  %v3659_v27 = vpop.f32.mrb[66].mxu1  ;;  %v2379_v37 = vpop.f32.mrb[67].mxu0  ;;  %2694 = vmatmul.mubr.f32.gmra.mrb[172].mxu0 %v369_v38  ;;  %v382_v5 = vld [vmem:[%s10020_s1 + $0xb38] sm:$0xff] }
 0x320   :  { %v8992_v12 = vmax.f32 %v8848_v32, %v4166_v6  ;;  %v8995_v40 = vmax.f32 %v8851_v21, %v4165_v39  ;;  %v5661_v42 = vadd.f32 %v3659_v27, %v8810_v43  ;;  %v5470_v50 = vadd.f32 %v2379_v37, %v8810_v43  ;;  %v3661_v13 = vpop.f32.mrb[67].mxu1  ;;  %3976 = vmatmul.mubr.f32.gmra.mrb[172].mxu1 %v369_v38  ;;  %v876_v21 = vpop.permute.xlu0 %875 }
 0x321   :  { %v9003_v51 = vmax.f32 %v8859_v44, %v4167_v53  ;;  %v4168_v61 = vmax.f32 %v5469_v17, 0.0  ;;  %v5662_v32 = vadd.f32 %v3661_v13, %v8810_v43  ;;  %5072 = vmatprep.mubr.msk.f32.mxu0 %vm1183_vm0, %v374_v16  ;;  %5168 = vmatprep.mubr.msk.f32.mxu1 %vm1183_vm0, %v374_v16 }
 0x322   :  { %v4170_v20 = vmax.f32 %v5661_v42, 0.0  ;;  %v4169_v23 = vmax.f32 %v5470_v50, 0.0  ;;  %v2383_v30 = vpop.f32.mrb[68].mxu0 }
 0x323   :  { %v9012_v1 = vmax.f32 %v8868_v14, %v4168_v61  ;;  %v4171_v44 = vmax.f32 %v5662_v32, 0.0  ;;  %v5471_v4 = vadd.f32 %v2383_v30, %v876_v21  ;;  %v3665_v22 = vpop.f32.mrb[68].mxu1  ;;  %v2385_v34 = vpop.f32.mrb[69].mxu0  ;;  %2700 = vmatmul.mubr.f32.gmra.mrb[174].mxu0 %v373_v63  ;;  %v377_v14 = vld [vmem:[%s10020_s1 + $0xb10] sm:$0xff] }
 0x324   :  { %v9015_v43 = vmax.f32 %v8871_v9, %v4170_v20  ;;  %v9018_v31 = vmax.f32 %v8874_v47, %v4169_v23  ;;  %v5663_v24 = vadd.f32 %v3665_v22, %v876_v21  ;;  %v5472_v28 = vadd.f32 %v2385_v34, %v876_v21  ;;  %v3667_v45 = vpop.f32.mrb[69].mxu1  ;;  %3982 = vmatmul.mubr.f32.gmra.mrb[174].mxu1 %v373_v63  ;;  %v881_v9 = vpop.permute.xlu1 %880  ;;  %v386_v23 = vld [vmem:[%s10020_s1 + $0xb58] sm:$0xff] }
 0x325   :  { %v9024_v38 = vmax.f32 %v8880_v55, %v4171_v44  ;;  %v4172_v33 = vmax.f32 %v5471_v4, 0.0  ;;  %v5664_v35 = vadd.f32 %v3667_v45, %v876_v21  ;;  %5073 = vmatprep.mubr.msk.f32.mxu0 %vm1183_vm0, %v378_v59  ;;  %5169 = vmatprep.mubr.msk.f32.mxu1 %vm1183_vm0, %v378_v59 }
 0x326   :  { %v4174_v47 = vmax.f32 %v5663_v24, 0.0  ;;  %v4173_v6 = vmax.f32 %v5472_v28, 0.0  ;;  %v2389_v39 = vpop.f32.mrb[70].mxu0 }
 0x327   :  { %v9032_v16 = vmax.f32 %v8888_v29, %v4172_v33  ;;  %v4175_v53 = vmax.f32 %v5664_v35, 0.0  ;;  %v5473_v55 = vadd.f32 %v2389_v39, %v881_v9  ;;  %v3671_v17 = vpop.f32.mrb[70].mxu1  ;;  %v2391_v27 = vpop.f32.mrb[71].mxu0  ;;  %2706 = vmatmul.mubr.f32.gmra.mrb[176].mxu0 %v377_v14  ;;  %v381_v29 = vld [vmem:[%s10020_s1 + $0xb30] sm:$0xff] }
 0x328   :  { %v9035_v37 = vmax.f32 %v8891_v62, %v4174_v47  ;;  %v9038_v42 = vmax.f32 %v8894_v2, %v4173_v6  ;;  %v5665_v50 = vadd.f32 %v3671_v17, %v881_v9  ;;  %v5474_v13 = vadd.f32 %v2391_v27, %v881_v9  ;;  %v3673_v63 = vpop.f32.mrb[71].mxu1  ;;  %3988 = vmatmul.mubr.f32.gmra.mrb[176].mxu1 %v377_v14  ;;  %v390_v6 = vld [vmem:[%s10020_s1 + $0xb78] sm:$0xff] }
 0x329   :  { %v9044_v61 = vmax.f32 %v8900_v19, %v4175_v53  ;;  %v4176_v32 = vmax.f32 %v5473_v55, 0.0  ;;  %v5666_v21 = vadd.f32 %v3673_v63, %v881_v9  ;;  %5074 = vmatprep.mubr.msk.f32.mxu0 %vm1183_vm0, %v382_v5  ;;  %5170 = vmatprep.mubr.msk.f32.mxu1 %vm1183_vm0, %v382_v5 }
 0x32a   :  { %v4178_v62 = vmax.f32 %v5665_v50, 0.0  ;;  %v4177_v2 = vmax.f32 %v5474_v13, 0.0  ;;  %v2395_v20 = vpop.f32.mrb[72].mxu0 }
 0x32b   :  { %v9052_v30 = vmax.f32 %v8908_v7, %v4176_v32  ;;  %v4179_v59 = vmax.f32 %v5666_v21, 0.0  ;;  %v5475_v19 = vadd.f32 %v2395_v20, %v8675_v48  ;;  %v3677_v44 = vpop.f32.mrb[72].mxu1  ;;  %v2397_v4 = vpop.f32.mrb[73].mxu0  ;;  %2712 = vmatmul.mubr.f32.gmra.mrb[178].mxu0 %v381_v29  ;;  %v385_v7 = vld [vmem:[%s10020_s1 + $0xb50] sm:$0xff] }
 0x32c   :  { %v9056_v22 = vmax.f32 %v8912_v10, %v4178_v62  ;;  %v9059_v34 = vmax.f32 %v8915_v56, %v4177_v2  ;;  %v5667_v24 = vadd.f32 %v3677_v44, %v8675_v48  ;;  %v5476_v28 = vadd.f32 %v2397_v4, %v8675_v48  ;;  %v3679_v45 = vpop.f32.mrb[73].mxu1  ;;  %3994 = vmatmul.mubr.f32.gmra.mrb[178].mxu1 %v381_v29  ;;  %v9072_v56 = vpop.permute.xlu0 %925  ;;  %v394_v2 = vld [vmem:[%s10020_s1 + $0xb98] sm:$0xff] }
 0x32d   :  { %v9067_v14 = vmax.f32 %v8923_v54, %v4179_v59  ;;  %v4180_v33 = vmax.f32 %v5475_v19, 0.0  ;;  %v5668_v10 = vadd.f32 %v3679_v45, %v8675_v48  ;;  %5075 = vmatprep.mubr.msk.f32.mxu0 %vm1183_vm0, %v386_v23  ;;  %5171 = vmatprep.mubr.msk.f32.mxu1 %vm1183_vm0, %v386_v23  ;;  %v393_v45 = vld [vmem:[%s10020_s1 + $0xb90] sm:$0xff] }
 0x32e   :  { %v4182_v35 = vmax.f32 %v5667_v24, 0.0  ;;  %v4181_v9 = vmax.f32 %v5476_v28, 0.0  ;;  %v2401_v47 = vpop.f32.mrb[74].mxu0 }
 0x32f   :  { %v9078_v39 = vmax.f32 %v8934_v36, %v4180_v33  ;;  %v4183_v54 = vmax.f32 %v5668_v10, 0.0  ;;  %v5477_v5 = vadd.f32 %v2401_v47, %v8701_v41  ;;  %v3683_v48 = vpop.f32.mrb[74].mxu1  ;;  %v2403_v53 = vpop.f32.mrb[75].mxu0  ;;  %2718 = vmatmul.mubr.f32.gmra.mrb[180].mxu0 %v385_v7  ;;  %v389_v36 = vld [vmem:[%s10020_s1 + $0xb70] sm:$0xff] }
 0x330   :  { %v9082_v55 = vmax.f32 %v8938_v26, %v4182_v35  ;;  %v9085_v17 = vmax.f32 %v8941_v60, %v4181_v9  ;;  %v5669_v27 = vadd.f32 %v3683_v48, %v8701_v41  ;;  %v5478_v50 = vadd.f32 %v2403_v53, %v8701_v41  ;;  %v3685_v13 = vpop.f32.mrb[75].mxu1  ;;  %4000 = vmatmul.mubr.f32.gmra.mrb[180].mxu1 %v385_v7  ;;  %v9098_v60 = vpop.permute.xlu1 %930  ;;  %v398_v9 = vld [vmem:[%s10020_s1 + $0xbb8] sm:$0xff] }
 0x331   :  { %v9093_v63 = vmax.f32 %v8949_v52, %v4183_v54  ;;  %v4184_v29 = vmax.f32 %v5477_v5, 0.0  ;;  %v5670_v26 = vadd.f32 %v3685_v13, %v8701_v41  ;;  %5076 = vmatprep.mubr.msk.f32.mxu0 %vm1183_vm0, %v390_v6  ;;  %5172 = vmatprep.mubr.msk.f32.mxu1 %vm1183_vm0, %v390_v6  ;;  %v9107_v19 = vpop.permute.xlu0 %975  ;;  %v397_v13 = vld [vmem:[%s10020_s1 + $0xbb0] sm:$0xff] }
 0x332   :  { %v4186_v32 = vmax.f32 %v5669_v27, 0.0  ;;  %v4185_v21 = vmax.f32 %v5478_v50, 0.0  ;;  %v2407_v62 = vpop.f32.mrb[76].mxu0 }
 0x333   :  { %v9104_v20 = vmax.f32 %v8960_v18, %v4184_v29  ;;  %v4187_v52 = vmax.f32 %v5670_v26, 0.0  ;;  %v5479_v23 = vadd.f32 %v2407_v62, %v8928_v0  ;;  %v3689_v41 = vpop.f32.mrb[76].mxu1  ;;  %v2409_v59 = vpop.f32.mrb[77].mxu0  ;;  %2724 = vmatmul.mubr.f32.gmra.mrb[182].mxu0 %v389_v36  ;;  %v402_v62 = vld [vmem:[%s10020_s1 + $0xbd8] sm:$0xff] }
 0x334   :  { %v9110_v44 = vmax.f32 %v8966_v46, %v4186_v32  ;;  %v9113_v4 = vmax.f32 %v8969_v49, %v4185_v21  ;;  %v5671_v24 = vadd.f32 %v3689_v41, %v8928_v0  ;;  %v5480_v28 = vadd.f32 %v2409_v59, %v8928_v0  ;;  %v3691_v18 = vpop.f32.mrb[77].mxu1  ;;  %4006 = vmatmul.mubr.f32.gmra.mrb[182].mxu1 %v389_v36 }
 0x335   :  { %v9121_v7 = vmax.f32 %v8977_v8, %v4187_v52  ;;  %v4188_v33 = vmax.f32 %v5479_v23, 0.0  ;;  %v5672_v46 = vadd.f32 %v3691_v18, %v8928_v0  ;;  %5077 = vmatprep.mubr.msk.f32.mxu0 %vm1183_vm0, %v394_v2  ;;  %5173 = vmatprep.mubr.msk.f32.mxu1 %vm1183_vm0, %v394_v2  ;;  %v9133_v0 = vpop.permute.xlu1 %980 }
 0x336   :  { %v4190_v49 = vmax.f32 %v5671_v24, 0.0  ;;  %v4189_v10 = vmax.f32 %v5480_v28, 0.0  ;;  %v2413_v35 = vpop.f32.mrb[78].mxu0 }
 0x337   :  { %v9130_v47 = vmax.f32 %v8986_v25, %v4188_v33  ;;  %v4191_v6 = vmax.f32 %v5672_v46, 0.0  ;;  %v5481_v8 = vadd.f32 %v2413_v35, %v8954_v57  ;;  %v3695_v54 = vpop.f32.mrb[78].mxu1  ;;  %v2415_v5 = vpop.f32.mrb[79].mxu0  ;;  %2730 = vmatmul.mubr.f32.gmra.mrb[184].mxu0 %v393_v45  ;;  %v406_v35 = vld [vmem:[%s10020_s1 + $0xbf8] sm:$0xff] }
 0x338   :  { %v9136_v48 = vmax.f32 %v8992_v12, %v4190_v49  ;;  %v9139_v53 = vmax.f32 %v8995_v40, %v4189_v10  ;;  %v5673_v27 = vadd.f32 %v3695_v54, %v8954_v57  ;;  %v5482_v50 = vadd.f32 %v2415_v5, %v8954_v57  ;;  %v3697_v25 = vpop.f32.mrb[79].mxu1  ;;  %4012 = vmatmul.mubr.f32.gmra.mrb[184].mxu1 %v393_v45  ;;  %v906_v40 = vpop.permute.xlu0 %905 }
 0x339   :  { %v9147_v36 = vmax.f32 %v9003_v51, %v4191_v6  ;;  %v4192_v29 = vmax.f32 %v5481_v8, 0.0  ;;  %v5674_v12 = vadd.f32 %v3697_v25, %v8954_v57  ;;  %5078 = vmatprep.mubr.msk.f32.mxu0 %vm1183_vm0, %v398_v9  ;;  %5174 = vmatprep.mubr.msk.f32.mxu1 %vm1183_vm0, %v398_v9 }
 0x33a   :  { %v4194_v26 = vmax.f32 %v5673_v27, 0.0  ;;  %v4193_v32 = vmax.f32 %v5482_v50, 0.0  ;;  %v2419_v21 = vpop.f32.mrb[80].mxu0 }
 0x33b   :  { %v9156_v2 = vmax.f32 %v9012_v1, %v4192_v29  ;;  %v4195_v51 = vmax.f32 %v5674_v12, 0.0  ;;  %v5483_v52 = vadd.f32 %v2419_v21, %v906_v40  ;;  %v3701_v23 = vpop.f32.mrb[80].mxu1  ;;  %v2421_v41 = vpop.f32.mrb[81].mxu0  ;;  %2736 = vmatmul.mubr.f32.gmra.mrb[186].mxu0 %v397_v13  ;;  %v401_v1 = vld [vmem:[%s10020_s1 + $0xbd0] sm:$0xff] }
 0x33c   :  { %v9159_v57 = vmax.f32 %v9015_v43, %v4194_v26  ;;  %v9162_v59 = vmax.f32 %v9018_v31, %v4193_v32  ;;  %v5675_v24 = vadd.f32 %v3701_v23, %v906_v40  ;;  %v5484_v28 = vadd.f32 %v2421_v41, %v906_v40  ;;  %v3703_v18 = vpop.f32.mrb[81].mxu1  ;;  %4018 = vmatmul.mubr.f32.gmra.mrb[186].mxu1 %v397_v13  ;;  %v911_v43 = vpop.permute.xlu1 %910 }
 0x33d   :  { %v9168_v45 = vmax.f32 %v9024_v38, %v4195_v51  ;;  %v4196_v33 = vmax.f32 %v5483_v52, 0.0  ;;  %v5676_v46 = vadd.f32 %v3703_v18, %v906_v40  ;;  %5079 = vmatprep.mubr.msk.f32.mxu0 %vm1183_vm0, %v402_v62  ;;  %5175 = vmatprep.mubr.msk.f32.mxu1 %vm1183_vm0, %v402_v62 }
 0x33e   :  { %v4198_v31 = vmax.f32 %v5675_v24, 0.0  ;;  %v4197_v49 = vmax.f32 %v5484_v28, 0.0  ;;  %v2425_v10 = vpop.f32.mrb[82].mxu0 }
 0x33f   :  { %v9176_v9 = vmax.f32 %v9032_v16, %v4196_v33  ;;  %v4199_v6 = vmax.f32 %v5676_v46, 0.0  ;;  %v5485_v38 = vadd.f32 %v2425_v10, %v911_v43  ;;  %v3707_v8 = vpop.f32.mrb[82].mxu1  ;;  %v2427_v54 = vpop.f32.mrb[83].mxu0  ;;  %2742 = vmatmul.mubr.f32.gmra.mrb[188].mxu0 %v401_v1  ;;  %v405_v16 = vld [vmem:[%s10020_s1 + $0xbf0] sm:$0xff] }
 0x340   :  { %v9179_v5 = vmax.f32 %v9035_v37, %v4198_v31  ;;  %v9182_v27 = vmax.f32 %v9038_v42, %v4197_v49  ;;  %v5677_v50 = vadd.f32 %v3707_v8, %v911_v43  ;;  %v5486_v25 = vadd.f32 %v2427_v54, %v911_v43  ;;  %v3709_v13 = vpop.f32.mrb[83].mxu1  ;;  %4024 = vmatmul.mubr.f32.gmra.mrb[188].mxu1 %v401_v1  ;;  %v9208_v33 = vpop.permute.xlu0 %955 }
 0x341   :  { %v9188_v29 = vmax.f32 %v9044_v61, %v4199_v6  ;;  %v4200_v12 = vmax.f32 %v5485_v38, 0.0  ;;  %v5678_v40 = vadd.f32 %v3709_v13, %v911_v43  ;;  %5080 = vmatprep.mubr.msk.f32.mxu0 %vm1183_vm0, %v406_v35  ;;  %5176 = vmatprep.mubr.msk.f32.mxu1 %vm1183_vm0, %v406_v35 }
 0x342   :  { %v4202_v37 = vmax.f32 %v5677_v50, 0.0  ;;  %v4201_v42 = vmax.f32 %v5486_v25, 0.0  ;;  %v2431_v26 = vpop.f32.mrb[84].mxu0  ;;  %v9226_v25 = vpop.permute.xlu1 %960 }
 0x343   :  { %v9193_v32 = vmax.f32 %v9052_v30, %v4200_v12  ;;  %v4203_v21 = vmax.f32 %v5678_v40, 0.0  ;;  %v5487_v62 = vadd.f32 %v2431_v26, %v8819_v3  ;;  %v3713_v51 = vpop.f32.mrb[84].mxu1  ;;  %v2433_v52 = vpop.f32.mrb[85].mxu0  ;;  %2748 = vmatmul.mubr.f32.gmra.mrb[190].mxu0 %v405_v16 }
 0x344   :  { %v9197_v61 = vmax.f32 %v9056_v22, %v4202_v37  ;;  %v9200_v23 = vmax.f32 %v9059_v34, %v4201_v42  ;;  %v5679_v41 = vadd.f32 %v3713_v51, %v8819_v3  ;;  %v5488_v24 = vadd.f32 %v2433_v52, %v8819_v3  ;;  %v3715_v28 = vpop.f32.mrb[85].mxu1  ;;  %4030 = vmatmul.mubr.f32.gmra.mrb[190].mxu1 %v405_v16  ;;  %v9232_v26 = vpop.permute.xlu0 %1005 }
 0x345   :  { %v9205_v30 = vmax.f32 %v9067_v14, %v4203_v21  ;;  %v4204_v18 = vmax.f32 %v5487_v62, 0.0  ;;  %v5680_v1 = vadd.f32 %v3715_v28, %v8819_v3 }
 0x346   :  { %v4206_v46 = vmax.f32 %v5679_v41, 0.0  ;;  %v4205_v22 = vmax.f32 %v5488_v24, 0.0  ;;  %v2437_v43 = vpop.f32.mrb[86].mxu0 }
 0x347   :  { %v9211_v34 = vmax.f32 %v9078_v39, %v4204_v18  ;;  %v4207_v31 = vmax.f32 %v5680_v1, 0.0  ;;  %v5489_v49 = vadd.f32 %v2437_v43, %v8845_v15  ;;  %v3719_v10 = vpop.f32.mrb[86].mxu1  ;;  %v2439_v35 = vpop.f32.mrb[87].mxu0 }
 0x348   :  { %v9215_v6 = vmax.f32 %v9082_v55, %v4206_v46  ;;  %v9218_v14 = vmax.f32 %v9085_v17, %v4205_v22  ;;  %v5681_v3 = vadd.f32 %v3719_v10, %v8845_v15  ;;  %v5490_v38 = vadd.f32 %v2439_v35, %v8845_v15  ;;  %v3721_v8 = vpop.f32.mrb[87].mxu1  ;;  %v9250_v43 = vpop.permute.xlu1 %1010 }
 0x349   :  { %v9223_v54 = vmax.f32 %v9093_v63, %v4207_v31  ;;  %v4208_v39 = vmax.f32 %v5489_v49, 0.0  ;;  %v5682_v50 = vadd.f32 %v3721_v8, %v8845_v15 }
 0x34a   :  { %v4210_v13 = vmax.f32 %v5681_v3, 0.0  ;;  %v4209_v16 = vmax.f32 %v5490_v38, 0.0  ;;  %v2443_v55 = vpop.f32.mrb[88].mxu0  ;;  %v936_v38 = vpop.permute.xlu0 %935 }
 0x34b   :  { %v9229_v12 = vmax.f32 %v9104_v20, %v4208_v39  ;;  %v4211_v17 = vmax.f32 %v5682_v50, 0.0  ;;  %v5491_v40 = vadd.f32 %v2443_v55, %v9072_v56  ;;  %v3725_v37 = vpop.f32.mrb[88].mxu1  ;;  %v2445_v42 = vpop.f32.mrb[89].mxu0 }
 0x34c   :  { %v9235_v63 = vmax.f32 %v9110_v44, %v4210_v13  ;;  %v9238_v15 = vmax.f32 %v9113_v4, %v4209_v16  ;;  %v5683_v21 = vadd.f32 %v3725_v37, %v9072_v56  ;;  %v5492_v62 = vadd.f32 %v2445_v42, %v9072_v56  ;;  %v3727_v51 = vpop.f32.mrb[89].mxu1 }
 0x34d   :  { %v9243_v20 = vmax.f32 %v9121_v7, %v4211_v17  ;;  %v4212_v52 = vmax.f32 %v5491_v40, 0.0  ;;  %v5684_v41 = vadd.f32 %v3727_v51, %v9072_v56 }
 0x34e   :  { %v4214_v24 = vmax.f32 %v5683_v21, 0.0  ;;  %v4213_v28 = vmax.f32 %v5492_v62, 0.0  ;;  %v2449_v18 = vpop.f32.mrb[90].mxu0 }
 0x34f   :  { %v9247_v44 = vmax.f32 %v9130_v47, %v4212_v52  ;;  %v4215_v1 = vmax.f32 %v5684_v41, 0.0  ;;  %v5493_v4 = vadd.f32 %v2449_v18, %v9098_v60  ;;  %v3731_v46 = vpop.f32.mrb[90].mxu1  ;;  %v2451_v22 = vpop.f32.mrb[91].mxu0 }
 0x350   :  { %v9253_v31 = vmax.f32 %v9136_v48, %v4214_v24  ;;  %v9256_v7 = vmax.f32 %v9139_v53, %v4213_v28  ;;  %v5685_v56 = vadd.f32 %v3731_v46, %v9098_v60  ;;  %v5494_v49 = vadd.f32 %v2451_v22, %v9098_v60  ;;  %v3733_v10 = vpop.f32.mrb[91].mxu1 }
 0x351   :  { %v9261_v47 = vmax.f32 %v9147_v36, %v4215_v1  ;;  %v4216_v35 = vmax.f32 %v5493_v4, 0.0  ;;  %v5686_v3 = vadd.f32 %v3733_v10, %v9098_v60 }
 0x352   :  { %v4218_v8 = vmax.f32 %v5685_v56, 0.0  ;;  %v4217_v39 = vmax.f32 %v5494_v49, 0.0  ;;  %v2455_v50 = vpop.f32.mrb[92].mxu0 }
 0x353   :  { %v9265_v48 = vmax.f32 %v9156_v2, %v4216_v35  ;;  %v4219_v53 = vmax.f32 %v5686_v3, 0.0  ;;  %v5495_v13 = vadd.f32 %v2455_v50, %v936_v38  ;;  %v3737_v16 = vpop.f32.mrb[92].mxu1  ;;  %v2457_v55 = vpop.f32.mrb[93].mxu0 }
 0x354   :  { %v9268_v17 = vmax.f32 %v9159_v57, %v4218_v8  ;;  %v9271_v36 = vmax.f32 %v9162_v59, %v4217_v39  ;;  %v5687_v40 = vadd.f32 %v3737_v16, %v936_v38  ;;  %v5496_v37 = vadd.f32 %v2457_v55, %v936_v38  ;;  %v3739_v60 = vpop.f32.mrb[93].mxu1  ;;  %v941_v2 = vpop.permute.xlu1 %940 }
 0x355   :  { %v9274_v42 = vmax.f32 %v9168_v45, %v4219_v53  ;;  %v4220_v21 = vmax.f32 %v5495_v13, 0.0  ;;  %v5688_v62 = vadd.f32 %v3739_v60, %v936_v38 }
 0x356   :  { %v4222_v51 = vmax.f32 %v5687_v40, 0.0  ;;  %v4221_v52 = vmax.f32 %v5496_v37, 0.0  ;;  %v2461_v41 = vpop.f32.mrb[94].mxu0  ;;  %v9304_v37 = vpop.permute.xlu0 %985 }
 0x357   :  { %v9277_v24 = vmax.f32 %v9176_v9, %v4220_v21  ;;  %v4223_v57 = vmax.f32 %v5688_v62, 0.0  ;;  %v5497_v28 = vadd.f32 %v2461_v41, %v941_v2  ;;  %v3743_v18 = vpop.f32.mrb[94].mxu1  ;;  %v2463_v59 = vpop.f32.mrb[95].mxu0 }
 0x358   :  { %v9280_v1 = vmax.f32 %v9179_v5, %v4222_v51  ;;  %v9283_v4 = vmax.f32 %v9182_v27, %v4221_v52  ;;  %v5689_v45 = vadd.f32 %v3743_v18, %v941_v2  ;;  %v5498_v46 = vadd.f32 %v2463_v59, %v941_v2  ;;  %v3745_v22 = vpop.f32.mrb[95].mxu1 }
 0x359   :  { %v9286_v56 = vmax.f32 %v9188_v29, %v4223_v57  ;;  %v4224_v49 = vmax.f32 %v5497_v28, 0.0  ;;  %v5690_v10 = vadd.f32 %v3745_v22, %v941_v2 }
 0x35a   :  { %v4226_v9 = vmax.f32 %v5689_v45, 0.0  ;;  %v4225_v35 = vmax.f32 %v5498_v46, 0.0  ;;  %v2467_v3 = vpop.f32.mrb[96].mxu0  ;;  %v9322_v45 = vpop.permute.xlu1 %990 }
 0x35b   :  { %v9289_v38 = vmax.f32 %v9193_v32, %v4224_v49  ;;  %v4227_v8 = vmax.f32 %v5690_v10, 0.0  ;;  %v5499_v5 = vadd.f32 %v2467_v3, %v8963_v11  ;;  %v3749_v39 = vpop.f32.mrb[96].mxu1  ;;  %v2469_v27 = vpop.f32.mrb[97].mxu0 }
 0x35c   :  { %v9293_v50 = vmax.f32 %v9197_v61, %v4226_v9  ;;  %v9296_v53 = vmax.f32 %v9200_v23, %v4225_v35  ;;  %v5691_v29 = vadd.f32 %v3749_v39, %v8963_v11  ;;  %v5500_v13 = vadd.f32 %v2469_v27, %v8963_v11  ;;  %v3751_v16 = vpop.f32.mrb[97].mxu1  ;;  %v9328_v3 = vpop.permute.xlu0 %1035 }
 0x35d   :  { %v9301_v55 = vmax.f32 %v9205_v30, %v4227_v8  ;;  %v4228_v32 = vmax.f32 %v5499_v5, 0.0  ;;  %v5692_v40 = vadd.f32 %v3751_v16, %v8963_v11 }
 0x35e   :  { %v4230_v60 = vmax.f32 %v5691_v29, 0.0  ;;  %v4229_v21 = vmax.f32 %v5500_v13, 0.0  ;;  %v2473_v61 = vpop.f32.mrb[98].mxu0 }
 0x35f   :  { %v9307_v62 = vmax.f32 %v9211_v34, %v4228_v32  ;;  %v4231_v23 = vmax.f32 %v5692_v40, 0.0  ;;  %v5501_v2 = vadd.f32 %v2473_v61, %v8989_v58  ;;  %v3755_v51 = vpop.f32.mrb[98].mxu1  ;;  %v2475_v52 = vpop.f32.mrb[99].mxu0 }
 0x360   :  { %v9311_v41 = vmax.f32 %v9215_v6, %v4230_v60  ;;  %v9314_v30 = vmax.f32 %v9218_v14, %v4229_v21  ;;  %v5693_v11 = vadd.f32 %v3755_v51, %v8989_v58  ;;  %v5502_v57 = vadd.f32 %v2475_v52, %v8989_v58  ;;  %v3757_v28 = vpop.f32.mrb[99].mxu1  ;;  %v9346_v61 = vpop.permute.xlu1 %1040 }
 0x361   :  { %v9319_v18 = vmax.f32 %v9223_v54, %v4231_v23  ;;  %v4232_v34 = vmax.f32 %v5501_v2, 0.0  ;;  %v5694_v59 = vadd.f32 %v3757_v28, %v8989_v58 }
 0x362   :  { %v4234_v46 = vmax.f32 %v5693_v11, 0.0  ;;  %v4233_v22 = vmax.f32 %v5502_v57, 0.0  ;;  %v2479_v6 = vpop.f32.mrb[100].mxu0  ;;  %v966_v57 = vpop.permute.xlu0 %965 }
 0x363   :  { %v9325_v49 = vmax.f32 %v9229_v12, %v4232_v34  ;;  %v4235_v14 = vmax.f32 %v5694_v59, 0.0  ;;  %v5503_v10 = vadd.f32 %v2479_v6, %v9208_v33  ;;  %v3761_v9 = vpop.f32.mrb[100].mxu1  ;;  %v2481_v35 = vpop.f32.mrb[101].mxu0 }
 0x364   :  { %v9331_v54 = vmax.f32 %v9235_v63, %v4234_v46  ;;  %v9334_v58 = vmax.f32 %v9238_v15, %v4233_v22  ;;  %v5695_v8 = vadd.f32 %v3761_v9, %v9208_v33  ;;  %v5504_v5 = vadd.f32 %v2481_v35, %v9208_v33  ;;  %v3763_v39 = vpop.f32.mrb[101].mxu1 }
 0x365   :  { %v9339_v12 = vmax.f32 %v9243_v20, %v4235_v14  ;;  %v4236_v27 = vmax.f32 %v5503_v10, 0.0  ;;  %v5696_v29 = vadd.f32 %v3763_v39, %v9208_v33 }
 0x366   :  { %v4238_v13 = vmax.f32 %v5695_v8, 0.0  ;;  %v4237_v16 = vmax.f32 %v5504_v5, 0.0  ;;  %v2485_v32 = vpop.f32.mrb[102].mxu0 }
 0x367   :  { %v9343_v63 = vmax.f32 %v9247_v44, %v4236_v27  ;;  %v4239_v40 = vmax.f32 %v5696_v29, 0.0  ;;  %v5505_v15 = vadd.f32 %v2485_v32, %v9226_v25  ;;  %v3767_v60 = vpop.f32.mrb[102].mxu1  ;;  %v2487_v21 = vpop.f32.mrb[103].mxu0 }
 0x368   :  { %v9349_v23 = vmax.f32 %v9253_v31, %v4238_v13  ;;  %v9352_v20 = vmax.f32 %v9256_v7, %v4237_v16  ;;  %v5697_v33 = vadd.f32 %v3767_v60, %v9226_v25  ;;  %v5506_v2 = vadd.f32 %v2487_v21, %v9226_v25  ;;  %v3769_v51 = vpop.f32.mrb[103].mxu1 }
 0x369   :  { %v9357_v44 = vmax.f32 %v9261_v47, %v4239_v40  ;;  %v4240_v52 = vmax.f32 %v5505_v15, 0.0  ;;  %v5698_v11 = vadd.f32 %v3769_v51, %v9226_v25 }
 0x36a   :  { %v4242_v28 = vmax.f32 %v5697_v33, 0.0  ;;  %v4241_v34 = vmax.f32 %v5506_v2, 0.0  ;;  %v2491_v59 = vpop.f32.mrb[104].mxu0 }
 0x36b   :  { %v9361_v31 = vmax.f32 %v9265_v48, %v4240_v52  ;;  %v4243_v7 = vmax.f32 %v5698_v11, 0.0  ;;  %v5507_v46 = vadd.f32 %v2491_v59, %v966_v57  ;;  %v3773_v22 = vpop.f32.mrb[104].mxu1  ;;  %v2493_v6 = vpop.f32.mrb[105].mxu0 }
 0x36c   :  { %v9364_v14 = vmax.f32 %v9268_v17, %v4242_v28  ;;  %v9367_v47 = vmax.f32 %v9271_v36, %v4241_v34  ;;  %v5699_v10 = vadd.f32 %v3773_v22, %v966_v57  ;;  %v5508_v9 = vadd.f32 %v2493_v6, %v966_v57  ;;  %v3775_v25 = vpop.f32.mrb[105].mxu1  ;;  %v971_v48 = vpop.permute.xlu1 %970 }
 0x36d   :  { %v9370_v35 = vmax.f32 %v9274_v42, %v4243_v7  ;;  %v4244_v8 = vmax.f32 %v5507_v46, 0.0  ;;  %v5700_v5 = vadd.f32 %v3775_v25, %v966_v57 }
 0x36e   :  { %v4246_v39 = vmax.f32 %v5699_v10, 0.0  ;;  %v4245_v27 = vmax.f32 %v5508_v9, 0.0  ;;  %v2497_v29 = vpop.f32.mrb[106].mxu0  ;;  %v9400_v9 = vpop.permute.xlu0 %1015 }
 0x36f   :  { %v9373_v13 = vmax.f32 %v9277_v24, %v4244_v8  ;;  %v4247_v17 = vmax.f32 %v5700_v5, 0.0  ;;  %v5509_v16 = vadd.f32 %v2497_v29, %v971_v48  ;;  %v3779_v32 = vpop.f32.mrb[106].mxu1  ;;  %v2499_v36 = vpop.f32.mrb[107].mxu0 }
 0x370   :  { %v9376_v40 = vmax.f32 %v9280_v1, %v4246_v39  ;;  %v9379_v15 = vmax.f32 %v9283_v4, %v4245_v27  ;;  %v5701_v42 = vadd.f32 %v3779_v32, %v971_v48  ;;  %v5510_v60 = vadd.f32 %v2499_v36, %v971_v48  ;;  %v3781_v21 = vpop.f32.mrb[107].mxu1 }
 0x371   :  { %v9382_v33 = vmax.f32 %v9286_v56, %v4247_v17  ;;  %v4248_v2 = vmax.f32 %v5509_v16, 0.0  ;;  %v5702_v51 = vadd.f32 %v3781_v21, %v971_v48 }
 0x372   :  { %v4250_v24 = vmax.f32 %v5701_v42, 0.0  ;;  %v4249_v52 = vmax.f32 %v5510_v60, 0.0  ;;  %v2503_v11 = vpop.f32.mrb[108].mxu0  ;;  %v9418_v42 = vpop.permute.xlu1 %1020 }
 0x373   :  { %v9385_v57 = vmax.f32 %v9289_v38, %v4248_v2  ;;  %v4251_v28 = vmax.f32 %v5702_v51, 0.0  ;;  %v5511_v1 = vadd.f32 %v2503_v11, %v9107_v19  ;;  %v3785_v34 = vpop.f32.mrb[108].mxu1  ;;  %v2505_v4 = vpop.f32.mrb[109].mxu0 }
 0x374   :  { %v9389_v59 = vmax.f32 %v9293_v50, %v4250_v24  ;;  %v9392_v7 = vmax.f32 %v9296_v53, %v4249_v52  ;;  %v5703_v56 = vadd.f32 %v3785_v34, %v9107_v19  ;;  %v5512_v46 = vadd.f32 %v2505_v4, %v9107_v19  ;;  %v3787_v22 = vpop.f32.mrb[109].mxu1  ;;  %v9424_v11 = vpop.permute.xlu0 %1065 }
 0x375   :  { %v9397_v6 = vmax.f32 %v9301_v55, %v4251_v28  ;;  %v4252_v38 = vmax.f32 %v5511_v1, 0.0  ;;  %v5704_v10 = vadd.f32 %v3787_v22, %v9107_v19 }
 0x376   :  { %v4254_v25 = vmax.f32 %v5703_v56, 0.0  ;;  %v4253_v8 = vmax.f32 %v5512_v46, 0.0  ;;  %v2509_v50 = vpop.f32.mrb[110].mxu0 }
 0x377   :  { %v9403_v5 = vmax.f32 %v9307_v62, %v4252_v38  ;;  %v4255_v53 = vmax.f32 %v5704_v10, 0.0  ;;  %v5513_v48 = vadd.f32 %v2509_v50, %v9133_v0  ;;  %v3791_v39 = vpop.f32.mrb[110].mxu1  ;;  %v2511_v27 = vpop.f32.mrb[111].mxu0 }
 0x378   :  { %v9407_v29 = vmax.f32 %v9311_v41, %v4254_v25  ;;  %v9410_v55 = vmax.f32 %v9314_v30, %v4253_v8  ;;  %v5705_v19 = vadd.f32 %v3791_v39, %v9133_v0  ;;  %v5514_v17 = vadd.f32 %v2511_v27, %v9133_v0  ;;  %v3793_v16 = vpop.f32.mrb[111].mxu1  ;;  %v9442_v50 = vpop.permute.xlu1 %1070 }
 0x379   :  { %v9415_v32 = vmax.f32 %v9319_v18, %v4255_v53  ;;  %v4256_v62 = vmax.f32 %v5513_v48, 0.0  ;;  %v5706_v36 = vadd.f32 %v3793_v16, %v9133_v0 }
 0x37a   :  { %v4258_v60 = vmax.f32 %v5705_v19, 0.0  ;;  %v4257_v21 = vmax.f32 %v5514_v17, 0.0  ;;  %v2515_v41 = vpop.f32.mrb[112].mxu0  ;;  %v996_v17 = vpop.permute.xlu0 %995 }
 0x37b   :  { %v9421_v2 = vmax.f32 %v9325_v49, %v4256_v62  ;;  %v4259_v30 = vmax.f32 %v5706_v36, 0.0  ;;  %v5515_v51 = vadd.f32 %v2515_v41, %v9304_v37  ;;  %v3797_v24 = vpop.f32.mrb[112].mxu1  ;;  %v2517_v52 = vpop.f32.mrb[113].mxu0 }
 0x37c   :  { %v9427_v18 = vmax.f32 %v9331_v54, %v4258_v60  ;;  %v9430_v0 = vmax.f32 %v9334_v58, %v4257_v21  ;;  %v5707_v28 = vadd.f32 %v3797_v24, %v9304_v37  ;;  %v5516_v1 = vadd.f32 %v2517_v52, %v9304_v37  ;;  %v3799_v34 = vpop.f32.mrb[113].mxu1 }
 0x37d   :  { %v9435_v49 = vmax.f32 %v9339_v12, %v4259_v30  ;;  %v4260_v4 = vmax.f32 %v5515_v51, 0.0  ;;  %v5708_v56 = vadd.f32 %v3799_v34, %v9304_v37 }
 0x37e   :  { %v4262_v46 = vmax.f32 %v5707_v28, 0.0  ;;  %v4261_v22 = vmax.f32 %v5516_v1, 0.0  ;;  %v2521_v38 = vpop.f32.mrb[114].mxu0 }
 0x37f   :  { %v9439_v54 = vmax.f32 %v9343_v63, %v4260_v4  ;;  %v4263_v10 = vmax.f32 %v5708_v56, 0.0  ;;  %v5517_v58 = vadd.f32 %v2521_v38, %v9322_v45  ;;  %v3803_v25 = vpop.f32.mrb[114].mxu1  ;;  %v2523_v8 = vpop.f32.mrb[115].mxu0 }
 0x380   :  { %v9445_v53 = vmax.f32 %v9349_v23, %v4262_v46  ;;  %v9448_v12 = vmax.f32 %v9352_v20, %v4261_v22  ;;  %v5709_v37 = vadd.f32 %v3803_v25, %v9322_v45  ;;  %v5518_v48 = vadd.f32 %v2523_v8, %v9322_v45  ;;  %v3805_v39 = vpop.f32.mrb[115].mxu1 }
 0x381   :  { %v9453_v63 = vmax.f32 %v9357_v44, %v4263_v10  ;;  %v4264_v27 = vmax.f32 %v5517_v58, 0.0  ;;  %v5710_v19 = vadd.f32 %v3805_v39, %v9322_v45 }
 0x382   :  { %v4266_v16 = vmax.f32 %v5709_v37, 0.0  ;;  %v4265_v62 = vmax.f32 %v5518_v48, 0.0  ;;  %v2527_v36 = vpop.f32.mrb[116].mxu0 }
 0x383   :  { %v9457_v23 = vmax.f32 %v9361_v31, %v4264_v27  ;;  %v4267_v20 = vmax.f32 %v5710_v19, 0.0  ;;  %v5519_v60 = vadd.f32 %v2527_v36, %v996_v17  ;;  %v3809_v21 = vpop.f32.mrb[116].mxu1  ;;  %v2529_v41 = vpop.f32.mrb[117].mxu0 }
 0x384   :  { %v9460_v30 = vmax.f32 %v9364_v14, %v4266_v16  ;;  %v9463_v44 = vmax.f32 %v9367_v47, %v4265_v62  ;;  %v5711_v51 = vadd.f32 %v3809_v21, %v996_v17  ;;  %v5520_v24 = vadd.f32 %v2529_v41, %v996_v17  ;;  %v3811_v45 = vpop.f32.mrb[117].mxu1  ;;  %v1001_v31 = vpop.permute.xlu1 %1000 }
 0x385   :  { %v9466_v52 = vmax.f32 %v9370_v35, %v4267_v20  ;;  %v4268_v28 = vmax.f32 %v5519_v60, 0.0  ;;  %v5712_v1 = vadd.f32 %v3811_v45, %v996_v17 }
 0x386   :  { %v4270_v34 = vmax.f32 %v5711_v51, 0.0  ;;  %v4269_v4 = vmax.f32 %v5520_v24, 0.0  ;;  %v2533_v56 = vpop.f32.mrb[118].mxu0  ;;  %v9496_v24 = vpop.permute.xlu0 %1045 }
 0x387   :  { %v9469_v46 = vmax.f32 %v9373_v13, %v4268_v28  ;;  %v4271_v14 = vmax.f32 %v5712_v1, 0.0  ;;  %v5521_v22 = vadd.f32 %v2533_v56, %v1001_v31  ;;  %v3815_v38 = vpop.f32.mrb[118].mxu1  ;;  %v2535_v47 = vpop.f32.mrb[119].mxu0 }
 0x388   :  { %v9472_v10 = vmax.f32 %v9376_v40, %v4270_v34  ;;  %v9475_v58 = vmax.f32 %v9379_v15, %v4269_v4  ;;  %v5713_v35 = vadd.f32 %v3815_v38, %v1001_v31  ;;  %v5522_v25 = vadd.f32 %v2535_v47, %v1001_v31  ;;  %v3817_v8 = vpop.f32.mrb[119].mxu1 }
 0x389   :  { %v9478_v37 = vmax.f32 %v9382_v33, %v4271_v14  ;;  %v4272_v48 = vmax.f32 %v5521_v22, 0.0  ;;  %v5714_v39 = vadd.f32 %v3817_v8, %v1001_v31 }
 0x38a   :  { %v4274_v13 = vmax.f32 %v5713_v35, 0.0  ;;  %v4273_v27 = vmax.f32 %v5522_v25, 0.0  ;;  %v2539_v19 = vpop.f32.mrb[120].mxu0  ;;  %v9514_v35 = vpop.permute.xlu1 %1050 }
 0x38b   :  { %v9481_v17 = vmax.f32 %v9385_v57, %v4272_v48  ;;  %v4275_v16 = vmax.f32 %v5714_v39, 0.0  ;;  %v5523_v40 = vadd.f32 %v2539_v19, %v9232_v26  ;;  %v3821_v62 = vpop.f32.mrb[120].mxu1  ;;  %v2541_v15 = vpop.f32.mrb[121].mxu0 }
 0x38c   :  { %v9485_v36 = vmax.f32 %v9389_v59, %v4274_v13  ;;  %v9488_v20 = vmax.f32 %v9392_v7, %v4273_v27  ;;  %v5715_v33 = vadd.f32 %v3821_v62, %v9232_v26  ;;  %v5524_v60 = vadd.f32 %v2541_v15, %v9232_v26  ;;  %v3823_v21 = vpop.f32.mrb[121].mxu1  ;;  %v9520_v19 = vpop.permute.xlu0 %1095 }
 0x38d   :  { %v9493_v41 = vmax.f32 %v9397_v6, %v4275_v16  ;;  %v4276_v57 = vmax.f32 %v5523_v40, 0.0  ;;  %v5716_v51 = vadd.f32 %v3823_v21, %v9232_v26 }
 0x38e   :  { %v4278_v45 = vmax.f32 %v5715_v33, 0.0  ;;  %v4277_v28 = vmax.f32 %v5524_v60, 0.0  ;;  %v2545_v59 = vpop.f32.mrb[122].mxu0 }
 0x38f   :  { %v9499_v1 = vmax.f32 %v9403_v5, %v4276_v57  ;;  %v4279_v7 = vmax.f32 %v5716_v51, 0.0  ;;  %v5525_v31 = vadd.f32 %v2545_v59, %v9250_v43  ;;  %v3827_v34 = vpop.f32.mrb[122].mxu1  ;;  %v2547_v4 = vpop.f32.mrb[123].mxu0 }
 0x390   :  { %v9503_v56 = vmax.f32 %v9407_v29, %v4278_v45  ;;  %v9506_v6 = vmax.f32 %v9410_v55, %v4277_v28  ;;  %v5717_v26 = vadd.f32 %v3827_v34, %v9250_v43  ;;  %v5526_v14 = vadd.f32 %v2547_v4, %v9250_v43  ;;  %v3829_v22 = vpop.f32.mrb[123].mxu1  ;;  %v9538_v59 = vpop.permute.xlu1 %1100 }
 0x391   :  { %v9511_v38 = vmax.f32 %v9415_v32, %v4279_v7  ;;  %v4280_v5 = vmax.f32 %v5525_v31, 0.0  ;;  %v5718_v47 = vadd.f32 %v3829_v22, %v9250_v43 }
 0x392   :  { %v4282_v25 = vmax.f32 %v5717_v26, 0.0  ;;  %v4281_v8 = vmax.f32 %v5526_v14, 0.0  ;;  %v2551_v29 = vpop.f32.mrb[124].mxu0  ;;  %v1026_v14 = vpop.permute.xlu0 %1025 }
 0x393   :  { %v9517_v48 = vmax.f32 %v9421_v2, %v4280_v5  ;;  %v4283_v55 = vmax.f32 %v5718_v47, 0.0  ;;  %v5527_v39 = vadd.f32 %v2551_v29, %v9400_v9  ;;  %v3833_v13 = vpop.f32.mrb[124].mxu1  ;;  %v2553_v27 = vpop.f32.mrb[125].mxu0 }
 0x394   :  { %v9523_v32 = vmax.f32 %v9427_v18, %v4282_v25  ;;  %v9526_v43 = vmax.f32 %v9430_v0, %v4281_v8  ;;  %v5719_v16 = vadd.f32 %v3833_v13, %v9400_v9  ;;  %v5528_v40 = vadd.f32 %v2553_v27, %v9400_v9  ;;  %v3835_v62 = vpop.f32.mrb[125].mxu1 }
 0x395   :  { %v9531_v2 = vmax.f32 %v9435_v49, %v4283_v55  ;;  %v4284_v15 = vmax.f32 %v5527_v39, 0.0  ;;  %v5720_v33 = vadd.f32 %v3835_v62, %v9400_v9 }
 0x396   :  { %v4286_v60 = vmax.f32 %v5719_v16, 0.0  ;;  %v4285_v21 = vmax.f32 %v5528_v40, 0.0  ;;  %v2557_v57 = vpop.f32.mrb[126].mxu0 }
 0x397   :  { %v9535_v18 = vmax.f32 %v9439_v54, %v4284_v15  ;;  %v4287_v51 = vmax.f32 %v5720_v33, 0.0  ;;  %v5529_v0 = vadd.f32 %v2557_v57, %v9418_v42  ;;  %v3839_v45 = vpop.f32.mrb[126].mxu1  ;;  %v2559_v28 = vpop.f32.mrb[127].mxu0 }
 0x398   :  { %v9541_v7 = vmax.f32 %v9445_v53, %v4286_v60  ;;  %v9544_v49 = vmax.f32 %v9448_v12, %v4285_v21  ;;  %v5721_v9 = vadd.f32 %v3839_v45, %v9418_v42  ;;  %v5530_v31 = vadd.f32 %v2559_v28, %v9418_v42  ;;  %v3841_v34 = vpop.f32.mrb[127].mxu1 }
 0x399   :  { %v9549_v54 = vmax.f32 %v9453_v63, %v4287_v51  ;;  %v4288_v4 = vmax.f32 %v5529_v0, 0.0  ;;  %v5722_v26 = vadd.f32 %v3841_v34, %v9418_v42 }
 0x39a   :  { %v4290_v22 = vmax.f32 %v5721_v9, 0.0  ;;  %v4289_v5 = vmax.f32 %v5530_v31, 0.0  ;;  %v2563_v47 = vpop.f32.mrb[128].mxu0 }
 0x39b   :  { %v9553_v53 = vmax.f32 %v9457_v23, %v4288_v4  ;;  %v4291_v12 = vmax.f32 %v5722_v26, 0.0  ;;  %v5531_v25 = vadd.f32 %v2563_v47, %v1026_v14  ;;  %v3845_v8 = vpop.f32.mrb[128].mxu1  ;;  %v2565_v29 = vpop.f32.mrb[129].mxu0  ;;  %v6202_v47 = vmov 0.0  }
 0x39c   :  { %v9556_v55 = vmax.f32 %v9460_v30, %v4290_v22  ;;  %v9559_v63 = vmax.f32 %v9463_v44, %v4289_v5  ;;  %v5723_v39 = vadd.f32 %v3845_v8, %v1026_v14  ;;  %v5532_v13 = vadd.f32 %v2565_v29, %v1026_v14  ;;  %v3847_v42 = vpop.f32.mrb[129].mxu1  ;;  %v1031_v23 = vpop.permute.xlu1 %1030  ;;  %4859 = vmatprep.mubr.f32.mxu0 %v6202_v47 }
 0x39d   :  { %v9562_v27 = vmax.f32 %v9466_v52, %v4291_v12  ;;  %v4292_v16 = vmax.f32 %v5531_v25, 0.0  ;;  %v5724_v40 = vadd.f32 %v3847_v42, %v1026_v14  ;;  %4930 = vmatprep.mubr.f32.mxu1 %v6202_v47  ;;  %v9592_v42 = vpop.permute.xlu0 %1075 }
 0x39e   :  { %v4294_v62 = vmax.f32 %v5723_v39, 0.0  ;;  %v4293_v15 = vmax.f32 %v5532_v13, 0.0  ;;  %v2569_v33 = vpop.f32.mrb[130].mxu0 }
 0x39f   :  { %v9565_v60 = vmax.f32 %v9469_v46, %v4292_v16  ;;  %v4295_v30 = vmax.f32 %v5724_v40, 0.0  ;;  %v5533_v21 = vadd.f32 %v2569_v33, %v1031_v23  ;;  %v3851_v57 = vpop.f32.mrb[130].mxu1  ;;  %v2571_v44 = vpop.f32.mrb[131].mxu0 }
 0x3a0   :  { %v9568_v51 = vmax.f32 %v9472_v10, %v4294_v62  ;;  %v9571_v0 = vmax.f32 %v9475_v58, %v4293_v15  ;;  %v5725_v52 = vadd.f32 %v3851_v57, %v1031_v23  ;;  %v5534_v45 = vadd.f32 %v2571_v44, %v1031_v23  ;;  %v3853_v28 = vpop.f32.mrb[131].mxu1 }
 0x3a1   :  { %v9574_v9 = vmax.f32 %v9478_v37, %v4295_v30  ;;  %v4296_v31 = vmax.f32 %v5533_v21, 0.0  ;;  %v5726_v34 = vadd.f32 %v3853_v28, %v1031_v23 }
 0x3a2   :  { %v4298_v46 = vmax.f32 %v5725_v52, 0.0  ;;  %v4297_v4 = vmax.f32 %v5534_v45, 0.0  ;;  %v2575_v26 = vpop.f32.mrb[132].mxu0  ;;  %v9610_v45 = vpop.permute.xlu1 %1080 }
 0x3a3   :  { %v9577_v14 = vmax.f32 %v9481_v17, %v4296_v31  ;;  %v4299_v22 = vmax.f32 %v5726_v34, 0.0  ;;  %v5535_v10 = vadd.f32 %v2575_v26, %v9328_v3  ;;  %v3857_v5 = vpop.f32.mrb[132].mxu1  ;;  %v2577_v58 = vpop.f32.mrb[133].mxu0 }
 0x3a4   :  { %v9581_v12 = vmax.f32 %v9485_v36, %v4298_v46  ;;  %v9584_v37 = vmax.f32 %v9488_v20, %v4297_v4  ;;  %v5727_v25 = vadd.f32 %v3857_v5, %v9328_v3  ;;  %v5536_v8 = vadd.f32 %v2577_v58, %v9328_v3  ;;  %v3859_v17 = vpop.f32.mrb[133].mxu1 }
 0x3a5   :  { %v9589_v29 = vmax.f32 %v9493_v41, %v4299_v22  ;;  %v4300_v39 = vmax.f32 %v5535_v10, 0.0  ;;  %v5728_v13 = vadd.f32 %v3859_v17, %v9328_v3  ;;  %v9616_v22 = vpop.permute.xlu0 %1125 }
 0x3a6   :  { %v4302_v16 = vmax.f32 %v5727_v25, 0.0  ;;  %v4301_v40 = vmax.f32 %v5536_v8, 0.0  ;;  %v2581_v36 = vpop.f32.mrb[134].mxu0 }
 0x3a7   :  { %v9595_v23 = vmax.f32 %v9499_v1, %v4300_v39  ;;  %v4303_v20 = vmax.f32 %v5728_v13, 0.0  ;;  %v5537_v62 = vadd.f32 %v2581_v36, %v9346_v61  ;;  %v3863_v15 = vpop.f32.mrb[134].mxu1  ;;  %v2583_v33 = vpop.f32.mrb[135].mxu0 }
 0x3a8   :  { %v9599_v30 = vmax.f32 %v9503_v56, %v4302_v16  ;;  %v9602_v41 = vmax.f32 %v9506_v6, %v4301_v40  ;;  %v5729_v3 = vadd.f32 %v3863_v15, %v9346_v61  ;;  %v5538_v21 = vadd.f32 %v2583_v33, %v9346_v61  ;;  %v3865_v57 = vpop.f32.mrb[135].mxu1  ;;  %v9634_v36 = vpop.permute.xlu1 %1130 }
 0x3a9   :  { %v9607_v44 = vmax.f32 %v9511_v38, %v4303_v20  ;;  %v4304_v1 = vmax.f32 %v5537_v62, 0.0  ;;  %v5730_v52 = vadd.f32 %v3865_v57, %v9346_v61 }
 0x3aa   :  { %v4306_v28 = vmax.f32 %v5729_v3, 0.0  ;;  %v4305_v31 = vmax.f32 %v5538_v21, 0.0  ;;  %v2587_v56 = vpop.f32.mrb[136].mxu0  ;;  %v1056_v21 = vpop.permute.xlu0 %1055 }
 0x3ab   :  { %v9613_v34 = vmax.f32 %v9517_v48, %v4304_v1  ;;  %v4307_v6 = vmax.f32 %v5730_v52, 0.0  ;;  %v5539_v46 = vadd.f32 %v2587_v56, %v9496_v24  ;;  %v3869_v4 = vpop.f32.mrb[136].mxu1  ;;  %v2589_v26 = vpop.f32.mrb[137].mxu0 }
 0x3ac   :  { %v9619_v38 = vmax.f32 %v9523_v32, %v4306_v28  ;;  %v9622_v61 = vmax.f32 %v9526_v43, %v4305_v31  ;;  %v5731_v10 = vadd.f32 %v3869_v4, %v9496_v24  ;;  %v5540_v5 = vadd.f32 %v2589_v26, %v9496_v24  ;;  %v3871_v58 = vpop.f32.mrb[137].mxu1 }
 0x3ad   :  { %v9627_v48 = vmax.f32 %v9531_v2, %v4307_v6  ;;  %v4308_v47 = vmax.f32 %v5539_v46, 0.0  ;;  %v5732_v25 = vadd.f32 %v3871_v58, %v9496_v24 }
 0x3ae   :  { %v4310_v8 = vmax.f32 %v5731_v10, 0.0  ;;  %v4309_v17 = vmax.f32 %v5540_v5, 0.0  ;;  %v2593_v39 = vpop.f32.mrb[138].mxu0 }
 0x3af   :  { %v9631_v32 = vmax.f32 %v9535_v18, %v4308_v47  ;;  %v4311_v13 = vmax.f32 %v5732_v25, 0.0  ;;  %v5541_v43 = vadd.f32 %v2593_v39, %v9514_v35  ;;  %v3875_v16 = vpop.f32.mrb[138].mxu1  ;;  %v2595_v40 = vpop.f32.mrb[139].mxu0 }
 0x3b0   :  { %v9637_v20 = vmax.f32 %v9541_v7, %v4310_v8  ;;  %v9640_v2 = vmax.f32 %v9544_v49, %v4309_v17  ;;  %v5733_v24 = vadd.f32 %v3875_v16, %v9514_v35  ;;  %v5542_v62 = vadd.f32 %v2595_v40, %v9514_v35  ;;  %v3877_v15 = vpop.f32.mrb[139].mxu1 }
 0x3b1   :  { %v9645_v18 = vmax.f32 %v9549_v54, %v4311_v13  ;;  %v4312_v33 = vmax.f32 %v5541_v43, 0.0  ;;  %v5734_v3 = vadd.f32 %v3877_v15, %v9514_v35 }
 0x3b2   :  { %v4314_v57 = vmax.f32 %v5733_v24, 0.0  ;;  %v4313_v1 = vmax.f32 %v5542_v62, 0.0  ;;  %v2599_v52 = vpop.f32.mrb[140].mxu0 }
 0x3b3   :  { %v9649_v7 = vmax.f32 %v9553_v53, %v4312_v33  ;;  %v4315_v49 = vmax.f32 %v5734_v3, 0.0  ;;  %v5543_v28 = vadd.f32 %v2599_v52, %v1056_v21  ;;  %v3881_v31 = vpop.f32.mrb[140].mxu1  ;;  %v2601_v56 = vpop.f32.mrb[141].mxu0 }
 0x3b4   :  { %v9652_v6 = vmax.f32 %v9556_v55, %v4314_v57  ;;  %v9655_v54 = vmax.f32 %v9559_v63, %v4313_v1  ;;  %v5735_v46 = vadd.f32 %v3881_v31, %v1056_v21  ;;  %v5544_v4 = vadd.f32 %v2601_v56, %v1056_v21  ;;  %v3883_v35 = vpop.f32.mrb[141].mxu1  ;;  %v1061_v53 = vpop.permute.xlu1 %1060 }
 0x3b5   :  { %v9658_v26 = vmax.f32 %v9562_v27, %v4315_v49  ;;  %v4316_v10 = vmax.f32 %v5543_v28, 0.0  ;;  %v5736_v5 = vadd.f32 %v3883_v35, %v1056_v21 }
 0x3b6   :  { %v4318_v58 = vmax.f32 %v5735_v46, 0.0  ;;  %v4317_v47 = vmax.f32 %v5544_v4, 0.0  ;;  %v2605_v25 = vpop.f32.mrb[142].mxu0  ;;  %v9688_v4 = vpop.permute.xlu0 %1105 }
 0x3b7   :  { %v9661_v8 = vmax.f32 %v9565_v60, %v4316_v10  ;;  %v4319_v55 = vmax.f32 %v5736_v5, 0.0  ;;  %v5545_v17 = vadd.f32 %v2605_v25, %v1061_v53  ;;  %v3887_v39 = vpop.f32.mrb[142].mxu1  ;;  %v2607_v63 = vpop.f32.mrb[143].mxu0 }
 0x3b8   :  { %v9664_v13 = vmax.f32 %v9568_v51, %v4318_v58  ;;  %v9667_v43 = vmax.f32 %v9571_v0, %v4317_v47  ;;  %v5737_v27 = vadd.f32 %v3887_v39, %v1061_v53  ;;  %v5546_v16 = vadd.f32 %v2607_v63, %v1061_v53  ;;  %v3889_v40 = vpop.f32.mrb[143].mxu1 }
 0x3b9   :  { %v9670_v24 = vmax.f32 %v9574_v9, %v4319_v55  ;;  %v4320_v62 = vmax.f32 %v5545_v17, 0.0  ;;  %v5738_v15 = vadd.f32 %v3889_v40, %v1061_v53 }
 0x3ba   :  { %v4322_v60 = vmax.f32 %v5737_v27, 0.0  ;;  %v4321_v33 = vmax.f32 %v5546_v16, 0.0  ;;  %v2611_v3 = vpop.f32.mrb[144].mxu0  ;;  %v9706_v27 = vpop.permute.xlu1 %1110 }
 0x3bb   :  { %v9673_v21 = vmax.f32 %v9577_v14, %v4320_v62  ;;  %v4323_v57 = vmax.f32 %v5738_v15, 0.0  ;;  %v5547_v51 = vadd.f32 %v2611_v3, %v9424_v11  ;;  %v3893_v1 = vpop.f32.mrb[144].mxu1  ;;  %v2613_v0 = vpop.f32.mrb[145].mxu0 }
 0x3bc   :  { %v9677_v52 = vmax.f32 %v9581_v12, %v4322_v60  ;;  %v9680_v49 = vmax.f32 %v9584_v37, %v4321_v33  ;;  %v5739_v9 = vadd.f32 %v3893_v1, %v9424_v11  ;;  %v5548_v28 = vadd.f32 %v2613_v0, %v9424_v11  ;;  %v3895_v31 = vpop.f32.mrb[145].mxu1  ;;  %v9712_v3 = vpop.permute.xlu0 %1155 }
 0x3bd   :  { %v9685_v56 = vmax.f32 %v9589_v29, %v4323_v57  ;;  %v4324_v14 = vmax.f32 %v5547_v51, 0.0  ;;  %v5740_v46 = vadd.f32 %v3895_v31, %v9424_v11 }
 0x3be   :  { %v4326_v35 = vmax.f32 %v5739_v9, 0.0  ;;  %v4325_v10 = vmax.f32 %v5548_v28, 0.0  ;;  %v2617_v12 = vpop.f32.mrb[146].mxu0 }
 0x3bf   :  { %v9691_v5 = vmax.f32 %v9595_v23, %v4324_v14  ;;  %v4327_v37 = vmax.f32 %v5740_v46, 0.0  ;;  %v5549_v53 = vadd.f32 %v2617_v12, %v9442_v50  ;;  %v3899_v58 = vpop.f32.mrb[146].mxu1  ;;  %v2619_v47 = vpop.f32.mrb[147].mxu0 }
 0x3c0   :  { %v9695_v25 = vmax.f32 %v9599_v30, %v4326_v35  ;;  %v9698_v29 = vmax.f32 %v9602_v41, %v4325_v10  ;;  %v5741_v11 = vadd.f32 %v3899_v58, %v9442_v50  ;;  %v5550_v55 = vadd.f32 %v2619_v47, %v9442_v50  ;;  %v3901_v17 = vpop.f32.mrb[147].mxu1  ;;  %v9730_v12 = vpop.permute.xlu1 %1160 }
 0x3c1   :  { %v9703_v39 = vmax.f32 %v9607_v44, %v4327_v37  ;;  %v4328_v23 = vmax.f32 %v5549_v53, 0.0  ;;  %v5742_v63 = vadd.f32 %v3901_v17, %v9442_v50 }
 0x3c2   :  { %v4330_v16 = vmax.f32 %v5741_v11, 0.0  ;;  %v4329_v40 = vmax.f32 %v5550_v55, 0.0  ;;  %v2623_v30 = vpop.f32.mrb[148].mxu0  ;;  %v1086_v55 = vpop.permute.xlu0 %1085 }
 0x3c3   :  { %v9709_v62 = vmax.f32 %v9613_v34, %v4328_v23  ;;  %v4331_v41 = vmax.f32 %v5742_v63, 0.0  ;;  %v5551_v15 = vadd.f32 %v2623_v30, %v9592_v42  ;;  %v3905_v60 = vpop.f32.mrb[148].mxu1  ;;  %v2625_v33 = vpop.f32.mrb[149].mxu0 }
 0x3c4   :  { %v9715_v44 = vmax.f32 %v9619_v38, %v4330_v16  ;;  %v9718_v50 = vmax.f32 %v9622_v61, %v4329_v40  ;;  %v5743_v57 = vadd.f32 %v3905_v60, %v9592_v42  ;;  %v5552_v51 = vadd.f32 %v2625_v33, %v9592_v42  ;;  %v3907_v1 = vpop.f32.mrb[149].mxu1 }
 0x3c5   :  { %v9723_v34 = vmax.f32 %v9627_v48, %v4331_v41  ;;  %v4332_v0 = vmax.f32 %v5551_v15, 0.0  ;;  %v5744_v9 = vadd.f32 %v3907_v1, %v9592_v42 }
 0x3c6   :  { %v4334_v28 = vmax.f32 %v5743_v57, 0.0  ;;  %v4333_v31 = vmax.f32 %v5552_v51, 0.0  ;;  %v2629_v14 = vpop.f32.mrb[150].mxu0 }
 0x3c7   :  { %v9727_v38 = vmax.f32 %v9631_v32, %v4332_v0  ;;  %v4335_v46 = vmax.f32 %v5744_v9, 0.0  ;;  %v5553_v61 = vadd.f32 %v2629_v14, %v9610_v45  ;;  %v3911_v35 = vpop.f32.mrb[150].mxu1  ;;  %v2631_v10 = vpop.f32.mrb[151].mxu0 }
 0x3c8   :  { %v9733_v37 = vmax.f32 %v9637_v20, %v4334_v28  ;;  %v9736_v48 = vmax.f32 %v9640_v2, %v4333_v31  ;;  %v5745_v42 = vadd.f32 %v3911_v35, %v9610_v45  ;;  %v5554_v53 = vadd.f32 %v2631_v10, %v9610_v45  ;;  %v3913_v58 = vpop.f32.mrb[151].mxu1 }
 0x3c9   :  { %v9741_v32 = vmax.f32 %v9645_v18, %v4335_v46  ;;  %v4336_v47 = vmax.f32 %v5553_v61, 0.0  ;;  %v5746_v11 = vadd.f32 %v3913_v58, %v9610_v45 }
 0x3ca   :  { %v4338_v17 = vmax.f32 %v5745_v42, 0.0  ;;  %v4337_v23 = vmax.f32 %v5554_v53, 0.0  ;;  %v2635_v63 = vpop.f32.mrb[152].mxu0 }
 0x3cb   :  { %v9745_v20 = vmax.f32 %v9649_v7, %v4336_v47  ;;  %v4339_v2 = vmax.f32 %v5746_v11, 0.0  ;;  %v5555_v16 = vadd.f32 %v2635_v63, %v1086_v55  ;;  %v3917_v40 = vpop.f32.mrb[152].mxu1  ;;  %v2637_v30 = vpop.f32.mrb[153].mxu0 }
 0x3cc   :  { %v9748_v41 = vmax.f32 %v9652_v6, %v4338_v17  ;;  %v9751_v18 = vmax.f32 %v9655_v54, %v4337_v23  ;;  %v5747_v15 = vadd.f32 %v3917_v40, %v1086_v55  ;;  %v5556_v60 = vadd.f32 %v2637_v30, %v1086_v55  ;;  %v3919_v45 = vpop.f32.mrb[153].mxu1  ;;  %v1091_v7 = vpop.permute.xlu1 %1090 }
 0x3cd   :  { %v9754_v33 = vmax.f32 %v9658_v26, %v4339_v2  ;;  %v4340_v57 = vmax.f32 %v5555_v16, 0.0  ;;  %v5748_v51 = vadd.f32 %v3919_v45, %v1086_v55 }
 0x3ce   :  { %v4342_v1 = vmax.f32 %v5747_v15, 0.0  ;;  %v4341_v0 = vmax.f32 %v5556_v60, 0.0  ;;  %v2641_v9 = vpop.f32.mrb[154].mxu0 }
 0x3cf   :  { %v9757_v28 = vmax.f32 %v9661_v8, %v4340_v57  ;;  %v4343_v6 = vmax.f32 %v5748_v51, 0.0  ;;  %v5557_v31 = vadd.f32 %v2641_v9, %v1091_v7  ;;  %v3923_v14 = vpop.f32.mrb[154].mxu1  ;;  %v2643_v54 = vpop.f32.mrb[155].mxu0 }
 0x3d0   :  { %v9760_v46 = vmax.f32 %v9664_v13, %v4342_v1  ;;  %v9763_v61 = vmax.f32 %v9667_v43, %v4341_v0  ;;  %v5749_v26 = vadd.f32 %v3923_v14, %v1091_v7  ;;  %v5558_v35 = vadd.f32 %v2643_v54, %v1091_v7  ;;  %v3925_v10 = vpop.f32.mrb[155].mxu1 }
 0x3d1   :  { %v9766_v42 = vmax.f32 %v9670_v24, %v4343_v6  ;;  %v4344_v53 = vmax.f32 %v5557_v31, 0.0  ;;  %v5750_v58 = vadd.f32 %v3925_v10, %v1091_v7 }
 0x3d2   :  { %v4346_v8 = vmax.f32 %v5749_v26, 0.0  ;;  %v4345_v47 = vmax.f32 %v5558_v35, 0.0  ;;  %v2647_v11 = vpop.f32.mrb[156].mxu0 }
 0x3d3   :  { %v9769_v55 = vmax.f32 %v9673_v21, %v4344_v53  ;;  %v4347_v17 = vmax.f32 %v5750_v58, 0.0  ;;  %v5559_v13 = vadd.f32 %v2647_v11, %v9520_v19  ;;  %v3929_v23 = vpop.f32.mrb[156].mxu1  ;;  %v2649_v43 = vpop.f32.mrb[157].mxu0 }
 0x3d4   :  { %v9773_v63 = vmax.f32 %v9677_v52, %v4346_v8  ;;  %v9776_v2 = vmax.f32 %v9680_v49, %v4345_v47  ;;  %v5751_v24 = vadd.f32 %v3929_v23, %v9520_v19  ;;  %v5560_v16 = vadd.f32 %v2649_v43, %v9520_v19  ;;  %v3931_v40 = vpop.f32.mrb[157].mxu1  ;;  %v9804_v8 = vpop.permute.xlu0 %1135 }
 0x3d5   :  { %v9781_v30 = vmax.f32 %v9685_v56, %v4347_v17  ;;  %v4348_v21 = vmax.f32 %v5559_v13, 0.0  ;;  %v5752_v15 = vadd.f32 %v3931_v40, %v9520_v19 }
 0x3d6   :  { %v4350_v60 = vmax.f32 %v5751_v24, 0.0  ;;  %v4349_v45 = vmax.f32 %v5560_v16, 0.0  ;;  %v2653_v57 = vpop.f32.mrb[158].mxu0 }
 0x3d7   :  { %v9785_v52 = vmax.f32 %v9691_v5, %v4348_v21  ;;  %v4351_v51 = vmax.f32 %v5752_v15, 0.0  ;;  %v5561_v49 = vadd.f32 %v2653_v57, %v9538_v59  ;;  %v3935_v7 = vpop.f32.mrb[158].mxu1  ;;  %v2655_v1 = vpop.f32.mrb[159].mxu0 }
 0x3d8   :  { %v9789_v0 = vmax.f32 %v9695_v25, %v4350_v60  ;;  %v9792_v56 = vmax.f32 %v9698_v29, %v4349_v45  ;;  %v5753_v9 = vadd.f32 %v3935_v7, %v9538_v59  ;;  %v5562_v19 = vadd.f32 %v2655_v1, %v9538_v59  ;;  %v3937_v6 = vpop.f32.mrb[159].mxu1  ;;  %v9822_v60 = vpop.permute.xlu1 %1140 }
 0x3d9   :  { %v9797_v31 = vmax.f32 %v9703_v39, %v4351_v51  ;;  %v4352_v5 = vmax.f32 %v5561_v49, 0.0  ;;  %v5754_v14 = vadd.f32 %v3937_v6, %v9538_v59  ;;  %v1116_v1 = vpop.permute.xlu0 %1115 }
 0x3da   :  { %v4354_v54 = vmax.f32 %v5753_v9, 0.0  ;;  %v4353_v26 = vmax.f32 %v5562_v19, 0.0  ;;  %v2659_v35 = vpop.f32.mrb[160].mxu0 }
 0x3db   :  { %v9801_v25 = vmax.f32 %v9709_v62, %v4352_v5  ;;  %v4355_v10 = vmax.f32 %v5754_v14, 0.0  ;;  %v5563_v29 = vadd.f32 %v2659_v35, %v9688_v4  ;;  %v3941_v53 = vpop.f32.mrb[160].mxu1  ;;  %v2661_v58 = vpop.f32.mrb[161].mxu0 }
 0x3dc   :  { %v9807_v47 = vmax.f32 %v9715_v44, %v4354_v54  ;;  %v9810_v39 = vmax.f32 %v9718_v50, %v4353_v26  ;;  %v5755_v59 = vadd.f32 %v3941_v53, %v9688_v4  ;;  %v5564_v11 = vadd.f32 %v2661_v58, %v9688_v4  ;;  %v3943_v17 = vpop.f32.mrb[161].mxu1 }
 0x3dd   :  { %v9815_v62 = vmax.f32 %v9723_v34, %v4355_v10  ;;  %v4356_v13 = vmax.f32 %v5563_v29, 0.0  ;;  %v5756_v23 = vadd.f32 %v3943_v17, %v9688_v4 }
 0x3de   :  { %v4358_v43 = vmax.f32 %v5755_v59, 0.0  ;;  %v4357_v24 = vmax.f32 %v5564_v11, 0.0  ;;  %v2665_v16 = vpop.f32.mrb[162].mxu0 }
 0x3df   :  { %v9819_v44 = vmax.f32 %v9727_v38, %v4356_v13  ;;  %v4359_v40 = vmax.f32 %v5756_v23, 0.0  ;;  %v5565_v50 = vadd.f32 %v2665_v16, %v9706_v27  ;;  %v3947_v21 = vpop.f32.mrb[162].mxu1  ;;  %v2667_v15 = vpop.f32.mrb[163].mxu0 }
 0x3e0   :  { %v9825_v45 = vmax.f32 %v9733_v37, %v4358_v43  ;;  %v9828_v34 = vmax.f32 %v9736_v48, %v4357_v24  ;;  %v5757_v4 = vadd.f32 %v3947_v21, %v9706_v27  ;;  %v5566_v57 = vadd.f32 %v2667_v15, %v9706_v27  ;;  %v3949_v51 = vpop.f32.mrb[163].mxu1 }
 0x3e1   :  { %v9833_v38 = vmax.f32 %v9741_v32, %v4359_v40  ;;  %v4360_v49 = vmax.f32 %v5565_v50, 0.0  ;;  %v5758_v7 = vadd.f32 %v3949_v51, %v9706_v27 }
 0x3e2   :  { %v4362_v9 = vmax.f32 %v5757_v4, 0.0  ;;  %v4361_v19 = vmax.f32 %v5566_v57, 0.0  ;;  %v2671_v6 = vpop.f32.mrb[164].mxu0 }
 0x3e3   :  { %v9837_v37 = vmax.f32 %v9745_v20, %v4360_v49  ;;  %v4363_v48 = vmax.f32 %v5758_v7, 0.0  ;;  %v5567_v5 = vadd.f32 %v2671_v6, %v1116_v1  ;;  %v3953_v14 = vpop.f32.mrb[164].mxu1  ;;  %v2673_v54 = vpop.f32.mrb[165].mxu0 }
 0x3e4   :  { %v9840_v26 = vmax.f32 %v9748_v41, %v4362_v9  ;;  %v9843_v32 = vmax.f32 %v9751_v18, %v4361_v19  ;;  %v5759_v35 = vadd.f32 %v3953_v14, %v1116_v1  ;;  %v5568_v10 = vadd.f32 %v2673_v54, %v1116_v1  ;;  %v3955_v27 = vpop.f32.mrb[165].mxu1  ;;  %v1121_v20 = vpop.permute.xlu1 %1120 }
 0x3e5   :  { %v9846_v29 = vmax.f32 %v9754_v33, %v4363_v48  ;;  %v4364_v53 = vmax.f32 %v5567_v5, 0.0  ;;  %v5760_v58 = vadd.f32 %v3955_v27, %v1116_v1 }
 0x3e6   :  { %v4366_v59 = vmax.f32 %v5759_v35, 0.0  ;;  %v4365_v11 = vmax.f32 %v5568_v10, 0.0  ;;  %v2677_v17 = vpop.f32.mrb[166].mxu0 }
 0x3e7   :  { %v9849_v13 = vmax.f32 %v9757_v28, %v4364_v53  ;;  %v4367_v41 = vmax.f32 %v5760_v58, 0.0  ;;  %v5569_v23 = vadd.f32 %v2677_v17, %v1121_v20  ;;  %v3959_v43 = vpop.f32.mrb[166].mxu1  ;;  %v2679_v18 = vpop.f32.mrb[167].mxu0 }
 0x3e8   :  { %v9852_v24 = vmax.f32 %v9760_v46, %v4366_v59  ;;  %v9855_v16 = vmax.f32 %v9763_v61, %v4365_v11  ;;  %v5761_v33 = vadd.f32 %v3959_v43, %v1121_v20  ;;  %v5570_v40 = vadd.f32 %v2679_v18, %v1121_v20  ;;  %v3961_v50 = vpop.f32.mrb[167].mxu1 }
 0x3e9   :  { %v9858_v21 = vmax.f32 %v9766_v42, %v4367_v41  ;;  %v4368_v15 = vmax.f32 %v5569_v23, 0.0  ;;  %v5762_v4 = vadd.f32 %v3961_v50, %v1121_v20 }
 0x3ea   :  { %v4370_v28 = vmax.f32 %v5761_v33, 0.0  ;;  %v4369_v57 = vmax.f32 %v5570_v40, 0.0  ;;  %v2683_v51 = vpop.f32.mrb[168].mxu0 }
 0x3eb   :  { %v9861_v49 = vmax.f32 %v9769_v55, %v4368_v15  ;;  %v4371_v7 = vmax.f32 %v5762_v4, 0.0  ;;  %v5571_v46 = vadd.f32 %v2683_v51, %v9616_v22  ;;  %v3965_v1 = vpop.f32.mrb[168].mxu1  ;;  %v2685_v61 = vpop.f32.mrb[169].mxu0 }
 0x3ec   :  { %v9865_v9 = vmax.f32 %v9773_v63, %v4370_v28  ;;  %v9868_v19 = vmax.f32 %v9776_v2, %v4369_v57  ;;  %v5763_v42 = vadd.f32 %v3965_v1, %v9616_v22  ;;  %v5572_v6 = vadd.f32 %v2685_v61, %v9616_v22  ;;  %v3967_v48 = vpop.f32.mrb[169].mxu1  ;;  %v9896_v15 = vpop.permute.xlu0 %1165 }
 0x3ed   :  { %v9873_v5 = vmax.f32 %v9781_v30, %v4371_v7  ;;  %v4372_v55 = vmax.f32 %v5571_v46, 0.0  ;;  %v5764_v14 = vadd.f32 %v3967_v48, %v9616_v22 }
 0x3ee   :  { %v4374_v54 = vmax.f32 %v5763_v42, 0.0  ;;  %v4373_v35 = vmax.f32 %v5572_v6, 0.0  ;;  %v2689_v10 = vpop.f32.mrb[170].mxu0 }
 0x3ef   :  { %v9877_v63 = vmax.f32 %v9785_v52, %v4372_v55  ;;  %v4375_v27 = vmax.f32 %v5764_v14, 0.0  ;;  %v5573_v2 = vadd.f32 %v2689_v10, %v9634_v36  ;;  %v3971_v53 = vpop.f32.mrb[170].mxu1  ;;  %v2691_v58 = vpop.f32.mrb[171].mxu0 }
 0x3f0   :  { %v9881_v20 = vmax.f32 %v9789_v0, %v4374_v54  ;;  %v9884_v30 = vmax.f32 %v9792_v56, %v4373_v35  ;;  %v5765_v59 = vadd.f32 %v3971_v53, %v9634_v36  ;;  %v5574_v22 = vadd.f32 %v2691_v58, %v9634_v36  ;;  %v3973_v11 = vpop.f32.mrb[171].mxu1  ;;  %v9914_v55 = vpop.permute.xlu1 %1170 }
 0x3f1   :  { %v9889_v17 = vmax.f32 %v9797_v31, %v4375_v27  ;;  %v4376_v52 = vmax.f32 %v5573_v2, 0.0  ;;  %v5766_v41 = vadd.f32 %v3973_v11, %v9634_v36  ;;  %v1146_v2 = vpop.permute.xlu0 %1145 }
 0x3f2   :  { %v4378_v23 = vmax.f32 %v5765_v59, 0.0  ;;  %v4377_v43 = vmax.f32 %v5574_v22, 0.0  ;;  %v2695_v18 = vpop.f32.mrb[172].mxu0 }
 0x3f3   :  { %v9893_v0 = vmax.f32 %v9801_v25, %v4376_v52  ;;  %v4379_v33 = vmax.f32 %v5766_v41, 0.0  ;;  %v5575_v56 = vadd.f32 %v2695_v18, %v9804_v8  ;;  %v3977_v40 = vpop.f32.mrb[172].mxu1  ;;  %v2697_v50 = vpop.f32.mrb[173].mxu0 }
 0x3f4   :  { %v9899_v4 = vmax.f32 %v9807_v47, %v4378_v23  ;;  %v9902_v31 = vmax.f32 %v9810_v39, %v4377_v43  ;;  %v5767_v36 = vadd.f32 %v3977_v40, %v9804_v8  ;;  %v5576_v28 = vadd.f32 %v2697_v50, %v9804_v8  ;;  %v3979_v57 = vpop.f32.mrb[173].mxu1 }
 0x3f5   :  { %v9907_v25 = vmax.f32 %v9815_v62, %v4379_v33  ;;  %v4380_v51 = vmax.f32 %v5575_v56, 0.0  ;;  %v5768_v7 = vadd.f32 %v3979_v57, %v9804_v8 }
 0x3f6   :  { %v4382_v46 = vmax.f32 %v5767_v36, 0.0  ;;  %v4381_v1 = vmax.f32 %v5576_v28, 0.0  ;;  %v2701_v61 = vpop.f32.mrb[174].mxu0 }
 0x3f7   :  { %v9911_v47 = vmax.f32 %v9819_v44, %v4380_v51  ;;  %v4383_v42 = vmax.f32 %v5768_v7, 0.0  ;;  %v5577_v39 = vadd.f32 %v2701_v61, %v9822_v60  ;;  %v3983_v6 = vpop.f32.mrb[174].mxu1  ;;  %v2703_v48 = vpop.f32.mrb[175].mxu0 }
 0x3f8   :  { %v9917_v14 = vmax.f32 %v9825_v45, %v4382_v46  ;;  %v9920_v62 = vmax.f32 %v9828_v34, %v4381_v1  ;;  %v5769_v8 = vadd.f32 %v3983_v6, %v9822_v60  ;;  %v5578_v54 = vadd.f32 %v2703_v48, %v9822_v60  ;;  %v3985_v35 = vpop.f32.mrb[175].mxu1 }
 0x3f9   :  { %v9925_v44 = vmax.f32 %v9833_v38, %v4383_v42  ;;  %v4384_v10 = vmax.f32 %v5577_v39, 0.0  ;;  %v5770_v27 = vadd.f32 %v3985_v35, %v9822_v60 }
 0x3fa   :  { %v4386_v53 = vmax.f32 %v5769_v8, 0.0  ;;  %v4385_v58 = vmax.f32 %v5578_v54, 0.0  ;;  %v2707_v59 = vpop.f32.mrb[176].mxu0 }
 0x3fb   :  { %v9929_v45 = vmax.f32 %v9837_v37, %v4384_v10  ;;  %v4387_v34 = vmax.f32 %v5770_v27, 0.0  ;;  %v5579_v22 = vadd.f32 %v2707_v59, %v1146_v2  ;;  %v3989_v11 = vpop.f32.mrb[176].mxu1  ;;  %v2709_v52 = vpop.f32.mrb[177].mxu0 }
 0x3fc   :  { %v9932_v41 = vmax.f32 %v9840_v26, %v4386_v53  ;;  %v9935_v38 = vmax.f32 %v9843_v32, %v4385_v58  ;;  %v5771_v23 = vadd.f32 %v3989_v11, %v1146_v2  ;;  %v5580_v43 = vadd.f32 %v2709_v52, %v1146_v2  ;;  %v3991_v60 = vpop.f32.mrb[177].mxu1  ;;  %v1151_v37 = vpop.permute.xlu1 %1150 }
 0x3fd   :  { %v9938_v18 = vmax.f32 %v9846_v29, %v4387_v34  ;;  %v4388_v33 = vmax.f32 %v5579_v22, 0.0  ;;  %v5772_v56 = vadd.f32 %v3991_v60, %v1146_v2 }
 0x3fe   :  { %v4390_v40 = vmax.f32 %v5771_v23, 0.0  ;;  %v4389_v50 = vmax.f32 %v5580_v43, 0.0  ;;  %v2713_v36 = vpop.f32.mrb[178].mxu0 }
 0x3ff   :  { %v9941_v28 = vmax.f32 %v9849_v13, %v4388_v33  ;;  %v4391_v26 = vmax.f32 %v5772_v56, 0.0  ;;  %v5581_v57 = vadd.f32 %v2713_v36, %v1151_v37  ;;  %v3995_v51 = vpop.f32.mrb[178].mxu1  ;;  %v2715_v32 = vpop.f32.mrb[179].mxu0 }
 0x400   :  { %v9944_v7 = vmax.f32 %v9852_v24, %v4390_v40  ;;  %v9947_v46 = vmax.f32 %v9855_v16, %v4389_v50  ;;  %v5773_v29 = vadd.f32 %v3995_v51, %v1151_v37  ;;  %v5582_v1 = vadd.f32 %v2715_v32, %v1151_v37  ;;  %v3997_v61 = vpop.f32.mrb[179].mxu1 }
 0x401   :  { %v9950_v42 = vmax.f32 %v9858_v21, %v4391_v26  ;;  %v4392_v39 = vmax.f32 %v5581_v57, 0.0  ;;  %v5774_v6 = vadd.f32 %v3997_v61, %v1151_v37 }
 0x402   :  { %v4394_v13 = vmax.f32 %v5773_v29, 0.0  ;;  %v4393_v48 = vmax.f32 %v5582_v1, 0.0  ;;  %v2719_v8 = vpop.f32.mrb[180].mxu0 }
 0x403   :  { %v9953_v54 = vmax.f32 %v9861_v49, %v4392_v39  ;;  %v4395_v35 = vmax.f32 %v5774_v6, 0.0  ;;  %v5583_v24 = vadd.f32 %v2719_v8, %v9712_v3  ;;  %v4001_v10 = vpop.f32.mrb[180].mxu1  ;;  %v2721_v16 = vpop.f32.mrb[181].mxu0 }
 0x404   :  { %v9957_v27 = vmax.f32 %v9865_v9, %v4394_v13  ;;  %v9960_v2 = vmax.f32 %v9868_v19, %v4393_v48  ;;  %v5775_v21 = vadd.f32 %v4001_v10, %v9712_v3  ;;  %v5584_v53 = vadd.f32 %v2721_v16, %v9712_v3  ;;  %v4003_v58 = vpop.f32.mrb[181].mxu1 }
 0x405   :  { %v9965_v59 = vmax.f32 %v9873_v5, %v4395_v35  ;;  %v4396_v49 = vmax.f32 %v5583_v24, 0.0  ;;  %v5776_v34 = vadd.f32 %v4003_v58, %v9712_v3 }
 0x406   :  { %v4398_v22 = vmax.f32 %v5775_v21, 0.0  ;;  %v4397_v11 = vmax.f32 %v5584_v53, 0.0  ;;  %v2725_v52 = vpop.f32.mrb[182].mxu0 }
 0x407   :  { %v4756_v9 = vmax.f32 %v9877_v63, %v4396_v49  ;;  %v4399_v23 = vmax.f32 %v5776_v34, 0.0  ;;  %v5585_v19 = vadd.f32 %v2725_v52, %v9730_v12  ;;  %v4007_v43 = vpop.f32.mrb[182].mxu1  ;;  %v2727_v60 = vpop.f32.mrb[183].mxu0 }
 0x408   :  { %v4758_v33 = vmax.f32 %v9881_v20, %v4398_v22  ;;  %v4757_v56 = vmax.f32 %v9884_v30, %v4397_v11  ;;  %v5777_v5 = vadd.f32 %v4007_v43, %v9730_v12  ;;  %v5586_v37 = vadd.f32 %v2727_v60, %v9730_v12  ;;  %v4009_v40 = vpop.f32.mrb[183].mxu1 }
 0x409   :  { %v4759_v3 = vmax.f32 %v9889_v17, %v4399_v23  ;;  %v4400_v50 = vmax.f32 %v5585_v19, 0.0  ;;  %v5778_v36 = vadd.f32 %v4009_v40, %v9730_v12  ;;  %v1176_v23 = vpop.permute.xlu0 %1175 }
 0x40a   :  { %v4402_v63 = vmax.f32 %v5777_v5, 0.0  ;;  %v4401_v26 = vmax.f32 %v5586_v37, 0.0  ;;  %v2731_v57 = vpop.f32.mrb[184].mxu0 }
 0x40b   :  { %v4760_v51 = vmax.f32 %v9893_v0, %v4400_v50  ;;  %v4403_v32 = vmax.f32 %v5778_v36, 0.0  ;;  %v5587_v20 = vadd.f32 %v2731_v57, %v9896_v15  ;;  %v4013_v29 = vpop.f32.mrb[184].mxu1  ;;  %v2733_v30 = vpop.f32.mrb[185].mxu0 }
 0x40c   :  { %v4762_v1 = vmax.f32 %v9899_v4, %v4402_v63  ;;  %v4761_v61 = vmax.f32 %v9902_v31, %v4401_v26  ;;  %v5779_v39 = vadd.f32 %v4013_v29, %v9896_v15  ;;  %v5588_v17 = vadd.f32 %v2733_v30, %v9896_v15  ;;  %v4015_v6 = vpop.f32.mrb[185].mxu1  ;;  %v1181_v57 = vpop.permute.xlu1 %1180 }
 0x40d   :  { %v5381_v12 = vpack.c.bf16 %v4760_v51, %v4756_v9  ;;  %v4763_v13 = vmax.f32 %v9907_v25, %v4403_v32  ;;  %v4404_v48 = vmax.f32 %v5587_v20, 0.0  ;;  %v5780_v0 = vadd.f32 %v4015_v6, %v9896_v15 }
 0x40e   :  { %v5393_v8 = vpack.c.bf16 %v4762_v1, %v4758_v33  ;;  %v4406_v35 = vmax.f32 %v5779_v39, 0.0  ;;  %v4405_v24 = vmax.f32 %v5588_v17, 0.0  ;;  %v2737_v10 = vpop.f32.mrb[186].mxu0  ;;  %v5379_v16 = vpack.c.bf16 %v4761_v61, %v4757_v56 }
 0x40f   :  { %v4764_v4 = vmax.f32 %v9911_v47, %v4404_v48  ;;  %v4407_v21 = vmax.f32 %v5780_v0, 0.0  ;;  %v5589_v31 = vadd.f32 %v2737_v10, %v9914_v55  ;;  %v4019_v53 = vpop.f32.mrb[186].mxu1  ;;  %v2739_v58 = vpop.f32.mrb[187].mxu0  ;;  %v5391_v49 = vpack.c.bf16 %v4763_v13, %v4759_v3 }
 0x410   :  { %v4766_v34 = vmax.f32 %v9917_v14, %v4406_v35  ;;  %v4765_v25 = vmax.f32 %v9920_v62, %v4405_v24  ;;  %v5781_v22 = vadd.f32 %v4019_v53, %v9914_v55  ;;  %v5590_v15 = vadd.f32 %v2739_v58, %v9914_v55  ;;  %v4021_v11 = vpop.f32.mrb[187].mxu1  ;;  %5380 = vmatprep.subr.bf16.mxu0 %v5379_v16  ;;  %v4780_v53 = vld [vmem:[%s10022_s3] sm:$0x1]  ;;  %s6204_s3 = smov [#allocation3]  }
 0x411   :  { %v4767_v52 = vmax.f32 %v9925_v44, %v4407_v21  ;;  %v4408_v9 = vmax.f32 %v5589_v31, 0.0  ;;  %v5782_v47 = vadd.f32 %v4021_v11, %v9914_v55  ;;  %5392 = vmatprep.subr.bf16.mxu1 %v5391_v49  ;;  %5382 = vmatpush1.bf16.msra.mxu0 %v5381_v12  ;;  %s4977_s20 = sshll.u32 %s6204_s3, 4  ;;  %s4978_s20 = int_to_ptr.vmem [resolvable:$true] %s4977_s20 }
 0x412   :  { %v4410_v19 = vmax.f32 %v5781_v22, 0.0  ;;  %v4409_v43 = vmax.f32 %v5590_v15, 0.0  ;;  %5394 = vmatpush1.bf16.msra.mxu1 %v5393_v8  ;;  %v2743_v14 = vpop.f32.mrb[188].mxu0  ;;  %s6177_s21 = scalar_lea.vmem %s4978_s20, 64  ;;  %p6182_p1 = scmp.lt.s32.totalorder %s4978_s20, %s4978_s20 }
 0x413   :  { %v4768_v62 = vmax.f32 %v9929_v45, %v4408_v9  ;;  %v4411_v60 = vmax.f32 %v5782_v47, 0.0  ;;  %v5591_v33 = vadd.f32 %v2743_v14, %v1176_v23  ;;  %v4025_v56 = vpop.f32.mrb[188].mxu1  ;;  %v2745_v5 = vpop.f32.mrb[189].mxu0  ;;  %p6178_p0 = scmp.ne.s32.totalorder %s4978_s20, %s6177_s21  ;;  %p6183_p2 = scmp.lt.s32.totalorder %s6177_s21, %s6177_s21 }
 0x414   :  { %v4770_v37 = vmax.f32 %v9932_v41, %v4410_v19  ;;  %v4769_v44 = vmax.f32 %v9935_v38, %v4409_v43  ;;  %v5783_v40 = vadd.f32 %v4025_v56, %v1176_v23  ;;  %v5592_v3 = vadd.f32 %v2745_v5, %v1176_v23  ;;  %v4027_v55 = vpop.f32.mrb[189].mxu1 }
 0x415   :  { %v5385_v50 = vpack.c.bf16 %v4768_v62, %v4764_v4  ;;  %v4771_v36 = vmax.f32 %v9938_v18, %v4411_v60  ;;  %v4412_v63 = vmax.f32 %v5591_v33, 0.0  ;;  %v5784_v26 = vadd.f32 %v4027_v55, %v1176_v23  ;;  %p6184_p3 = por %p6183_p2, %p6182_p1 }
 0x416   :  { %v5397_v51 = vpack.c.bf16 %v4770_v37, %v4766_v34  ;;  %v4414_v32 = vmax.f32 %v5783_v40, 0.0  ;;  %v4413_v45 = vmax.f32 %v5592_v3, 0.0  ;;  %v2749_v20 = vpop.f32.mrb[190].mxu0  ;;  %v5383_v29 = vpack.c.bf16 %v4769_v44, %v4765_v25 }
 0x417   :  { %v4772_v30 = vmax.f32 %v9941_v28, %v4412_v63  ;;  %v4415_v1 = vmax.f32 %v5784_v26, 0.0  ;;  %v5593_v41 = vadd.f32 %v2749_v20, %v1181_v57  ;;  %v4031_v61 = vpop.f32.mrb[190].mxu1  ;;  %v2751_v38 = vpop.f32.mrb[191].mxu0  ;;  %v5395_v39 = vpack.c.bf16 %v4771_v36, %v4767_v52  ;;  %p6185_p4 = pnand %p6184_p3, %p6178_p0 }
 0x418   :  { %v4774_v17 = vmax.f32 %v9944_v7, %v4414_v32  ;;  %v4773_v6 = vmax.f32 %v9947_v46, %v4413_v45  ;;  %v5785_v18 = vadd.f32 %v4031_v61, %v1181_v57  ;;  %v5594_v12 = vadd.f32 %v2751_v38, %v1181_v57  ;;  %v4033_v13 = vpop.f32.mrb[191].mxu1  ;;  %5384 = vmatprep.subr.bf16.mxu0 %v5383_v29 }
 0x419   :  { %v4775_v48 = vmax.f32 %v9950_v42, %v4415_v1  ;;  %v4416_v0 = vmax.f32 %v5593_v41, 0.0  ;;  %v5786_v8 = vadd.f32 %v4033_v13, %v1181_v57  ;;  %5396 = vmatprep.subr.bf16.mxu1 %v5395_v39  ;;  %5386 = vmatpush1.bf16.msra.mxu0 %v5385_v50 }
 0x41a   :  { %v4418_v28 = vmax.f32 %v5785_v18, 0.0  ;;  %v4417_v35 = vmax.f32 %v5594_v12, 0.0  ;;  %5398 = vmatpush1.bf16.msra.mxu1 %v5397_v51 }
 0x41b   :  { %v4776_v24 = vmax.f32 %v9953_v54, %v4416_v0  ;;  %v4419_v10 = vmax.f32 %v5786_v8, 0.0  ;;  %v4787_v54 = vlaneseq }
 0x41c   :  { %v4778_v7 = vmax.f32 %v9957_v27, %v4418_v28  ;;  %v4777_v46 = vmax.f32 %v9960_v2, %v4417_v35  ;;  %v6203_v2 = vmov 1966171168  }
 0x41d   :  { %v5389_v16 = vpack.c.bf16 %v4776_v24, %v4772_v30  ;;  %v4779_v4 = vmax.f32 %v9965_v59, %v4419_v10  ;;  %v4788_v27 = vshrl.u32 %v4787_v54, 7  ;;  %v4944_v58 = vunpack.c.l.s4 %v6203_v2  ;;  %v4785_v59 = vpop.permute.xlu0 %4784 }
 0x41e   :  { %v5401_v21 = vpack.c.bf16 %v4778_v7, %v4774_v17  ;;  %v5387_v31 = vpack.c.bf16 %v4777_v46, %v4773_v6  ;;  %vm4968_vm2 = vcmp.lt.s32.totalorder %v4787_v54, 512 }
 0x41f   :  { %v5399_v42 = vpack.c.bf16 %v4779_v4, %v4775_v48  ;;  %v4789_v49 = vsub.s32 0, %v4788_v27  ;;  %v4945_v34 = vunpack.c.0.s8 %v4944_v58 }
 0x420   :  { %5388 = vmatprep.subr.bf16.mxu0 %v5387_v31 }
 0x421   :  { %5400 = vmatprep.subr.bf16.mxu1 %v5399_v42  ;;  %5390 = vmatpush1.bf16.msra.mxu0 %v5389_v16  ;;  %v4790_v25 = vrot.slane %v4785_v59, %v4789_v49  ;;  %v4948_v9 = vsub.s32 %v4945_v34, %v4788_v27 }
 0x422   :  { %5402 = vmatpush1.bf16.msra.mxu1 %v5401_v21 }
 0x424   :  { %5177 = vmatmul.mubr.msk.f32.vlgmr.msra.gmra.mrb[192].mxu0 %vm4791_vm1, %v4780_v53 }
 0x425   :  { %5178 = vmatmul.mubr.msk.f32.vlgmr.msra.gmra.mrb[192].mxu1 %vm4791_vm1, %v4780_v53 }
 0x4f7   :  { %v4861_v22 = vpop.f32.mrb[192].mxu0 }
 0x4f8   :  { %v4862_v15 = vadd.f32 %v4861_v22, %v4790_v25  ;;  %v4932_v11 = vpop.f32.mrb[192].mxu1  ;;  %v4863_v52 = vpop.f32.mrb[193].mxu0 }
 0x4f9   :  { %v4933_v47 = vadd.f32 %v4932_v11, %v4790_v25  ;;  %v4864_v23 = vadd.f32 %v4863_v52, %v4790_v25  ;;  %v4934_v19 = vpop.f32.mrb[193].mxu1 }
 0x4fa   :  { %v4935_v43 = vadd.f32 %v4934_v19, %v4790_v25 }
 0x4fb   :  { %v4941_v14 = vcombine.low %v4862_v15, %v4864_v23 }
 0x4fc   :  { %v4942_v62 = vcombine.low %v4933_v47, %v4935_v43 }
 0x4fd   :  { %v4949_v60 = vrot.slane %v4941_v14, %v4948_v9 }
 0x4fe   :  { %v4956_v33 = vrot.slane %v4942_v62, %v4948_v9 }
 0x500   :  { %v4957_v56 = vcombine.low %v4949_v60, %v4956_v33 }
 0x502   :  { %v4964_v5 = vrot.slane %v4957_v56, %v4948_v9 }
 0x504   :  { %4970 = vst.msk [vmem:[#allocation3] sm:$0xf] %vm4968_vm2, %v4964_v5 }
 0x505   :  { %6188 = shalt.err (!%p6185_p4)
}
 0x506   :  { %s6189_s24 = scalar_lea.hbm %s10024_s5, 64 }
 0x507   :  { %p6190_p5 = scmp.ne.s32.totalorder %s10024_s5, %s6189_s24  ;;  %p6193_p6 = scmp.lt.u32.totalorder %s6189_s24, %s10024_s5 }
 0x509   :  { %p6195_p7 = pnand %p6193_p6, %p6190_p5 }
 0x50b   :  { %6198 = shalt.err (!%p6195_p7)
}
 0x50c   :  { %4980 = dma.vmem_to_hbm [thread:$0]  %s4978_s20, 64, %s10024_s5, [#allocation4]  }
 0x50d   :  { %6199 = dma.done.wait [#allocation4], 64  }
 0x50e   :  { %6200 = vsyncadd [#allocation4], 4294967232 }
 0x50f   :  { %4984 = vsyncpa [#allocation4], 1 }

</bundles_post_ra>
